<compile_context>
chip_gen: v7x
topology: tpu7x:2x2x1
jax: 0.10.0
libtpu: 0.0.40
codegen_flags: <defaults>
</compile_context>

<pallas_src>
import functools

import jax
import jax.numpy as jnp
from jax.experimental import pallas as pl
from jax.experimental.pallas import tpu as pltpu


def _gelu(x):
    # TODO(synk): torch nn.GELU default is the exact erf form; the tanh
    # approximation is used for Mosaic-safe lowering (max abs diff ~1e-3).
    return jax.nn.gelu(x, approximate=True)


def _ln(x, g, b, eps=1e-5):
    mean = jnp.mean(x, axis=-1, keepdims=True)
    xc = x - mean
    var = jnp.mean(xc * xc, axis=-1, keepdims=True)
    return xc * jax.lax.rsqrt(var + eps) * g + b


def _bf16(x):
    return x.astype(jnp.bfloat16)


def _largest_divisor_leq(n, cap):
    for d in range(min(n, max(cap, 1)), 0, -1):
        if n % d == 0:
            return d
    return 1


def _full_spec(a):
    n = a.ndim
    return pl.BlockSpec(a.shape, lambda: (0,) * n)


# --------------------------------------------------------------------------
# Kernel 1: tube embedding (P4DConv 1x1 conv + spatial/temporal max pooling)
#           fused with the learned (x, y, z, t) positional embedding.
# --------------------------------------------------------------------------
def _embed_kernel(disp_ref, xyzt_ref, w_tube_ref, w_pos_ref, b_pos_ref, o_ref):
    gt, s, npts, _ = disp_ref.shape
    c = o_ref.shape[-1]

    # 1x1 Conv2d(4 -> dim, bias=False) realised as one lane-dense MXU matmul.
    d = _bf16(disp_ref[...].reshape(gt * s * npts, 4))
    y = jnp.dot(d, w_tube_ref[...], preferred_element_type=jnp.float32)
    y = y.reshape(gt, s, npts, c)
    # spatial_pooling='max' over nsamples and temporal_pooling='max' over the
    # temporal kernel are equivalent to a single max over the combined S axis.
    feat = jnp.max(y, axis=1)                                  # (gt, Np, C)

    p = _bf16(xyzt_ref[...].reshape(gt * npts, 4))
    pos = jnp.dot(p, w_pos_ref[...], preferred_element_type=jnp.float32)
    pos = pos.reshape(gt, npts, c) + b_pos_ref[...]

    o_ref[...] = (feat + pos).astype(o_ref.dtype)


def tube_embed_pos(disp, xyzt, w_tube, w_pos, b_pos):
    """disp: [G, S, Np, 4], xyzt: [G, Np, 4] -> tokens [G, Np, C]."""
    G, S, Np, _ = disp.shape
    C = w_tube.shape[1]
    gt = _largest_divisor_leq(G, max(1, 2048 // (S * Np)))
    return pl.pallas_call(
        _embed_kernel,
        grid=(G // gt,),
        out_shape=jax.ShapeDtypeStruct((G, Np, C), jnp.float32),
        in_specs=[
            pl.BlockSpec((gt, S, Np, 4), lambda i: (i, 0, 0, 0)),
            pl.BlockSpec((gt, Np, 4), lambda i: (i, 0, 0)),
            pl.BlockSpec((4, C), lambda i: (0, 0)),
            pl.BlockSpec((4, C), lambda i: (0, 0)),
            pl.BlockSpec((1, C), lambda i: (0, 0)),
        ],
        out_specs=pl.BlockSpec((gt, Np, C), lambda i: (i, 0, 0)),
        compiler_params=pltpu.CompilerParams(
            dimension_semantics=("parallel",)),
    )(disp, xyzt, w_tube, w_pos, b_pos)


# --------------------------------------------------------------------------
# Kernel 2: one fully fused pre-norm transformer encoder layer per grid step.
# --------------------------------------------------------------------------
def _layer_kernel(x_ref, ln1_g_ref, ln1_b_ref, wqkv_ref, wout_ref, bout_ref,
                  ln2_g_ref, ln2_b_ref, wff1_ref, bff1_ref, wff2_ref, bff2_ref,
                  o_ref, *, heads, dim_head, scale):
    inner = heads * dim_head
    x = x_ref[...].astype(jnp.float32)                         # (T, D)

    # ---- multi-head self-attention (pre-norm) + output proj + residual ----
    h = _ln(x, ln1_g_ref[...], ln1_b_ref[...])
    qkv = jnp.dot(_bf16(h), wqkv_ref[...],
                  preferred_element_type=jnp.float32)          # (T, 3*inner)

    attn = jnp.zeros(x.shape, jnp.float32)
    for hh in range(heads):
        lo = hh * dim_head
        q = qkv[:, lo:lo + dim_head]
        k = qkv[:, inner + lo:inner + lo + dim_head]
        v = qkv[:, 2 * inner + lo:2 * inner + lo + dim_head]
        s = jax.lax.dot_general(_bf16(q), _bf16(k), (((1,), (1,)), ((), ())),
                                preferred_element_type=jnp.float32) * scale
        s = s - jnp.max(s, axis=-1, keepdims=True)
        p = jnp.exp(s)
        p = p * pl.reciprocal(jnp.sum(p, axis=-1, keepdims=True), approx=True)
        av = jnp.dot(_bf16(p), _bf16(v),
                     preferred_element_type=jnp.float32)       # (T, dh)
        # Fold the output projection per head -> lane-dense (T, D) accumulator.
        attn = attn + jnp.dot(_bf16(av), wout_ref[lo:lo + dim_head, :],
                              preferred_element_type=jnp.float32)
    x = x + attn + bout_ref[...]

    # ---- feed-forward (pre-norm) + residual --------------------------------
    h = _ln(x, ln2_g_ref[...], ln2_b_ref[...])
    f = jnp.dot(_bf16(h), wff1_ref[...],
                preferred_element_type=jnp.float32) + bff1_ref[...]
    f = _gelu(f)
    f = jnp.dot(_bf16(f), wff2_ref[...],
                preferred_element_type=jnp.float32) + bff2_ref[...]
    o_ref[...] = (x + f).astype(o_ref.dtype)


def transformer_layer(x, lyr, heads, dim_head):
    """x: [B, T, D] -> [B, T, D], one pallas_call for the whole layer."""
    B, T, D = x.shape
    inner = heads * dim_head
    mlp_dim = lyr["w_ff1"].shape[1]
    kernel = functools.partial(_layer_kernel, heads=heads, dim_head=dim_head,
                               scale=float(dim_head) ** -0.5)
    return pl.pallas_call(
        kernel,
        grid=(B,),
        out_shape=jax.ShapeDtypeStruct((B, T, D), jnp.float32),
        in_specs=[
            pl.BlockSpec((None, T, D), lambda b: (b, 0, 0)),        # x
            pl.BlockSpec((1, D), lambda b: (0, 0)),                 # ln1_g
            pl.BlockSpec((1, D), lambda b: (0, 0)),                 # ln1_b
            pl.BlockSpec((D, 3 * inner), lambda b: (0, 0)),         # w_qkv
            pl.BlockSpec((inner, D), lambda b: (0, 0)),             # w_out
            pl.BlockSpec((1, D), lambda b: (0, 0)),                 # b_out
            pl.BlockSpec((1, D), lambda b: (0, 0)),                 # ln2_g
            pl.BlockSpec((1, D), lambda b: (0, 0)),                 # ln2_b
            pl.BlockSpec((D, mlp_dim), lambda b: (0, 0)),           # w_ff1
            pl.BlockSpec((1, mlp_dim), lambda b: (0, 0)),           # b_ff1
            pl.BlockSpec((mlp_dim, D), lambda b: (0, 0)),           # w_ff2
            pl.BlockSpec((1, D), lambda b: (0, 0)),                 # b_ff2
        ],
        out_specs=pl.BlockSpec((None, T, D), lambda b: (b, 0, 0)),
        compiler_params=pltpu.CompilerParams(
            dimension_semantics=("parallel",)),
    )(x, lyr["ln1_g"], lyr["ln1_b"], lyr["w_qkv"], lyr["w_out"], lyr["b_out"],
      lyr["ln2_g"], lyr["ln2_b"], lyr["w_ff1"], lyr["b_ff1"], lyr["w_ff2"],
      lyr["b_ff2"])


# --------------------------------------------------------------------------
# Kernel 3: fused tail — max over (frames, points) + mlp_head + txt fusion.
# --------------------------------------------------------------------------
def _tail_kernel(x_ref, txt_ref, ln_g_ref, ln_b_ref, wh1_ref, bh1_ref,
                 wh2_ref, bh2_ref, wf1a_ref, wf1b_ref, bfu1_ref,
                 wf2_ref, bfu2_ref, o_ref):
    x = x_ref[...].astype(jnp.float32)                     # (B, T, D)
    # torch.max over dim=1 applied twice == max over the combined token axis.
    pooled = jnp.max(x, axis=1)                            # (B, D)

    # mlp_head: LayerNorm -> Linear -> GELU -> (Dropout) -> Linear(., 80)
    h = _ln(pooled, ln_g_ref[...], ln_b_ref[...])
    h = jnp.dot(_bf16(h), wh1_ref[...], preferred_element_type=jnp.float32)
    h = _gelu(h + bh1_ref[...])
    head = jnp.dot(_bf16(h), wh2_ref[...],
                   preferred_element_type=jnp.float32) + bh2_ref[...]  # (B,80)

    # mlp_fusion: GELU(concat([head, txt])) @ W1 + b1 done as a split matmul.
    g1 = _gelu(head)
    g2 = _gelu(txt_ref[...].astype(jnp.float32))
    f = (jnp.dot(_bf16(g1), wf1a_ref[...], preferred_element_type=jnp.float32)
         + jnp.dot(_bf16(g2), wf1b_ref[...], preferred_element_type=jnp.float32)
         + bfu1_ref[...])
    f = _gelu(f)
    out = jnp.dot(_bf16(f), wf2_ref[...],
                  preferred_element_type=jnp.float32) + bfu2_ref[...]
    o_ref[...] = out.astype(o_ref.dtype)


def head_fusion(x, txt, params):
    B = x.shape[0]
    nc = params["w_fus2"].shape[1]
    w_fus1a = params["w_fus1"][:80]     # rows matching the mlp_head output
    w_fus1b = params["w_fus1"][80:]     # rows matching the txt feature
    args = (x, txt, params["head_ln_g"], params["head_ln_b"],
            params["w_head1"], params["b_head1"],
            params["w_head2"], params["b_head2"],
            w_fus1a, w_fus1b, params["b_fus1"],
            params["w_fus2"], params["b_fus2"])
    return pl.pallas_call(
        _tail_kernel,
        out_shape=jax.ShapeDtypeStruct((B, nc), jnp.float32),
        in_specs=[_full_spec(a) for a in args],
        out_specs=pl.BlockSpec((B, nc), lambda: (0, 0)),
    )(*args)


# --------------------------------------------------------------------------
# JAX glue: P4DConv grouping (sampling + neighbourhood displacements)
# --------------------------------------------------------------------------
def grouping(xyzs, radius, nsamples, spatial_stride, t_ksize, t_stride, t_pad):
    B, T, N, _ = xyzs.shape
    frames = [xyzs[:, t] for t in range(T)]
    # temporal_padding = [1, 0] -> replicate-pad one frame at the start.
    frames = [frames[0]] * t_pad[0] + frames + [frames[-1]] * t_pad[1]
    t_radius = (t_ksize - 1) // 2
    Np = N // spatial_stride
    # TODO(synk): CUDA furthest_point_sample replaced by deterministic strided
    # subsampling of anchors (no static JAX/Pallas equivalent of FPS here).
    anchor_idx = jnp.arange(Np) * spatial_stride

    anchors, disps, t_centers = [], [], []
    for t in range(t_radius, len(frames) - t_radius, t_stride):
        anchor = frames[t][:, anchor_idx]                         # [B, Np, 3]
        per_t = []
        for i in range(t - t_radius, t + t_radius + 1):
            nf = frames[i]                                        # [B, N, 3]
            d2 = jnp.sum((anchor[:, :, None, :] - nf[:, None, :, :]) ** 2, -1)
            neg_d2, idx = jax.lax.top_k(-d2, nsamples)            # [B, Np, ns]
            nn_d2 = -neg_d2
            nf_b = jnp.broadcast_to(nf[:, None], (B, Np, N, 3))
            idx3 = jnp.repeat(idx[..., None], 3, axis=-1)
            neigh = jnp.take_along_axis(nf_b, idx3, axis=2)       # [B,Np,ns,3]
            # TODO(synk): ball_query approximated by kNN; out-of-radius
            # samples are replaced by the nearest neighbour (fill semantics).
            inside = (nn_d2 <= radius * radius)[..., None]
            neigh = jnp.where(inside, neigh, neigh[:, :, :1, :])
            xyz_disp = neigh - anchor[:, :, None, :]              # [B,Np,ns,3]
            t_disp = jnp.full((B, Np, nsamples, 1), float(i - t), jnp.float32)
            per_t.append(jnp.concatenate([xyz_disp, t_disp], axis=-1))
        disp_t = jnp.stack(per_t, axis=1)                   # [B, Tk, Np, ns, 4]
        disp_t = jnp.transpose(disp_t, (0, 1, 3, 2, 4))     # [B, Tk, ns, Np, 4]
        disp_t = disp_t.reshape(B, t_ksize * nsamples, Np, 4)
        disps.append(disp_t)
        anchors.append(anchor)
        t_centers.append(float(t - t_pad[0]))
    disp = jnp.stack(disps, axis=1)                          # [B, L, S, Np, 4]
    new_xyzs = jnp.stack(anchors, axis=1)                    # [B, L, Np, 3]
    # TODO(synk): at realistic N the dense kNN (B*Np*N distances + top_k)
    # should become a tiled Pallas streaming-min kernel; XLA is fine at toy N.
    return new_xyzs, disp, jnp.asarray(t_centers, jnp.float32)


# --------------------------------------------------------------------------
# Full forward pass
# --------------------------------------------------------------------------
def pst_forward(params, pts, txt_feature, cfg):
    B = pts.shape[0]
    dim, heads, dh = cfg["dim"], cfg["heads"], cfg["dim_head"]

    # ---- tube_embedding (P4DConv, in_planes=0) ------------------------------
    new_xyzs, disp, t_centers = grouping(
        pts, cfg["radius"], cfg["nsamples"], cfg["spatial_stride"],
        cfg["temporal_kernel_size"], cfg["temporal_stride"],
        cfg["temporal_padding"])
    _, L, S, Np, _ = disp.shape
    G = B * L

    # TODO(synk): PST-Transformer's displacement-aware attention is not given
    # in the prompt; standard pre-norm MHA is used, with the (x,y,z,t)
    # coordinates folded in via a learned linear positional embedding.
    xyzt = jnp.concatenate(
        [new_xyzs,
         jnp.broadcast_to(t_centers[None, :, None, None], (B, L, Np, 1))],
        axis=-1)                                              # [B, L, Np, 4]

    x = tube_embed_pos(disp.reshape(G, S, Np, 4), xyzt.reshape(G, Np, 4),
                       params["w_tube"], params["w_pos"], params["b_pos"])
    x = x.reshape(B, L * Np, dim)                             # [B, tokens, dim]

    # ---- transformer (one fused kernel per layer) ---------------------------
    for lyr in params["layers"]:
        x = transformer_layer(x, lyr, heads, dh)

    # ---- max-pool + mlp_head + txt concat + mlp_fusion (one kernel) ---------
    return head_fusion(x, txt_feature.astype(jnp.float32), params)


# --------------------------------------------------------------------------
# Deterministic parameter init (shapes implied by the module's __init__)
# --------------------------------------------------------------------------
def init_params(key, cfg):
    dim, heads, dh = cfg["dim"], cfg["heads"], cfg["dim_head"]
    inner = heads * dh
    mlp_dim, nc, depth = cfg["mlp_dim"], cfg["num_classes"], cfg["depth"]
    keys = iter(jax.random.split(key, 64))

    def w(shape, scale=0.05):
        # MXU matmul weights stored in bf16; accumulation stays f32 in-kernel.
        return (scale * jax.random.normal(next(keys), shape, jnp.float32)
                ).astype(jnp.bfloat16)

    def bias(n, scale=0.05):
        # VPU-side additive biases kept in f32 as (1, n) row vectors.
        return scale * jax.random.normal(next(keys), (1, n), jnp.float32)

    params = {
        "w_tube": w((4, dim)),                    # P4DConv conv_d (bias=False)
        "w_pos": w((4, dim)),
        "b_pos": jnp.zeros((1, dim), jnp.float32),
        "head_ln_g": jnp.ones((1, dim), jnp.float32),
        "head_ln_b": jnp.zeros((1, dim), jnp.float32),
        "w_head1": w((dim, mlp_dim)), "b_head1": bias(mlp_dim),
        "w_head2": w((mlp_dim, 80)), "b_head2": bias(80),
        "w_fus1": w((82, 200)), "b_fus1": bias(200),
        "w_fus2": w((200, nc)), "b_fus2": bias(nc),
        "layers": [],
    }
    for _ in range(depth):
        params["layers"].append({
            "ln1_g": jnp.ones((1, dim), jnp.float32),
            "ln1_b": jnp.zeros((1, dim), jnp.float32),
            "w_qkv": w((dim, 3 * inner)),
            "w_out": w((inner, dim)), "b_out": bias(dim),
            "ln2_g": jnp.ones((1, dim), jnp.float32),
            "ln2_b": jnp.zeros((1, dim), jnp.float32),
            "w_ff1": w((dim, mlp_dim)), "b_ff1": bias(mlp_dim),
            "w_ff2": w((mlp_dim, dim)), "b_ff2": bias(dim),
        })
    return params


if __name__ == "__main__":
    cfg = dict(radius=0.5, nsamples=8, spatial_stride=4,
               temporal_kernel_size=3, temporal_stride=2,
               temporal_padding=(1, 0),
               dim=64, depth=2, heads=4, dim_head=16,
               dropout1=0.0, mlp_dim=128, num_classes=10, dropout2=0.0)

    key = jax.random.PRNGKey(0)
    k_params, k_pts, k_txt = jax.random.split(key, 3)
    params = init_params(k_params, cfg)

    B, T, N = 2, 4, 64
    pts = jax.random.uniform(k_pts, (B, T, N, 3), jnp.float32)      # [B,T,N,3]
    txt_feature = jax.random.normal(k_txt, (B, 2), jnp.float32)     # 80+2=82

    fwd = jax.jit(lambda p, x, t: pst_forward(p, x, t, cfg))
    out = jax.block_until_ready(fwd(params, pts, txt_feature))
    assert out.shape == (B, cfg["num_classes"])
    assert bool(jnp.all(jnp.isfinite(out)))
    print("KERNEL_OK")
</pallas_src>

<mosaic_0001>
module attributes {stable_mosaic.version = 11 : i64} {
  func.func @_embed_kernel(%arg0: i32, %arg1: memref<4x24x16x4xf32, #tpu.memory_space<vmem>>, %arg2: memref<4x16x4xf32, #tpu.memory_space<vmem>>, %arg3: memref<4x64xbf16, #tpu.memory_space<vmem>>, %arg4: memref<4x64xbf16, #tpu.memory_space<vmem>>, %arg5: memref<1x64xf32, #tpu.memory_space<vmem>>, %arg6: memref<4x16x64xf32, #tpu.memory_space<vmem>>) attributes {dimension_semantics = [#tpu.dimension_semantics<parallel>], iteration_bounds = array<i64: 1>, scalar_prefetch = 0 : i64, scratch_operands = 0 : i64, tpu.core_type = #tpu.core_type<tc>, window_params = [{transform_indices = @transform_0, window_bounds = array<i64: 4, 24, 16, 4>}, {transform_indices = @transform_1, window_bounds = array<i64: 4, 16, 4>}, {pipeline_mode = #tpu.pipeline_mode<synchronous>, transform_indices = @transform_2, window_bounds = array<i64: 4, 64>}, {pipeline_mode = #tpu.pipeline_mode<synchronous>, transform_indices = @transform_3, window_bounds = array<i64: 4, 64>}, {pipeline_mode = #tpu.pipeline_mode<synchronous>, transform_indices = @transform_4, window_bounds = array<i64: 1, 64>}, {transform_indices = @transform_5, window_bounds = array<i64: 4, 16, 64>}]} {
    %c0 = arith.constant 0 : index
    %c0_0 = arith.constant 0 : index
    %c0_1 = arith.constant 0 : index
    %c0_2 = arith.constant 0 : index
    %0 = vector.load %arg1[%c0, %c0_0, %c0_1, %c0_2] : memref<4x24x16x4xf32, #tpu.memory_space<vmem>>, vector<4x24x16x4xf32>
    %1 = vector.shape_cast %0 : vector<4x24x16x4xf32> to vector<1536x4xf32>
    %2 = arith.truncf %1 : vector<1536x4xf32> to vector<1536x4xbf16>
    %c0_3 = arith.constant 0 : index
    %c0_4 = arith.constant 0 : index
    %3 = vector.load %arg3[%c0_3, %c0_4] : memref<4x64xbf16, #tpu.memory_space<vmem>>, vector<4x64xbf16>
    %cst = arith.constant dense<0.000000e+00> : vector<1536x64xf32>
    %4 = tpu.matmul %2, %3, %cst {dimension_numbers = #tpu.dot_dimension_numbers<[1], [0], [0], [1], [0, 0, 1, 1], [], []>} : vector<1536x4xbf16>, vector<4x64xbf16>, vector<1536x64xf32> -> vector<1536x64xf32>
    %5 = vector.shape_cast %4 : vector<1536x64xf32> to vector<4x24x16x64xf32>
    %cst_5 = arith.constant dense<0xFF800000> : vector<4x16x64xf32>
    %6 = vector.multi_reduction <maximumf>, %5, %cst_5 [1] : vector<4x24x16x64xf32> to vector<4x16x64xf32>
    %c0_6 = arith.constant 0 : index
    %c0_7 = arith.constant 0 : index
    %c0_8 = arith.constant 0 : index
    %7 = vector.load %arg2[%c0_6, %c0_7, %c0_8] : memref<4x16x4xf32, #tpu.memory_space<vmem>>, vector<4x16x4xf32>
    %8 = vector.shape_cast %7 : vector<4x16x4xf32> to vector<64x4xf32>
    %9 = arith.truncf %8 : vector<64x4xf32> to vector<64x4xbf16>
    %c0_9 = arith.constant 0 : index
    %c0_10 = arith.constant 0 : index
    %10 = vector.load %arg4[%c0_9, %c0_10] : memref<4x64xbf16, #tpu.memory_space<vmem>>, vector<4x64xbf16>
    %cst_11 = arith.constant dense<0.000000e+00> : vector<64x64xf32>
    %11 = tpu.matmul %9, %10, %cst_11 {dimension_numbers = #tpu.dot_dimension_numbers<[1], [0], [0], [1], [0, 0, 1, 1], [], []>} : vector<64x4xbf16>, vector<4x64xbf16>, vector<64x64xf32> -> vector<64x64xf32>
    %12 = vector.shape_cast %11 : vector<64x64xf32> to vector<4x16x64xf32>
    %c0_12 = arith.constant 0 : index
    %c0_13 = arith.constant 0 : index
    %13 = vector.load %arg5[%c0_12, %c0_13] : memref<1x64xf32, #tpu.memory_space<vmem>>, vector<1x64xf32>
    %14 = vector.shape_cast %13 : vector<1x64xf32> to vector<1x1x64xf32>
    %15 = vector.broadcast %14 : vector<1x1x64xf32> to vector<4x16x64xf32>
    %16 = arith.addf %12, %15 : vector<4x16x64xf32>
    %17 = arith.addf %6, %16 : vector<4x16x64xf32>
    %c0_14 = arith.constant 0 : index
    %c0_15 = arith.constant 0 : index
    %c0_16 = arith.constant 0 : index
    %18 = vector.load %arg6[%c0_14, %c0_15, %c0_16] : memref<4x16x64xf32, #tpu.memory_space<vmem>>, vector<4x16x64xf32>
    tpu.vector_store %arg6[%c0_14, %c0_15, %c0_16], %17 {strides = array<i32>} : memref<4x16x64xf32, #tpu.memory_space<vmem>>, vector<4x16x64xf32>,
    return
  }
  func.func @transform_0(%arg0: i32) -> (i32, i32, i32, i32) {
    %c0_i32 = arith.constant 0 : i32
    %c0_i32_0 = arith.constant 0 : i32
    %c0_i32_1 = arith.constant 0 : i32
    %c0_i32_2 = arith.constant 0 : i32
    return %arg0, %c0_i32, %c0_i32_0, %c0_i32_1 : i32, i32, i32, i32
  }
  func.func @transform_1(%arg0: i32) -> (i32, i32, i32) {
    %c0_i32 = arith.constant 0 : i32
    %c0_i32_0 = arith.constant 0 : i32
    %c0_i32_1 = arith.constant 0 : i32
    return %arg0, %c0_i32, %c0_i32_0 : i32, i32, i32
  }
  func.func @transform_2(%arg0: i32) -> (i32, i32) {
    %c0_i32 = arith.constant 0 : i32
    %c0_i32_0 = arith.constant 0 : i32
    %c0_i32_1 = arith.constant 0 : i32
    return %c0_i32, %c0_i32_0 : i32, i32
  }
  func.func @transform_3(%arg0: i32) -> (i32, i32) {
    %c0_i32 = arith.constant 0 : i32
    %c0_i32_0 = arith.constant 0 : i32
    %c0_i32_1 = arith.constant 0 : i32
    return %c0_i32, %c0_i32_0 : i32, i32
  }
  func.func @transform_4(%arg0: i32) -> (i32, i32) {
    %c0_i32 = arith.constant 0 : i32
    %c0_i32_0 = arith.constant 0 : i32
    %c0_i32_1 = arith.constant 0 : i32
    return %c0_i32, %c0_i32_0 : i32, i32
  }
  func.func @transform_5(%arg0: i32) -> (i32, i32, i32) {
    %c0_i32 = arith.constant 0 : i32
    %c0_i32_0 = arith.constant 0 : i32
    %c0_i32_1 = arith.constant 0 : i32
    return %arg0, %c0_i32, %c0_i32_0 : i32, i32, i32
  }
}

module attributes {stable_mosaic.version = 11 : i64} {
  func.func @_layer_kernel(%arg0: i32, %arg1: memref<1x32x64xf32, #tpu.memory_space<vmem>>, %arg2: memref<1x64xf32, #tpu.memory_space<vmem>>, %arg3: memref<1x64xf32, #tpu.memory_space<vmem>>, %arg4: memref<64x192xbf16, #tpu.memory_space<vmem>>, %arg5: memref<64x64xbf16, #tpu.memory_space<vmem>>, %arg6: memref<1x64xf32, #tpu.memory_space<vmem>>, %arg7: memref<1x64xf32, #tpu.memory_space<vmem>>, %arg8: memref<1x64xf32, #tpu.memory_space<vmem>>, %arg9: memref<64x128xbf16, #tpu.memory_space<vmem>>, %arg10: memref<1x128xf32, #tpu.memory_space<vmem>>, %arg11: memref<128x64xbf16, #tpu.memory_space<vmem>>, %arg12: memref<1x64xf32, #tpu.memory_space<vmem>>, %arg13: memref<1x32x64xf32, #tpu.memory_space<vmem>>) attributes {dimension_semantics = [#tpu.dimension_semantics<parallel>], iteration_bounds = array<i64: 2>, scalar_prefetch = 0 : i64, scratch_operands = 0 : i64, tpu.core_type = #tpu.core_type<tc>, window_params = [{transform_indices = @transform_0, window_bounds = array<i64: 1, 32, 64>}, {pipeline_mode = #tpu.pipeline_mode<synchronous>, transform_indices = @transform_1, window_bounds = array<i64: 1, 64>}, {pipeline_mode = #tpu.pipeline_mode<synchronous>, transform_indices = @transform_2, window_bounds = array<i64: 1, 64>}, {pipeline_mode = #tpu.pipeline_mode<synchronous>, transform_indices = @transform_3, window_bounds = array<i64: 64, 192>}, {pipeline_mode = #tpu.pipeline_mode<synchronous>, transform_indices = @transform_4, window_bounds = array<i64: 64, 64>}, {pipeline_mode = #tpu.pipeline_mode<synchronous>, transform_indices = @transform_5, window_bounds = array<i64: 1, 64>}, {pipeline_mode = #tpu.pipeline_mode<synchronous>, transform_indices = @transform_6, window_bounds = array<i64: 1, 64>}, {pipeline_mode = #tpu.pipeline_mode<synchronous>, transform_indices = @transform_7, window_bounds = array<i64: 1, 64>}, {pipeline_mode = #tpu.pipeline_mode<synchronous>, transform_indices = @transform_8, window_bounds = array<i64: 64, 128>}, {pipeline_mode = #tpu.pipeline_mode<synchronous>, transform_indices = @transform_9, window_bounds = array<i64: 1, 128>}, {pipeline_mode = #tpu.pipeline_mode<synchronous>, transform_indices = @transform_10, window_bounds = array<i64: 128, 64>}, {pipeline_mode = #tpu.pipeline_mode<synchronous>, transform_indices = @transform_11, window_bounds = array<i64: 1, 64>}, {transform_indices = @transform_12, window_bounds = array<i64: 1, 32, 64>}]} {
    %c0 = arith.constant 0 : index
    %c0_0 = arith.constant 0 : index
    %c0_1 = arith.constant 0 : index
    %0 = vector.load %arg1[%c0, %c0_0, %c0_1] : memref<1x32x64xf32, #tpu.memory_space<vmem>>, vector<1x32x64xf32>
    %1 = vector.shape_cast %0 : vector<1x32x64xf32> to vector<32x64xf32>
    %c0_2 = arith.constant 0 : index
    %c0_3 = arith.constant 0 : index
    %2 = vector.load %arg2[%c0_2, %c0_3] : memref<1x64xf32, #tpu.memory_space<vmem>>, vector<1x64xf32>
    %c0_4 = arith.constant 0 : index
    %c0_5 = arith.constant 0 : index
    %3 = vector.load %arg3[%c0_4, %c0_5] : memref<1x64xf32, #tpu.memory_space<vmem>>, vector<1x64xf32>
    %cst = arith.constant dense<0.000000e+00> : vector<32xf32>
    %4 = vector.multi_reduction <add>, %1, %cst [1] : vector<32x64xf32> to vector<32xf32>
    %5 = vector.shape_cast %4 : vector<32xf32> to vector<32x1xf32>
    %cst_6 = arith.constant 6.400000e+01 : f32
    %6 = vector.broadcast %cst_6 : f32 to vector<32x1xf32>
    %7 = arith.divf %5, %6 : vector<32x1xf32>
    %8 = vector.broadcast %7 : vector<32x1xf32> to vector<32x64xf32>
    %9 = arith.subf %1, %8 : vector<32x64xf32>
    %10 = arith.mulf %9, %9 : vector<32x64xf32>
    %cst_7 = arith.constant dense<0.000000e+00> : vector<32xf32>
    %11 = vector.multi_reduction <add>, %10, %cst_7 [1] : vector<32x64xf32> to vector<32xf32>
    %12 = vector.shape_cast %11 : vector<32xf32> to vector<32x1xf32>
    %cst_8 = arith.constant 6.400000e+01 : f32
    %13 = vector.broadcast %cst_8 : f32 to vector<32x1xf32>
    %14 = arith.divf %12, %13 : vector<32x1xf32>
    %cst_9 = arith.constant 9.99999974E-6 : f32
    %15 = vector.broadcast %cst_9 : f32 to vector<32x1xf32>
    %16 = arith.addf %14, %15 : vector<32x1xf32>
    %17 = math.rsqrt %16 : vector<32x1xf32>
    %18 = vector.broadcast %17 : vector<32x1xf32> to vector<32x64xf32>
    %19 = arith.mulf %9, %18 : vector<32x64xf32>
    %20 = vector.broadcast %2 : vector<1x64xf32> to vector<32x64xf32>
    %21 = arith.mulf %19, %20 : vector<32x64xf32>
    %22 = vector.broadcast %3 : vector<1x64xf32> to vector<32x64xf32>
    %23 = arith.addf %21, %22 : vector<32x64xf32>
    %24 = arith.truncf %23 : vector<32x64xf32> to vector<32x64xbf16>
    %c0_10 = arith.constant 0 : index
    %c0_11 = arith.constant 0 : index
    %25 = vector.load %arg4[%c0_10, %c0_11] : memref<64x192xbf16, #tpu.memory_space<vmem>>, vector<64x192xbf16>
    %cst_12 = arith.constant dense<0.000000e+00> : vector<32x192xf32>
    %26 = tpu.matmul %24, %25, %cst_12 {dimension_numbers = #tpu.dot_dimension_numbers<[1], [0], [0], [1], [0, 0, 1, 1], [], []>} : vector<32x64xbf16>, vector<64x192xbf16>, vector<32x192xf32> -> vector<32x192xf32>
    %cst_13 = arith.constant 0.000000e+00 : f32
    %27 = vector.broadcast %cst_13 : f32 to vector<32x64xf32>
    %28 = vector.extract_strided_slice %26 {offsets = [0, 0], sizes = [32, 16], strides = [1, 1]} : vector<32x192xf32> to vector<32x16xf32>
    %29 = vector.extract_strided_slice %26 {offsets = [0, 64], sizes = [32, 16], strides = [1, 1]} : vector<32x192xf32> to vector<32x16xf32>
    %30 = vector.extract_strided_slice %26 {offsets = [0, 128], sizes = [32, 16], strides = [1, 1]} : vector<32x192xf32> to vector<32x16xf32>
    %31 = arith.truncf %28 : vector<32x16xf32> to vector<32x16xbf16>
    %32 = arith.truncf %29 : vector<32x16xf32> to vector<32x16xbf16>
    %cst_14 = arith.constant dense<0.000000e+00> : vector<32x32xf32>
    %33 = tpu.matmul %31, %32, %cst_14 {dimension_numbers = #tpu.dot_dimension_numbers<[1], [1], [0], [0], [0, 0, 1, 0], [], []>} : vector<32x16xbf16>, vector<32x16xbf16>, vector<32x32xf32> -> vector<32x32xf32>
    %cst_15 = arith.constant 2.500000e-01 : f32
    %34 = vector.broadcast %cst_15 : f32 to vector<32x32xf32>
    %35 = arith.mulf %33, %34 : vector<32x32xf32>
    %cst_16 = arith.constant dense<0xFF800000> : vector<32xf32>
    %36 = vector.multi_reduction <maximumf>, %35, %cst_16 [1] : vector<32x32xf32> to vector<32xf32>
    %37 = vector.shape_cast %36 : vector<32xf32> to vector<32x1xf32>
    %38 = vector.broadcast %37 : vector<32x1xf32> to vector<32x32xf32>
    %39 = arith.subf %35, %38 : vector<32x32xf32>
    %40 = math.exp %39 : vector<32x32xf32>
    %cst_17 = arith.constant dense<0.000000e+00> : vector<32xf32>
    %41 = vector.multi_reduction <add>, %40, %cst_17 [1] : vector<32x32xf32> to vector<32xf32>
    %42 = vector.shape_cast %41 : vector<32xf32> to vector<32x1xf32>
    %43 = tpu.reciprocal %42 {approx = true} : vector<32x1xf32> -> vector<32x1xf32>
    %44 = vector.broadcast %43 : vector<32x1xf32> to vector<32x32xf32>
    %45 = arith.mulf %40, %44 : vector<32x32xf32>
    %46 = arith.truncf %45 : vector<32x32xf32> to vector<32x32xbf16>
    %47 = arith.truncf %30 : vector<32x16xf32> to vector<32x16xbf16>
    %cst_18 = arith.constant dense<0.000000e+00> : vector<32x16xf32>
    %48 = tpu.matmul %46, %47, %cst_18 {dimension_numbers = #tpu.dot_dimension_numbers<[1], [0], [0], [1], [0, 0, 1, 1], [], []>} : vector<32x32xbf16>, vector<32x16xbf16>, vector<32x16xf32> -> vector<32x16xf32>
    %49 = arith.truncf %48 : vector<32x16xf32> to vector<32x16xbf16>
    %c0_19 = arith.constant 0 : index
    %c0_20 = arith.constant 0 : index
    %50 = vector.load %arg5[%c0_19, %c0_20] : memref<64x64xbf16, #tpu.memory_space<vmem>>, vector<16x64xbf16>
    %cst_21 = arith.constant dense<0.000000e+00> : vector<32x64xf32>
    %51 = tpu.matmul %49, %50, %cst_21 {dimension_numbers = #tpu.dot_dimension_numbers<[1], [0], [0], [1], [0, 0, 1, 1], [], []>} : vector<32x16xbf16>, vector<16x64xbf16>, vector<32x64xf32> -> vector<32x64xf32>
    %52 = arith.addf %27, %51 : vector<32x64xf32>
    %53 = vector.extract_strided_slice %26 {offsets = [0, 16], sizes = [32, 16], strides = [1, 1]} : vector<32x192xf32> to vector<32x16xf32>
    %54 = vector.extract_strided_slice %26 {offsets = [0, 80], sizes = [32, 16], strides = [1, 1]} : vector<32x192xf32> to vector<32x16xf32>
    %55 = vector.extract_strided_slice %26 {offsets = [0, 144], sizes = [32, 16], strides = [1, 1]} : vector<32x192xf32> to vector<32x16xf32>
    %56 = arith.truncf %53 : vector<32x16xf32> to vector<32x16xbf16>
    %57 = arith.truncf %54 : vector<32x16xf32> to vector<32x16xbf16>
    %cst_22 = arith.constant dense<0.000000e+00> : vector<32x32xf32>
    %58 = tpu.matmul %56, %57, %cst_22 {dimension_numbers = #tpu.dot_dimension_numbers<[1], [1], [0], [0], [0, 0, 1, 0], [], []>} : vector<32x16xbf16>, vector<32x16xbf16>, vector<32x32xf32> -> vector<32x32xf32>
    %cst_23 = arith.constant 2.500000e-01 : f32
    %59 = vector.broadcast %cst_23 : f32 to vector<32x32xf32>
    %60 = arith.mulf %58, %59 : vector<32x32xf32>
    %cst_24 = arith.constant dense<0xFF800000> : vector<32xf32>
    %61 = vector.multi_reduction <maximumf>, %60, %cst_24 [1] : vector<32x32xf32> to vector<32xf32>
    %62 = vector.shape_cast %61 : vector<32xf32> to vector<32x1xf32>
    %63 = vector.broadcast %62 : vector<32x1xf32> to vector<32x32xf32>
    %64 = arith.subf %60, %63 : vector<32x32xf32>
    %65 = math.exp %64 : vector<32x32xf32>
    %cst_25 = arith.constant dense<0.000000e+00> : vector<32xf32>
    %66 = vector.multi_reduction <add>, %65, %cst_25 [1] : vector<32x32xf32> to vector<32xf32>
    %67 = vector.shape_cast %66 : vector<32xf32> to vector<32x1xf32>
    %68 = tpu.reciprocal %67 {approx = true} : vector<32x1xf32> -> vector<32x1xf32>
    %69 = vector.broadcast %68 : vector<32x1xf32> to vector<32x32xf32>
    %70 = arith.mulf %65, %69 : vector<32x32xf32>
    %71 = arith.truncf %70 : vector<32x32xf32> to vector<32x32xbf16>
    %72 = arith.truncf %55 : vector<32x16xf32> to vector<32x16xbf16>
    %cst_26 = arith.constant dense<0.000000e+00> : vector<32x16xf32>
    %73 = tpu.matmul %71, %72, %cst_26 {dimension_numbers = #tpu.dot_dimension_numbers<[1], [0], [0], [1], [0, 0, 1, 1], [], []>} : vector<32x32xbf16>, vector<32x16xbf16>, vector<32x16xf32> -> vector<32x16xf32>
    %74 = arith.truncf %73 : vector<32x16xf32> to vector<32x16xbf16>
    %c16 = arith.constant 16 : index
    %c0_27 = arith.constant 0 : index
    %75 = vector.load %arg5[%c16, %c0_27] : memref<64x64xbf16, #tpu.memory_space<vmem>>, vector<16x64xbf16>
    %cst_28 = arith.constant dense<0.000000e+00> : vector<32x64xf32>
    %76 = tpu.matmul %74, %75, %cst_28 {dimension_numbers = #tpu.dot_dimension_numbers<[1], [0], [0], [1], [0, 0, 1, 1], [], []>} : vector<32x16xbf16>, vector<16x64xbf16>, vector<32x64xf32> -> vector<32x64xf32>
    %77 = arith.addf %52, %76 : vector<32x64xf32>
    %78 = vector.extract_strided_slice %26 {offsets = [0, 32], sizes = [32, 16], strides = [1, 1]} : vector<32x192xf32> to vector<32x16xf32>
    %79 = vector.extract_strided_slice %26 {offsets = [0, 96], sizes = [32, 16], strides = [1, 1]} : vector<32x192xf32> to vector<32x16xf32>
    %80 = vector.extract_strided_slice %26 {offsets = [0, 160], sizes = [32, 16], strides = [1, 1]} : vector<32x192xf32> to vector<32x16xf32>
    %81 = arith.truncf %78 : vector<32x16xf32> to vector<32x16xbf16>
    %82 = arith.truncf %79 : vector<32x16xf32> to vector<32x16xbf16>
    %cst_29 = arith.constant dense<0.000000e+00> : vector<32x32xf32>
    %83 = tpu.matmul %81, %82, %cst_29 {dimension_numbers = #tpu.dot_dimension_numbers<[1], [1], [0], [0], [0, 0, 1, 0], [], []>} : vector<32x16xbf16>, vector<32x16xbf16>, vector<32x32xf32> -> vector<32x32xf32>
    %cst_30 = arith.constant 2.500000e-01 : f32
    %84 = vector.broadcast %cst_30 : f32 to vector<32x32xf32>
    %85 = arith.mulf %83, %84 : vector<32x32xf32>
    %cst_31 = arith.constant dense<0xFF800000> : vector<32xf32>
    %86 = vector.multi_reduction <maximumf>, %85, %cst_31 [1] : vector<32x32xf32> to vector<32xf32>
    %87 = vector.shape_cast %86 : vector<32xf32> to vector<32x1xf32>
    %88 = vector.broadcast %87 : vector<32x1xf32> to vector<32x32xf32>
    %89 = arith.subf %85, %88 : vector<32x32xf32>
    %90 = math.exp %89 : vector<32x32xf32>
    %cst_32 = arith.constant dense<0.000000e+00> : vector<32xf32>
    %91 = vector.multi_reduction <add>, %90, %cst_32 [1] : vector<32x32xf32> to vector<32xf32>
    %92 = vector.shape_cast %91 : vector<32xf32> to vector<32x1xf32>
    %93 = tpu.reciprocal %92 {approx = true} : vector<32x1xf32> -> vector<32x1xf32>
    %94 = vector.broadcast %93 : vector<32x1xf32> to vector<32x32xf32>
    %95 = arith.mulf %90, %94 : vector<32x32xf32>
    %96 = arith.truncf %95 : vector<32x32xf32> to vector<32x32xbf16>
    %97 = arith.truncf %80 : vector<32x16xf32> to vector<32x16xbf16>
    %cst_33 = arith.constant dense<0.000000e+00> : vector<32x16xf32>
    %98 = tpu.matmul %96, %97, %cst_33 {dimension_numbers = #tpu.dot_dimension_numbers<[1], [0], [0], [1], [0, 0, 1, 1], [], []>} : vector<32x32xbf16>, vector<32x16xbf16>, vector<32x16xf32> -> vector<32x16xf32>
    %99 = arith.truncf %98 : vector<32x16xf32> to vector<32x16xbf16>
    %c32 = arith.constant 32 : index
    %c0_34 = arith.constant 0 : index
    %100 = vector.load %arg5[%c32, %c0_34] : memref<64x64xbf16, #tpu.memory_space<vmem>>, vector<16x64xbf16>
    %cst_35 = arith.constant dense<0.000000e+00> : vector<32x64xf32>
    %101 = tpu.matmul %99, %100, %cst_35 {dimension_numbers = #tpu.dot_dimension_numbers<[1], [0], [0], [1], [0, 0, 1, 1], [], []>} : vector<32x16xbf16>, vector<16x64xbf16>, vector<32x64xf32> -> vector<32x64xf32>
    %102 = arith.addf %77, %101 : vector<32x64xf32>
    %103 = vector.extract_strided_slice %26 {offsets = [0, 48], sizes = [32, 16], strides = [1, 1]} : vector<32x192xf32> to vector<32x16xf32>
    %104 = vector.extract_strided_slice %26 {offsets = [0, 112], sizes = [32, 16], strides = [1, 1]} : vector<32x192xf32> to vector<32x16xf32>
    %105 = vector.extract_strided_slice %26 {offsets = [0, 176], sizes = [32, 16], strides = [1, 1]} : vector<32x192xf32> to vector<32x16xf32>
    %106 = arith.truncf %103 : vector<32x16xf32> to vector<32x16xbf16>
    %107 = arith.truncf %104 : vector<32x16xf32> to vector<32x16xbf16>
    %cst_36 = arith.constant dense<0.000000e+00> : vector<32x32xf32>
    %108 = tpu.matmul %106, %107, %cst_36 {dimension_numbers = #tpu.dot_dimension_numbers<[1], [1], [0], [0], [0, 0, 1, 0], [], []>} : vector<32x16xbf16>, vector<32x16xbf16>, vector<32x32xf32> -> vector<32x32xf32>
    %cst_37 = arith.constant 2.500000e-01 : f32
    %109 = vector.broadcast %cst_37 : f32 to vector<32x32xf32>
    %110 = arith.mulf %108, %109 : vector<32x32xf32>
    %cst_38 = arith.constant dense<0xFF800000> : vector<32xf32>
    %111 = vector.multi_reduction <maximumf>, %110, %cst_38 [1] : vector<32x32xf32> to vector<32xf32>
    %112 = vector.shape_cast %111 : vector<32xf32> to vector<32x1xf32>
    %113 = vector.broadcast %112 : vector<32x1xf32> to vector<32x32xf32>
    %114 = arith.subf %110, %113 : vector<32x32xf32>
    %115 = math.exp %114 : vector<32x32xf32>
    %cst_39 = arith.constant dense<0.000000e+00> : vector<32xf32>
    %116 = vector.multi_reduction <add>, %115, %cst_39 [1] : vector<32x32xf32> to vector<32xf32>
    %117 = vector.shape_cast %116 : vector<32xf32> to vector<32x1xf32>
    %118 = tpu.reciprocal %117 {approx = true} : vector<32x1xf32> -> vector<32x1xf32>
    %119 = vector.broadcast %118 : vector<32x1xf32> to vector<32x32xf32>
    %120 = arith.mulf %115, %119 : vector<32x32xf32>
    %121 = arith.truncf %120 : vector<32x32xf32> to vector<32x32xbf16>
    %122 = arith.truncf %105 : vector<32x16xf32> to vector<32x16xbf16>
    %cst_40 = arith.constant dense<0.000000e+00> : vector<32x16xf32>
    %123 = tpu.matmul %121, %122, %cst_40 {dimension_numbers = #tpu.dot_dimension_numbers<[1], [0], [0], [1], [0, 0, 1, 1], [], []>} : vector<32x32xbf16>, vector<32x16xbf16>, vector<32x16xf32> -> vector<32x16xf32>
    %124 = arith.truncf %123 : vector<32x16xf32> to vector<32x16xbf16>
    %c48 = arith.constant 48 : index
    %c0_41 = arith.constant 0 : index
    %125 = vector.load %arg5[%c48, %c0_41] : memref<64x64xbf16, #tpu.memory_space<vmem>>, vector<16x64xbf16>
    %cst_42 = arith.constant dense<0.000000e+00> : vector<32x64xf32>
    %126 = tpu.matmul %124, %125, %cst_42 {dimension_numbers = #tpu.dot_dimension_numbers<[1], [0], [0], [1], [0, 0, 1, 1], [], []>} : vector<32x16xbf16>, vector<16x64xbf16>, vector<32x64xf32> -> vector<32x64xf32>
    %127 = arith.addf %102, %126 : vector<32x64xf32>
    %128 = arith.addf %1, %127 : vector<32x64xf32>
    %c0_43 = arith.constant 0 : index
    %c0_44 = arith.constant 0 : index
    %129 = vector.load %arg6[%c0_43, %c0_44] : memref<1x64xf32, #tpu.memory_space<vmem>>, vector<1x64xf32>
    %130 = vector.broadcast %129 : vector<1x64xf32> to vector<32x64xf32>
    %131 = arith.addf %128, %130 : vector<32x64xf32>
    %c0_45 = arith.constant 0 : index
    %c0_46 = arith.constant 0 : index
    %132 = vector.load %arg7[%c0_45, %c0_46] : memref<1x64xf32, #tpu.memory_space<vmem>>, vector<1x64xf32>
    %c0_47 = arith.constant 0 : index
    %c0_48 = arith.constant 0 : index
    %133 = vector.load %arg8[%c0_47, %c0_48] : memref<1x64xf32, #tpu.memory_space<vmem>>, vector<1x64xf32>
    %cst_49 = arith.constant dense<0.000000e+00> : vector<32xf32>
    %134 = vector.multi_reduction <add>, %131, %cst_49 [1] : vector<32x64xf32> to vector<32xf32>
    %135 = vector.shape_cast %134 : vector<32xf32> to vector<32x1xf32>
    %cst_50 = arith.constant 6.400000e+01 : f32
    %136 = vector.broadcast %cst_50 : f32 to vector<32x1xf32>
    %137 = arith.divf %135, %136 : vector<32x1xf32>
    %138 = vector.broadcast %137 : vector<32x1xf32> to vector<32x64xf32>
    %139 = arith.subf %131, %138 : vector<32x64xf32>
    %140 = arith.mulf %139, %139 : vector<32x64xf32>
    %cst_51 = arith.constant dense<0.000000e+00> : vector<32xf32>
    %141 = vector.multi_reduction <add>, %140, %cst_51 [1] : vector<32x64xf32> to vector<32xf32>
    %142 = vector.shape_cast %141 : vector<32xf32> to vector<32x1xf32>
    %cst_52 = arith.constant 6.400000e+01 : f32
    %143 = vector.broadcast %cst_52 : f32 to vector<32x1xf32>
    %144 = arith.divf %142, %143 : vector<32x1xf32>
    %cst_53 = arith.constant 9.99999974E-6 : f32
    %145 = vector.broadcast %cst_53 : f32 to vector<32x1xf32>
    %146 = arith.addf %144, %145 : vector<32x1xf32>
    %147 = math.rsqrt %146 : vector<32x1xf32>
    %148 = vector.broadcast %147 : vector<32x1xf32> to vector<32x64xf32>
    %149 = arith.mulf %139, %148 : vector<32x64xf32>
    %150 = vector.broadcast %132 : vector<1x64xf32> to vector<32x64xf32>
    %151 = arith.mulf %149, %150 : vector<32x64xf32>
    %152 = vector.broadcast %133 : vector<1x64xf32> to vector<32x64xf32>
    %153 = arith.addf %151, %152 : vector<32x64xf32>
    %154 = arith.truncf %153 : vector<32x64xf32> to vector<32x64xbf16>
    %c0_54 = arith.constant 0 : index
    %c0_55 = arith.constant 0 : index
    %155 = vector.load %arg9[%c0_54, %c0_55] : memref<64x128xbf16, #tpu.memory_space<vmem>>, vector<64x128xbf16>
    %cst_56 = arith.constant dense<0.000000e+00> : vector<32x128xf32>
    %156 = tpu.matmul %154, %155, %cst_56 {dimension_numbers = #tpu.dot_dimension_numbers<[1], [0], [0], [1], [0, 0, 1, 1], [], []>} : vector<32x64xbf16>, vector<64x128xbf16>, vector<32x128xf32> -> vector<32x128xf32>
    %c0_57 = arith.constant 0 : index
    %c0_58 = arith.constant 0 : index
    %157 = vector.load %arg10[%c0_57, %c0_58] : memref<1x128xf32, #tpu.memory_space<vmem>>, vector<1x128xf32>
    %158 = vector.broadcast %157 : vector<1x128xf32> to vector<32x128xf32>
    %159 = arith.addf %156, %158 : vector<32x128xf32>
    %160 = arith.mulf %159, %159 : vector<32x128xf32>
    %161 = arith.mulf %159, %160 : vector<32x128xf32>
    %cst_59 = arith.constant 4.471500e-02 : f32
    %162 = vector.broadcast %cst_59 : f32 to vector<32x128xf32>
    %163 = arith.mulf %162, %161 : vector<32x128xf32>
    %164 = arith.addf %159, %163 : vector<32x128xf32>
    %cst_60 = arith.constant 0.797884583 : f32
    %165 = vector.broadcast %cst_60 : f32 to vector<32x128xf32>
    %166 = arith.mulf %165, %164 : vector<32x128xf32>
    %167 = math.tanh %166 : vector<32x128xf32>
    %cst_61 = arith.constant 1.000000e+00 : f32
    %168 = vector.broadcast %cst_61 : f32 to vector<32x128xf32>
    %169 = arith.addf %168, %167 : vector<32x128xf32>
    %cst_62 = arith.constant 5.000000e-01 : f32
    %170 = vector.broadcast %cst_62 : f32 to vector<32x128xf32>
    %171 = arith.mulf %170, %169 : vector<32x128xf32>
    %172 = arith.mulf %159, %171 : vector<32x128xf32>
    %173 = arith.truncf %172 : vector<32x128xf32> to vector<32x128xbf16>
    %c0_63 = arith.constant 0 : index
    %c0_64 = arith.constant 0 : index
    %174 = vector.load %arg11[%c0_63, %c0_64] : memref<128x64xbf16, #tpu.memory_space<vmem>>, vector<128x64xbf16>
    %cst_65 = arith.constant dense<0.000000e+00> : vector<32x64xf32>
    %175 = tpu.matmul %173, %174, %cst_65 {dimension_numbers = #tpu.dot_dimension_numbers<[1], [0], [0], [1], [0, 0, 1, 1], [], []>} : vector<32x128xbf16>, vector<128x64xbf16>, vector<32x64xf32> -> vector<32x64xf32>
    %c0_66 = arith.constant 0 : index
    %c0_67 = arith.constant 0 : index
    %176 = vector.load %arg12[%c0_66, %c0_67] : memref<1x64xf32, #tpu.memory_space<vmem>>, vector<1x64xf32>
    %177 = vector.broadcast %176 : vector<1x64xf32> to vector<32x64xf32>
    %178 = arith.addf %175, %177 : vector<32x64xf32>
    %179 = arith.addf %131, %178 : vector<32x64xf32>
    %c0_68 = arith.constant 0 : index
    %c0_69 = arith.constant 0 : index
    %c0_70 = arith.constant 0 : index
    %180 = vector.load %arg13[%c0_68, %c0_69, %c0_70] : memref<1x32x64xf32, #tpu.memory_space<vmem>>, vector<1x32x64xf32>
    %181 = vector.shape_cast %180 : vector<1x32x64xf32> to vector<32x64xf32>
    %182 = vector.shape_cast %179 : vector<32x64xf32> to vector<1x32x64xf32>
    tpu.vector_store %arg13[%c0_68, %c0_69, %c0_70], %182 {strides = array<i32>} : memref<1x32x64xf32, #tpu.memory_space<vmem>>, vector<1x32x64xf32>,
    return
  }
  func.func @transform_0(%arg0: i32) -> (i32, i32, i32) {
    %c0_i32 = arith.constant 0 : i32
    %c0_i32_0 = arith.constant 0 : i32
    %c0_i32_1 = arith.constant 0 : i32
    return %arg0, %c0_i32, %c0_i32_0 : i32, i32, i32
  }
  func.func @transform_1(%arg0: i32) -> (i32, i32) {
    %c0_i32 = arith.constant 0 : i32
    %c0_i32_0 = arith.constant 0 : i32
    %c0_i32_1 = arith.constant 0 : i32
    return %c0_i32, %c0_i32_0 : i32, i32
  }
  func.func @transform_2(%arg0: i32) -> (i32, i32) {
    %c0_i32 = arith.constant 0 : i32
    %c0_i32_0 = arith.constant 0 : i32
    %c0_i32_1 = arith.constant 0 : i32
    return %c0_i32, %c0_i32_0 : i32, i32
  }
  func.func @transform_3(%arg0: i32) -> (i32, i32) {
    %c0_i32 = arith.constant 0 : i32
    %c0_i32_0 = arith.constant 0 : i32
    %c0_i32_1 = arith.constant 0 : i32
    return %c0_i32, %c0_i32_0 : i32, i32
  }
  func.func @transform_4(%arg0: i32) -> (i32, i32) {
    %c0_i32 = arith.constant 0 : i32
    %c0_i32_0 = arith.constant 0 : i32
    %c0_i32_1 = arith.constant 0 : i32
    return %c0_i32, %c0_i32_0 : i32, i32
  }
  func.func @transform_5(%arg0: i32) -> (i32, i32) {
    %c0_i32 = arith.constant 0 : i32
    %c0_i32_0 = arith.constant 0 : i32
    %c0_i32_1 = arith.constant 0 : i32
    return %c0_i32, %c0_i32_0 : i32, i32
  }
  func.func @transform_6(%arg0: i32) -> (i32, i32) {
    %c0_i32 = arith.constant 0 : i32
    %c0_i32_0 = arith.constant 0 : i32
    %c0_i32_1 = arith.constant 0 : i32
    return %c0_i32, %c0_i32_0 : i32, i32
  }
  func.func @transform_7(%arg0: i32) -> (i32, i32) {
    %c0_i32 = arith.constant 0 : i32
    %c0_i32_0 = arith.constant 0 : i32
    %c0_i32_1 = arith.constant 0 : i32
    return %c0_i32, %c0_i32_0 : i32, i32
  }
  func.func @transform_8(%arg0: i32) -> (i32, i32) {
    %c0_i32 = arith.constant 0 : i32
    %c0_i32_0 = arith.constant 0 : i32
    %c0_i32_1 = arith.constant 0 : i32
    return %c0_i32, %c0_i32_0 : i32, i32
  }
  func.func @transform_9(%arg0: i32) -> (i32, i32) {
    %c0_i32 = arith.constant 0 : i32
    %c0_i32_0 = arith.constant 0 : i32
    %c0_i32_1 = arith.constant 0 : i32
    return %c0_i32, %c0_i32_0 : i32, i32
  }
  func.func @transform_10(%arg0: i32) -> (i32, i32) {
    %c0_i32 = arith.constant 0 : i32
    %c0_i32_0 = arith.constant 0 : i32
    %c0_i32_1 = arith.constant 0 : i32
    return %c0_i32, %c0_i32_0 : i32, i32
  }
  func.func @transform_11(%arg0: i32) -> (i32, i32) {
    %c0_i32 = arith.constant 0 : i32
    %c0_i32_0 = arith.constant 0 : i32
    %c0_i32_1 = arith.constant 0 : i32
    return %c0_i32, %c0_i32_0 : i32, i32
  }
  func.func @transform_12(%arg0: i32) -> (i32, i32, i32) {
    %c0_i32 = arith.constant 0 : i32
    %c0_i32_0 = arith.constant 0 : i32
    %c0_i32_1 = arith.constant 0 : i32
    return %arg0, %c0_i32, %c0_i32_0 : i32, i32, i32
  }
}

module attributes {stable_mosaic.version = 11 : i64} {
  func.func @_tail_kernel(%arg0: memref<2x32x64xf32, #tpu.memory_space<vmem>>, %arg1: memref<2x2xf32, #tpu.memory_space<vmem>>, %arg2: memref<1x64xf32, #tpu.memory_space<vmem>>, %arg3: memref<1x64xf32, #tpu.memory_space<vmem>>, %arg4: memref<64x128xbf16, #tpu.memory_space<vmem>>, %arg5: memref<1x128xf32, #tpu.memory_space<vmem>>, %arg6: memref<128x80xbf16, #tpu.memory_space<vmem>>, %arg7: memref<1x80xf32, #tpu.memory_space<vmem>>, %arg8: memref<80x200xbf16, #tpu.memory_space<vmem>>, %arg9: memref<2x200xbf16, #tpu.memory_space<vmem>>, %arg10: memref<1x200xf32, #tpu.memory_space<vmem>>, %arg11: memref<200x10xbf16, #tpu.memory_space<vmem>>, %arg12: memref<1x10xf32, #tpu.memory_space<vmem>>, %arg13: memref<2x10xf32, #tpu.memory_space<vmem>>) attributes {dimension_semantics = [], scalar_prefetch = 0 : i64, scratch_operands = 0 : i64, tpu.core_type = #tpu.core_type<tc>} {
    %c0 = arith.constant 0 : index
    %c0_0 = arith.constant 0 : index
    %c0_1 = arith.constant 0 : index
    %0 = vector.load %arg0[%c0, %c0_0, %c0_1] : memref<2x32x64xf32, #tpu.memory_space<vmem>>, vector<2x32x64xf32>
    %cst = arith.constant dense<0xFF800000> : vector<2x64xf32>
    %1 = vector.multi_reduction <maximumf>, %0, %cst [1] : vector<2x32x64xf32> to vector<2x64xf32>
    %c0_2 = arith.constant 0 : index
    %c0_3 = arith.constant 0 : index
    %2 = vector.load %arg2[%c0_2, %c0_3] : memref<1x64xf32, #tpu.memory_space<vmem>>, vector<1x64xf32>
    %c0_4 = arith.constant 0 : index
    %c0_5 = arith.constant 0 : index
    %3 = vector.load %arg3[%c0_4, %c0_5] : memref<1x64xf32, #tpu.memory_space<vmem>>, vector<1x64xf32>
    %cst_6 = arith.constant dense<0.000000e+00> : vector<2xf32>
    %4 = vector.multi_reduction <add>, %1, %cst_6 [1] : vector<2x64xf32> to vector<2xf32>
    %5 = vector.shape_cast %4 : vector<2xf32> to vector<2x1xf32>
    %cst_7 = arith.constant 6.400000e+01 : f32
    %6 = vector.broadcast %cst_7 : f32 to vector<2x1xf32>
    %7 = arith.divf %5, %6 : vector<2x1xf32>
    %8 = vector.broadcast %7 : vector<2x1xf32> to vector<2x64xf32>
    %9 = arith.subf %1, %8 : vector<2x64xf32>
    %10 = arith.mulf %9, %9 : vector<2x64xf32>
    %cst_8 = arith.constant dense<0.000000e+00> : vector<2xf32>
    %11 = vector.multi_reduction <add>, %10, %cst_8 [1] : vector<2x64xf32> to vector<2xf32>
    %12 = vector.shape_cast %11 : vector<2xf32> to vector<2x1xf32>
    %cst_9 = arith.constant 6.400000e+01 : f32
    %13 = vector.broadcast %cst_9 : f32 to vector<2x1xf32>
    %14 = arith.divf %12, %13 : vector<2x1xf32>
    %cst_10 = arith.constant 9.99999974E-6 : f32
    %15 = vector.broadcast %cst_10 : f32 to vector<2x1xf32>
    %16 = arith.addf %14, %15 : vector<2x1xf32>
    %17 = math.rsqrt %16 : vector<2x1xf32>
    %18 = vector.broadcast %17 : vector<2x1xf32> to vector<2x64xf32>
    %19 = arith.mulf %9, %18 : vector<2x64xf32>
    %20 = vector.broadcast %2 : vector<1x64xf32> to vector<2x64xf32>
    %21 = arith.mulf %19, %20 : vector<2x64xf32>
    %22 = vector.broadcast %3 : vector<1x64xf32> to vector<2x64xf32>
    %23 = arith.addf %21, %22 : vector<2x64xf32>
    %24 = arith.truncf %23 : vector<2x64xf32> to vector<2x64xbf16>
    %c0_11 = arith.constant 0 : index
    %c0_12 = arith.constant 0 : index
    %25 = vector.load %arg4[%c0_11, %c0_12] : memref<64x128xbf16, #tpu.memory_space<vmem>>, vector<64x128xbf16>
    %cst_13 = arith.constant dense<0.000000e+00> : vector<2x128xf32>
    %26 = tpu.matmul %24, %25, %cst_13 {dimension_numbers = #tpu.dot_dimension_numbers<[1], [0], [0], [1], [0, 0, 1, 1], [], []>} : vector<2x64xbf16>, vector<64x128xbf16>, vector<2x128xf32> -> vector<2x128xf32>
    %c0_14 = arith.constant 0 : index
    %c0_15 = arith.constant 0 : index
    %27 = vector.load %arg5[%c0_14, %c0_15] : memref<1x128xf32, #tpu.memory_space<vmem>>, vector<1x128xf32>
    %28 = vector.broadcast %27 : vector<1x128xf32> to vector<2x128xf32>
    %29 = arith.addf %26, %28 : vector<2x128xf32>
    %30 = arith.mulf %29, %29 : vector<2x128xf32>
    %31 = arith.mulf %29, %30 : vector<2x128xf32>
    %cst_16 = arith.constant 4.471500e-02 : f32
    %32 = vector.broadcast %cst_16 : f32 to vector<2x128xf32>
    %33 = arith.mulf %32, %31 : vector<2x128xf32>
    %34 = arith.addf %29, %33 : vector<2x128xf32>
    %cst_17 = arith.constant 0.797884583 : f32
    %35 = vector.broadcast %cst_17 : f32 to vector<2x128xf32>
    %36 = arith.mulf %35, %34 : vector<2x128xf32>
    %37 = math.tanh %36 : vector<2x128xf32>
    %cst_18 = arith.constant 1.000000e+00 : f32
    %38 = vector.broadcast %cst_18 : f32 to vector<2x128xf32>
    %39 = arith.addf %38, %37 : vector<2x128xf32>
    %cst_19 = arith.constant 5.000000e-01 : f32
    %40 = vector.broadcast %cst_19 : f32 to vector<2x128xf32>
    %41 = arith.mulf %40, %39 : vector<2x128xf32>
    %42 = arith.mulf %29, %41 : vector<2x128xf32>
    %43 = arith.truncf %42 : vector<2x128xf32> to vector<2x128xbf16>
    %c0_20 = arith.constant 0 : index
    %c0_21 = arith.constant 0 : index
    %44 = vector.load %arg6[%c0_20, %c0_21] : memref<128x80xbf16, #tpu.memory_space<vmem>>, vector<128x80xbf16>
    %cst_22 = arith.constant dense<0.000000e+00> : vector<2x80xf32>
    %45 = tpu.matmul %43, %44, %cst_22 {dimension_numbers = #tpu.dot_dimension_numbers<[1], [0], [0], [1], [0, 0, 1, 1], [], []>} : vector<2x128xbf16>, vector<128x80xbf16>, vector<2x80xf32> -> vector<2x80xf32>
    %c0_23 = arith.constant 0 : index
    %c0_24 = arith.constant 0 : index
    %46 = vector.load %arg7[%c0_23, %c0_24] : memref<1x80xf32, #tpu.memory_space<vmem>>, vector<1x80xf32>
    %47 = vector.broadcast %46 : vector<1x80xf32> to vector<2x80xf32>
    %48 = arith.addf %45, %47 : vector<2x80xf32>
    %49 = arith.mulf %48, %48 : vector<2x80xf32>
    %50 = arith.mulf %48, %49 : vector<2x80xf32>
    %cst_25 = arith.constant 4.471500e-02 : f32
    %51 = vector.broadcast %cst_25 : f32 to vector<2x80xf32>
    %52 = arith.mulf %51, %50 : vector<2x80xf32>
    %53 = arith.addf %48, %52 : vector<2x80xf32>
    %cst_26 = arith.constant 0.797884583 : f32
    %54 = vector.broadcast %cst_26 : f32 to vector<2x80xf32>
    %55 = arith.mulf %54, %53 : vector<2x80xf32>
    %56 = math.tanh %55 : vector<2x80xf32>
    %cst_27 = arith.constant 1.000000e+00 : f32
    %57 = vector.broadcast %cst_27 : f32 to vector<2x80xf32>
    %58 = arith.addf %57, %56 : vector<2x80xf32>
    %cst_28 = arith.constant 5.000000e-01 : f32
    %59 = vector.broadcast %cst_28 : f32 to vector<2x80xf32>
    %60 = arith.mulf %59, %58 : vector<2x80xf32>
    %61 = arith.mulf %48, %60 : vector<2x80xf32>
    %c0_29 = arith.constant 0 : index
    %c0_30 = arith.constant 0 : index
    %62 = vector.load %arg1[%c0_29, %c0_30] : memref<2x2xf32, #tpu.memory_space<vmem>>, vector<2x2xf32>
    %63 = arith.mulf %62, %62 : vector<2x2xf32>
    %64 = arith.mulf %62, %63 : vector<2x2xf32>
    %cst_31 = arith.constant 4.471500e-02 : f32
    %65 = vector.broadcast %cst_31 : f32 to vector<2x2xf32>
    %66 = arith.mulf %65, %64 : vector<2x2xf32>
    %67 = arith.addf %62, %66 : vector<2x2xf32>
    %cst_32 = arith.constant 0.797884583 : f32
    %68 = vector.broadcast %cst_32 : f32 to vector<2x2xf32>
    %69 = arith.mulf %68, %67 : vector<2x2xf32>
    %70 = math.tanh %69 : vector<2x2xf32>
    %cst_33 = arith.constant 1.000000e+00 : f32
    %71 = vector.broadcast %cst_33 : f32 to vector<2x2xf32>
    %72 = arith.addf %71, %70 : vector<2x2xf32>
    %cst_34 = arith.constant 5.000000e-01 : f32
    %73 = vector.broadcast %cst_34 : f32 to vector<2x2xf32>
    %74 = arith.mulf %73, %72 : vector<2x2xf32>
    %75 = arith.mulf %62, %74 : vector<2x2xf32>
    %76 = arith.truncf %61 : vector<2x80xf32> to vector<2x80xbf16>
    %c0_35 = arith.constant 0 : index
    %c0_36 = arith.constant 0 : index
    %77 = vector.load %arg8[%c0_35, %c0_36] : memref<80x200xbf16, #tpu.memory_space<vmem>>, vector<80x200xbf16>
    %cst_37 = arith.constant dense<0.000000e+00> : vector<2x200xf32>
    %78 = tpu.matmul %76, %77, %cst_37 {dimension_numbers = #tpu.dot_dimension_numbers<[1], [0], [0], [1], [0, 0, 1, 1], [], []>} : vector<2x80xbf16>, vector<80x200xbf16>, vector<2x200xf32> -> vector<2x200xf32>
    %79 = arith.truncf %75 : vector<2x2xf32> to vector<2x2xbf16>
    %c0_38 = arith.constant 0 : index
    %c0_39 = arith.constant 0 : index
    %80 = vector.load %arg9[%c0_38, %c0_39] : memref<2x200xbf16, #tpu.memory_space<vmem>>, vector<2x200xbf16>
    %cst_40 = arith.constant dense<0.000000e+00> : vector<2x200xf32>
    %81 = tpu.matmul %79, %80, %cst_40 {dimension_numbers = #tpu.dot_dimension_numbers<[1], [0], [0], [1], [0, 0, 1, 1], [], []>} : vector<2x2xbf16>, vector<2x200xbf16>, vector<2x200xf32> -> vector<2x200xf32>
    %82 = arith.addf %78, %81 : vector<2x200xf32>
    %c0_41 = arith.constant 0 : index
    %c0_42 = arith.constant 0 : index
    %83 = vector.load %arg10[%c0_41, %c0_42] : memref<1x200xf32, #tpu.memory_space<vmem>>, vector<1x200xf32>
    %84 = vector.broadcast %83 : vector<1x200xf32> to vector<2x200xf32>
    %85 = arith.addf %82, %84 : vector<2x200xf32>
    %86 = arith.mulf %85, %85 : vector<2x200xf32>
    %87 = arith.mulf %85, %86 : vector<2x200xf32>
    %cst_43 = arith.constant 4.471500e-02 : f32
    %88 = vector.broadcast %cst_43 : f32 to vector<2x200xf32>
    %89 = arith.mulf %88, %87 : vector<2x200xf32>
    %90 = arith.addf %85, %89 : vector<2x200xf32>
    %cst_44 = arith.constant 0.797884583 : f32
    %91 = vector.broadcast %cst_44 : f32 to vector<2x200xf32>
    %92 = arith.mulf %91, %90 : vector<2x200xf32>
    %93 = math.tanh %92 : vector<2x200xf32>
    %cst_45 = arith.constant 1.000000e+00 : f32
    %94 = vector.broadcast %cst_45 : f32 to vector<2x200xf32>
    %95 = arith.addf %94, %93 : vector<2x200xf32>
    %cst_46 = arith.constant 5.000000e-01 : f32
    %96 = vector.broadcast %cst_46 : f32 to vector<2x200xf32>
    %97 = arith.mulf %96, %95 : vector<2x200xf32>
    %98 = arith.mulf %85, %97 : vector<2x200xf32>
    %99 = arith.truncf %98 : vector<2x200xf32> to vector<2x200xbf16>
    %c0_47 = arith.constant 0 : index
    %c0_48 = arith.constant 0 : index
    %100 = vector.load %arg11[%c0_47, %c0_48] : memref<200x10xbf16, #tpu.memory_space<vmem>>, vector<200x10xbf16>
    %cst_49 = arith.constant dense<0.000000e+00> : vector<2x10xf32>
    %101 = tpu.matmul %99, %100, %cst_49 {dimension_numbers = #tpu.dot_dimension_numbers<[1], [0], [0], [1], [0, 0, 1, 1], [], []>} : vector<2x200xbf16>, vector<200x10xbf16>, vector<2x10xf32> -> vector<2x10xf32>
    %c0_50 = arith.constant 0 : index
    %c0_51 = arith.constant 0 : index
    %102 = vector.load %arg12[%c0_50, %c0_51] : memref<1x10xf32, #tpu.memory_space<vmem>>, vector<1x10xf32>
    %103 = vector.broadcast %102 : vector<1x10xf32> to vector<2x10xf32>
    %104 = arith.addf %101, %103 : vector<2x10xf32>
    %c0_52 = arith.constant 0 : index
    %c0_53 = arith.constant 0 : index
    %105 = vector.load %arg13[%c0_52, %c0_53] : memref<2x10xf32, #tpu.memory_space<vmem>>, vector<2x10xf32>
    tpu.vector_store %arg13[%c0_52, %c0_53], %104 {strides = array<i32>} : memref<2x10xf32, #tpu.memory_space<vmem>>, vector<2x10xf32>,
    return
  }
}

</mosaic_0001>

<bundles_post_ra>
// kernel: neg.16
= control target key start
LH: loop header
LB: loop body
LE: loop exit
PB: predicated region body
PF: predicated region fallthrough
CT: control target
= control target key end

     0   :  { %s72_s0 = inlined_call_operand.vmem [shape: f32[2,16,64], index: 0, kind: input, shape index: {}]   ;;  %s73_s1 = inlined_call_operand.vmem [shape: f32[2,16,64], index: 1, kind: output, shape index: {}]  }
   0x1   :  { %v2_v0 = vld [vmem:[%s72_s0] sm:$0xff]  ;;  %v32_v1 = vld [vmem:[%s72_s0 + $0x10] sm:$0xff]  ;;  %v34_v2 = vld [vmem:[%s72_s0 + $0x8] sm:$0xff] }
   0x2   :  { %v5_v3 = vxor.u32 2147483648, %v2_v0  ;;  %v12_v4 = vxor.u32 2147483648, %v32_v1  ;;  %v20_v5 = vxor.u32 2147483648, %v34_v2  ;;  %v36_v6 = vld [vmem:[%s72_s0 + $0x18] sm:$0xff] }
   0x3   :  { %v28_v7 = vxor.u32 2147483648, %v36_v6 }
   0x4   :  { %7 = vst [vmem:[%s73_s1] sm:$0xff] %v5_v3  ;;  %33 = vst [vmem:[%s73_s1 + $0x10] sm:$0xff] %v12_v4 }
   0x5   :  { %35 = vst [vmem:[%s73_s1 + $0x8] sm:$0xff] %v20_v5  ;;  %37 = vst [vmem:[%s73_s1 + $0x18] sm:$0xff] %v28_v7 }

// kernel: sub.93
= control target key start
LH: loop header
LB: loop body
LE: loop exit
PB: predicated region body
PF: predicated region fallthrough
CT: control target
= control target key end

     0   :  { %s1642_s0 = inlined_call_operand.vmem [shape: f32[2,64,3], index: 0, kind: input, shape index: {}]   ;;  %s1643_s1 = inlined_call_operand.vmem [shape: f32[2,16,64,3], index: 1, kind: output, shape index: {}]  }
   0x1   :  { %v4_v0 = vld [vmem:[%s1642_s0] sm:$0xff]  ;;  %v578_v2 = vld [vmem:[%s1642_s0 + $0x8] sm:$0xff]  ;;  %v612_v4 = vld [vmem:[%s1642_s0 + $0x10] sm:$0xff] }
   0x2   :  { %v546_v1 = vld [vmem:[%s1642_s0 + $0x40] sm:$0xff]  ;;  %5 = vst [vmem:[%s1643_s1] sm:$0xff] %v4_v0  ;;  %548 = vst [vmem:[%s1643_s1 + $0x40] sm:$0xff] %v4_v0  ;;  %v580_v3 = vld [vmem:[%s1642_s0 + $0x48] sm:$0xff] }
   0x3   :  { %547 = vst [vmem:[%s1643_s1 + $0x400] sm:$0xff] %v546_v1  ;;  %549 = vst [vmem:[%s1643_s1 + $0x440] sm:$0xff] %v546_v1  ;;  %v614_v5 = vld [vmem:[%s1642_s0 + $0x50] sm:$0xff]  ;;  %v646_v6 = vld [vmem:[%s1642_s0 + $0x18] sm:$0xff] }
   0x4   :  { %550 = vst [vmem:[%s1643_s1 + $0x80] sm:$0xff] %v4_v0  ;;  %551 = vst [vmem:[%s1643_s1 + $0x480] sm:$0xff] %v546_v1  ;;  %v648_v7 = vld [vmem:[%s1642_s0 + $0x58] sm:$0xff]  ;;  %v680_v8 = vld [vmem:[%s1642_s0 + $0x20] sm:$0xff] }
   0x5   :  { %552 = vst [vmem:[%s1643_s1 + $0xc0] sm:$0xff] %v4_v0  ;;  %553 = vst [vmem:[%s1643_s1 + $0x4c0] sm:$0xff] %v546_v1  ;;  %v682_v9 = vld [vmem:[%s1642_s0 + $0x60] sm:$0xff]  ;;  %v714_v10 = vld [vmem:[%s1642_s0 + $0x28] sm:$0xff] }
   0x6   :  { %554 = vst [vmem:[%s1643_s1 + $0x100] sm:$0xff] %v4_v0  ;;  %555 = vst [vmem:[%s1643_s1 + $0x500] sm:$0xff] %v546_v1  ;;  %v716_v11 = vld [vmem:[%s1642_s0 + $0x68] sm:$0xff]  ;;  %v748_v12 = vld [vmem:[%s1642_s0 + $0x30] sm:$0xff] }
   0x7   :  { %556 = vst [vmem:[%s1643_s1 + $0x140] sm:$0xff] %v4_v0  ;;  %557 = vst [vmem:[%s1643_s1 + $0x540] sm:$0xff] %v546_v1  ;;  %v750_v13 = vld [vmem:[%s1642_s0 + $0x70] sm:$0xff]  ;;  %v782_v14 = vld [vmem:[%s1642_s0 + $0x38] sm:$0xff] }
   0x8   :  { %558 = vst [vmem:[%s1643_s1 + $0x180] sm:$0xff] %v4_v0  ;;  %559 = vst [vmem:[%s1643_s1 + $0x580] sm:$0xff] %v546_v1  ;;  %v784_v15 = vld [vmem:[%s1642_s0 + $0x78] sm:$0xff] }
   0x9   :  { %560 = vst [vmem:[%s1643_s1 + $0x1c0] sm:$0xff] %v4_v0  ;;  %561 = vst [vmem:[%s1643_s1 + $0x5c0] sm:$0xff] %v546_v1 }
   0xa   :  { %562 = vst [vmem:[%s1643_s1 + $0x200] sm:$0xff] %v4_v0  ;;  %563 = vst [vmem:[%s1643_s1 + $0x600] sm:$0xff] %v546_v1 }
   0xb   :  { %564 = vst [vmem:[%s1643_s1 + $0x240] sm:$0xff] %v4_v0  ;;  %565 = vst [vmem:[%s1643_s1 + $0x640] sm:$0xff] %v546_v1 }
   0xc   :  { %566 = vst [vmem:[%s1643_s1 + $0x280] sm:$0xff] %v4_v0  ;;  %567 = vst [vmem:[%s1643_s1 + $0x680] sm:$0xff] %v546_v1 }
   0xd   :  { %568 = vst [vmem:[%s1643_s1 + $0x2c0] sm:$0xff] %v4_v0  ;;  %569 = vst [vmem:[%s1643_s1 + $0x6c0] sm:$0xff] %v546_v1 }
   0xe   :  { %570 = vst [vmem:[%s1643_s1 + $0x300] sm:$0xff] %v4_v0  ;;  %571 = vst [vmem:[%s1643_s1 + $0x700] sm:$0xff] %v546_v1 }
   0xf   :  { %572 = vst [vmem:[%s1643_s1 + $0x340] sm:$0xff] %v4_v0  ;;  %573 = vst [vmem:[%s1643_s1 + $0x740] sm:$0xff] %v546_v1 }
  0x10   :  { %574 = vst [vmem:[%s1643_s1 + $0x380] sm:$0xff] %v4_v0  ;;  %575 = vst [vmem:[%s1643_s1 + $0x780] sm:$0xff] %v546_v1 }
  0x11   :  { %576 = vst [vmem:[%s1643_s1 + $0x3c0] sm:$0xff] %v4_v0  ;;  %577 = vst [vmem:[%s1643_s1 + $0x7c0] sm:$0xff] %v546_v1 }
  0x12   :  { %579 = vst [vmem:[%s1643_s1 + $0x8] sm:$0xff] %v578_v2  ;;  %582 = vst [vmem:[%s1643_s1 + $0x48] sm:$0xff] %v578_v2 }
  0x13   :  { %584 = vst [vmem:[%s1643_s1 + $0x88] sm:$0xff] %v578_v2  ;;  %586 = vst [vmem:[%s1643_s1 + $0xc8] sm:$0xff] %v578_v2 }
  0x14   :  { %588 = vst [vmem:[%s1643_s1 + $0x108] sm:$0xff] %v578_v2  ;;  %590 = vst [vmem:[%s1643_s1 + $0x148] sm:$0xff] %v578_v2 }
  0x15   :  { %592 = vst [vmem:[%s1643_s1 + $0x188] sm:$0xff] %v578_v2  ;;  %594 = vst [vmem:[%s1643_s1 + $0x1c8] sm:$0xff] %v578_v2 }
  0x16   :  { %596 = vst [vmem:[%s1643_s1 + $0x208] sm:$0xff] %v578_v2  ;;  %598 = vst [vmem:[%s1643_s1 + $0x248] sm:$0xff] %v578_v2 }
  0x17   :  { %600 = vst [vmem:[%s1643_s1 + $0x288] sm:$0xff] %v578_v2  ;;  %602 = vst [vmem:[%s1643_s1 + $0x2c8] sm:$0xff] %v578_v2 }
  0x18   :  { %604 = vst [vmem:[%s1643_s1 + $0x308] sm:$0xff] %v578_v2  ;;  %606 = vst [vmem:[%s1643_s1 + $0x348] sm:$0xff] %v578_v2 }
  0x19   :  { %608 = vst [vmem:[%s1643_s1 + $0x388] sm:$0xff] %v578_v2  ;;  %610 = vst [vmem:[%s1643_s1 + $0x3c8] sm:$0xff] %v578_v2 }
  0x1a   :  { %581 = vst [vmem:[%s1643_s1 + $0x408] sm:$0xff] %v580_v3  ;;  %583 = vst [vmem:[%s1643_s1 + $0x448] sm:$0xff] %v580_v3 }
  0x1b   :  { %585 = vst [vmem:[%s1643_s1 + $0x488] sm:$0xff] %v580_v3  ;;  %587 = vst [vmem:[%s1643_s1 + $0x4c8] sm:$0xff] %v580_v3 }
  0x1c   :  { %589 = vst [vmem:[%s1643_s1 + $0x508] sm:$0xff] %v580_v3  ;;  %591 = vst [vmem:[%s1643_s1 + $0x548] sm:$0xff] %v580_v3 }
  0x1d   :  { %593 = vst [vmem:[%s1643_s1 + $0x588] sm:$0xff] %v580_v3  ;;  %595 = vst [vmem:[%s1643_s1 + $0x5c8] sm:$0xff] %v580_v3 }
  0x1e   :  { %597 = vst [vmem:[%s1643_s1 + $0x608] sm:$0xff] %v580_v3  ;;  %599 = vst [vmem:[%s1643_s1 + $0x648] sm:$0xff] %v580_v3 }
  0x1f   :  { %601 = vst [vmem:[%s1643_s1 + $0x688] sm:$0xff] %v580_v3  ;;  %603 = vst [vmem:[%s1643_s1 + $0x6c8] sm:$0xff] %v580_v3 }
  0x20   :  { %605 = vst [vmem:[%s1643_s1 + $0x708] sm:$0xff] %v580_v3  ;;  %607 = vst [vmem:[%s1643_s1 + $0x748] sm:$0xff] %v580_v3 }
  0x21   :  { %609 = vst [vmem:[%s1643_s1 + $0x788] sm:$0xff] %v580_v3  ;;  %611 = vst [vmem:[%s1643_s1 + $0x7c8] sm:$0xff] %v580_v3 }
  0x22   :  { %613 = vst [vmem:[%s1643_s1 + $0x10] sm:$0xff] %v612_v4  ;;  %615 = vst [vmem:[%s1643_s1 + $0x410] sm:$0xff] %v614_v5 }
  0x23   :  { %616 = vst [vmem:[%s1643_s1 + $0x50] sm:$0xff] %v612_v4  ;;  %617 = vst [vmem:[%s1643_s1 + $0x450] sm:$0xff] %v614_v5 }
  0x24   :  { %618 = vst [vmem:[%s1643_s1 + $0x90] sm:$0xff] %v612_v4  ;;  %619 = vst [vmem:[%s1643_s1 + $0x490] sm:$0xff] %v614_v5 }
  0x25   :  { %620 = vst [vmem:[%s1643_s1 + $0xd0] sm:$0xff] %v612_v4  ;;  %621 = vst [vmem:[%s1643_s1 + $0x4d0] sm:$0xff] %v614_v5 }
  0x26   :  { %622 = vst [vmem:[%s1643_s1 + $0x110] sm:$0xff] %v612_v4  ;;  %623 = vst [vmem:[%s1643_s1 + $0x510] sm:$0xff] %v614_v5 }
  0x27   :  { %624 = vst [vmem:[%s1643_s1 + $0x150] sm:$0xff] %v612_v4  ;;  %625 = vst [vmem:[%s1643_s1 + $0x550] sm:$0xff] %v614_v5 }
  0x28   :  { %626 = vst [vmem:[%s1643_s1 + $0x190] sm:$0xff] %v612_v4  ;;  %627 = vst [vmem:[%s1643_s1 + $0x590] sm:$0xff] %v614_v5 }
  0x29   :  { %628 = vst [vmem:[%s1643_s1 + $0x1d0] sm:$0xff] %v612_v4  ;;  %629 = vst [vmem:[%s1643_s1 + $0x5d0] sm:$0xff] %v614_v5 }
  0x2a   :  { %630 = vst [vmem:[%s1643_s1 + $0x210] sm:$0xff] %v612_v4  ;;  %631 = vst [vmem:[%s1643_s1 + $0x610] sm:$0xff] %v614_v5 }
  0x2b   :  { %632 = vst [vmem:[%s1643_s1 + $0x250] sm:$0xff] %v612_v4  ;;  %633 = vst [vmem:[%s1643_s1 + $0x650] sm:$0xff] %v614_v5 }
  0x2c   :  { %634 = vst [vmem:[%s1643_s1 + $0x290] sm:$0xff] %v612_v4  ;;  %635 = vst [vmem:[%s1643_s1 + $0x690] sm:$0xff] %v614_v5 }
  0x2d   :  { %636 = vst [vmem:[%s1643_s1 + $0x2d0] sm:$0xff] %v612_v4  ;;  %637 = vst [vmem:[%s1643_s1 + $0x6d0] sm:$0xff] %v614_v5 }
  0x2e   :  { %638 = vst [vmem:[%s1643_s1 + $0x310] sm:$0xff] %v612_v4  ;;  %639 = vst [vmem:[%s1643_s1 + $0x710] sm:$0xff] %v614_v5 }
  0x2f   :  { %640 = vst [vmem:[%s1643_s1 + $0x350] sm:$0xff] %v612_v4  ;;  %641 = vst [vmem:[%s1643_s1 + $0x750] sm:$0xff] %v614_v5 }
  0x30   :  { %642 = vst [vmem:[%s1643_s1 + $0x390] sm:$0xff] %v612_v4  ;;  %643 = vst [vmem:[%s1643_s1 + $0x790] sm:$0xff] %v614_v5 }
  0x31   :  { %644 = vst [vmem:[%s1643_s1 + $0x3d0] sm:$0xff] %v612_v4  ;;  %645 = vst [vmem:[%s1643_s1 + $0x7d0] sm:$0xff] %v614_v5 }
  0x32   :  { %647 = vst [vmem:[%s1643_s1 + $0x18] sm:$0xff] %v646_v6  ;;  %649 = vst [vmem:[%s1643_s1 + $0x418] sm:$0xff] %v648_v7 }
  0x33   :  { %650 = vst [vmem:[%s1643_s1 + $0x58] sm:$0xff] %v646_v6  ;;  %651 = vst [vmem:[%s1643_s1 + $0x458] sm:$0xff] %v648_v7 }
  0x34   :  { %652 = vst [vmem:[%s1643_s1 + $0x98] sm:$0xff] %v646_v6  ;;  %653 = vst [vmem:[%s1643_s1 + $0x498] sm:$0xff] %v648_v7 }
  0x35   :  { %654 = vst [vmem:[%s1643_s1 + $0xd8] sm:$0xff] %v646_v6  ;;  %655 = vst [vmem:[%s1643_s1 + $0x4d8] sm:$0xff] %v648_v7 }
  0x36   :  { %656 = vst [vmem:[%s1643_s1 + $0x118] sm:$0xff] %v646_v6  ;;  %657 = vst [vmem:[%s1643_s1 + $0x518] sm:$0xff] %v648_v7 }
  0x37   :  { %658 = vst [vmem:[%s1643_s1 + $0x158] sm:$0xff] %v646_v6  ;;  %659 = vst [vmem:[%s1643_s1 + $0x558] sm:$0xff] %v648_v7 }
  0x38   :  { %660 = vst [vmem:[%s1643_s1 + $0x198] sm:$0xff] %v646_v6  ;;  %661 = vst [vmem:[%s1643_s1 + $0x598] sm:$0xff] %v648_v7 }
  0x39   :  { %662 = vst [vmem:[%s1643_s1 + $0x1d8] sm:$0xff] %v646_v6  ;;  %663 = vst [vmem:[%s1643_s1 + $0x5d8] sm:$0xff] %v648_v7 }
  0x3a   :  { %664 = vst [vmem:[%s1643_s1 + $0x218] sm:$0xff] %v646_v6  ;;  %665 = vst [vmem:[%s1643_s1 + $0x618] sm:$0xff] %v648_v7 }
  0x3b   :  { %666 = vst [vmem:[%s1643_s1 + $0x258] sm:$0xff] %v646_v6  ;;  %667 = vst [vmem:[%s1643_s1 + $0x658] sm:$0xff] %v648_v7 }
  0x3c   :  { %668 = vst [vmem:[%s1643_s1 + $0x298] sm:$0xff] %v646_v6  ;;  %669 = vst [vmem:[%s1643_s1 + $0x698] sm:$0xff] %v648_v7 }
  0x3d   :  { %670 = vst [vmem:[%s1643_s1 + $0x2d8] sm:$0xff] %v646_v6  ;;  %671 = vst [vmem:[%s1643_s1 + $0x6d8] sm:$0xff] %v648_v7 }
  0x3e   :  { %672 = vst [vmem:[%s1643_s1 + $0x318] sm:$0xff] %v646_v6  ;;  %673 = vst [vmem:[%s1643_s1 + $0x718] sm:$0xff] %v648_v7 }
  0x3f   :  { %674 = vst [vmem:[%s1643_s1 + $0x358] sm:$0xff] %v646_v6  ;;  %675 = vst [vmem:[%s1643_s1 + $0x758] sm:$0xff] %v648_v7 }
  0x40   :  { %676 = vst [vmem:[%s1643_s1 + $0x398] sm:$0xff] %v646_v6  ;;  %677 = vst [vmem:[%s1643_s1 + $0x798] sm:$0xff] %v648_v7 }
  0x41   :  { %678 = vst [vmem:[%s1643_s1 + $0x3d8] sm:$0xff] %v646_v6  ;;  %679 = vst [vmem:[%s1643_s1 + $0x7d8] sm:$0xff] %v648_v7 }
  0x42   :  { %681 = vst [vmem:[%s1643_s1 + $0x20] sm:$0xff] %v680_v8  ;;  %684 = vst [vmem:[%s1643_s1 + $0x60] sm:$0xff] %v680_v8 }
  0x43   :  { %686 = vst [vmem:[%s1643_s1 + $0xa0] sm:$0xff] %v680_v8  ;;  %688 = vst [vmem:[%s1643_s1 + $0xe0] sm:$0xff] %v680_v8 }
  0x44   :  { %690 = vst [vmem:[%s1643_s1 + $0x120] sm:$0xff] %v680_v8  ;;  %692 = vst [vmem:[%s1643_s1 + $0x160] sm:$0xff] %v680_v8 }
  0x45   :  { %694 = vst [vmem:[%s1643_s1 + $0x1a0] sm:$0xff] %v680_v8  ;;  %696 = vst [vmem:[%s1643_s1 + $0x1e0] sm:$0xff] %v680_v8 }
  0x46   :  { %698 = vst [vmem:[%s1643_s1 + $0x220] sm:$0xff] %v680_v8  ;;  %700 = vst [vmem:[%s1643_s1 + $0x260] sm:$0xff] %v680_v8 }
  0x47   :  { %702 = vst [vmem:[%s1643_s1 + $0x2a0] sm:$0xff] %v680_v8  ;;  %704 = vst [vmem:[%s1643_s1 + $0x2e0] sm:$0xff] %v680_v8 }
  0x48   :  { %706 = vst [vmem:[%s1643_s1 + $0x320] sm:$0xff] %v680_v8  ;;  %708 = vst [vmem:[%s1643_s1 + $0x360] sm:$0xff] %v680_v8 }
  0x49   :  { %710 = vst [vmem:[%s1643_s1 + $0x3a0] sm:$0xff] %v680_v8  ;;  %712 = vst [vmem:[%s1643_s1 + $0x3e0] sm:$0xff] %v680_v8 }
  0x4a   :  { %683 = vst [vmem:[%s1643_s1 + $0x420] sm:$0xff] %v682_v9  ;;  %685 = vst [vmem:[%s1643_s1 + $0x460] sm:$0xff] %v682_v9 }
  0x4b   :  { %687 = vst [vmem:[%s1643_s1 + $0x4a0] sm:$0xff] %v682_v9  ;;  %689 = vst [vmem:[%s1643_s1 + $0x4e0] sm:$0xff] %v682_v9 }
  0x4c   :  { %691 = vst [vmem:[%s1643_s1 + $0x520] sm:$0xff] %v682_v9  ;;  %693 = vst [vmem:[%s1643_s1 + $0x560] sm:$0xff] %v682_v9 }
  0x4d   :  { %695 = vst [vmem:[%s1643_s1 + $0x5a0] sm:$0xff] %v682_v9  ;;  %697 = vst [vmem:[%s1643_s1 + $0x5e0] sm:$0xff] %v682_v9 }
  0x4e   :  { %699 = vst [vmem:[%s1643_s1 + $0x620] sm:$0xff] %v682_v9  ;;  %701 = vst [vmem:[%s1643_s1 + $0x660] sm:$0xff] %v682_v9 }
  0x4f   :  { %703 = vst [vmem:[%s1643_s1 + $0x6a0] sm:$0xff] %v682_v9  ;;  %705 = vst [vmem:[%s1643_s1 + $0x6e0] sm:$0xff] %v682_v9 }
  0x50   :  { %707 = vst [vmem:[%s1643_s1 + $0x720] sm:$0xff] %v682_v9  ;;  %709 = vst [vmem:[%s1643_s1 + $0x760] sm:$0xff] %v682_v9 }
  0x51   :  { %711 = vst [vmem:[%s1643_s1 + $0x7a0] sm:$0xff] %v682_v9  ;;  %713 = vst [vmem:[%s1643_s1 + $0x7e0] sm:$0xff] %v682_v9 }
  0x52   :  { %715 = vst [vmem:[%s1643_s1 + $0x28] sm:$0xff] %v714_v10  ;;  %717 = vst [vmem:[%s1643_s1 + $0x428] sm:$0xff] %v716_v11 }
  0x53   :  { %718 = vst [vmem:[%s1643_s1 + $0x68] sm:$0xff] %v714_v10  ;;  %719 = vst [vmem:[%s1643_s1 + $0x468] sm:$0xff] %v716_v11 }
  0x54   :  { %720 = vst [vmem:[%s1643_s1 + $0xa8] sm:$0xff] %v714_v10  ;;  %721 = vst [vmem:[%s1643_s1 + $0x4a8] sm:$0xff] %v716_v11 }
  0x55   :  { %722 = vst [vmem:[%s1643_s1 + $0xe8] sm:$0xff] %v714_v10  ;;  %723 = vst [vmem:[%s1643_s1 + $0x4e8] sm:$0xff] %v716_v11 }
  0x56   :  { %724 = vst [vmem:[%s1643_s1 + $0x128] sm:$0xff] %v714_v10  ;;  %725 = vst [vmem:[%s1643_s1 + $0x528] sm:$0xff] %v716_v11 }
  0x57   :  { %726 = vst [vmem:[%s1643_s1 + $0x168] sm:$0xff] %v714_v10  ;;  %727 = vst [vmem:[%s1643_s1 + $0x568] sm:$0xff] %v716_v11 }
  0x58   :  { %728 = vst [vmem:[%s1643_s1 + $0x1a8] sm:$0xff] %v714_v10  ;;  %729 = vst [vmem:[%s1643_s1 + $0x5a8] sm:$0xff] %v716_v11 }
  0x59   :  { %730 = vst [vmem:[%s1643_s1 + $0x1e8] sm:$0xff] %v714_v10  ;;  %731 = vst [vmem:[%s1643_s1 + $0x5e8] sm:$0xff] %v716_v11 }
  0x5a   :  { %732 = vst [vmem:[%s1643_s1 + $0x228] sm:$0xff] %v714_v10  ;;  %733 = vst [vmem:[%s1643_s1 + $0x628] sm:$0xff] %v716_v11 }
  0x5b   :  { %734 = vst [vmem:[%s1643_s1 + $0x268] sm:$0xff] %v714_v10  ;;  %735 = vst [vmem:[%s1643_s1 + $0x668] sm:$0xff] %v716_v11 }
  0x5c   :  { %736 = vst [vmem:[%s1643_s1 + $0x2a8] sm:$0xff] %v714_v10  ;;  %737 = vst [vmem:[%s1643_s1 + $0x6a8] sm:$0xff] %v716_v11 }
  0x5d   :  { %738 = vst [vmem:[%s1643_s1 + $0x2e8] sm:$0xff] %v714_v10  ;;  %739 = vst [vmem:[%s1643_s1 + $0x6e8] sm:$0xff] %v716_v11 }
  0x5e   :  { %740 = vst [vmem:[%s1643_s1 + $0x328] sm:$0xff] %v714_v10  ;;  %741 = vst [vmem:[%s1643_s1 + $0x728] sm:$0xff] %v716_v11 }
  0x5f   :  { %742 = vst [vmem:[%s1643_s1 + $0x368] sm:$0xff] %v714_v10  ;;  %743 = vst [vmem:[%s1643_s1 + $0x768] sm:$0xff] %v716_v11 }
  0x60   :  { %744 = vst [vmem:[%s1643_s1 + $0x3a8] sm:$0xff] %v714_v10  ;;  %745 = vst [vmem:[%s1643_s1 + $0x7a8] sm:$0xff] %v716_v11 }
  0x61   :  { %746 = vst [vmem:[%s1643_s1 + $0x3e8] sm:$0xff] %v714_v10  ;;  %747 = vst [vmem:[%s1643_s1 + $0x7e8] sm:$0xff] %v716_v11 }
  0x62   :  { %749 = vst [vmem:[%s1643_s1 + $0x30] sm:$0xff] %v748_v12  ;;  %751 = vst [vmem:[%s1643_s1 + $0x430] sm:$0xff] %v750_v13 }
  0x63   :  { %752 = vst [vmem:[%s1643_s1 + $0x70] sm:$0xff] %v748_v12  ;;  %753 = vst [vmem:[%s1643_s1 + $0x470] sm:$0xff] %v750_v13 }
  0x64   :  { %754 = vst [vmem:[%s1643_s1 + $0xb0] sm:$0xff] %v748_v12  ;;  %755 = vst [vmem:[%s1643_s1 + $0x4b0] sm:$0xff] %v750_v13 }
  0x65   :  { %756 = vst [vmem:[%s1643_s1 + $0xf0] sm:$0xff] %v748_v12  ;;  %757 = vst [vmem:[%s1643_s1 + $0x4f0] sm:$0xff] %v750_v13 }
  0x66   :  { %758 = vst [vmem:[%s1643_s1 + $0x130] sm:$0xff] %v748_v12  ;;  %759 = vst [vmem:[%s1643_s1 + $0x530] sm:$0xff] %v750_v13 }
  0x67   :  { %760 = vst [vmem:[%s1643_s1 + $0x170] sm:$0xff] %v748_v12  ;;  %761 = vst [vmem:[%s1643_s1 + $0x570] sm:$0xff] %v750_v13 }
  0x68   :  { %762 = vst [vmem:[%s1643_s1 + $0x1b0] sm:$0xff] %v748_v12  ;;  %763 = vst [vmem:[%s1643_s1 + $0x5b0] sm:$0xff] %v750_v13 }
  0x69   :  { %764 = vst [vmem:[%s1643_s1 + $0x1f0] sm:$0xff] %v748_v12  ;;  %765 = vst [vmem:[%s1643_s1 + $0x5f0] sm:$0xff] %v750_v13 }
  0x6a   :  { %766 = vst [vmem:[%s1643_s1 + $0x230] sm:$0xff] %v748_v12  ;;  %767 = vst [vmem:[%s1643_s1 + $0x630] sm:$0xff] %v750_v13 }
  0x6b   :  { %768 = vst [vmem:[%s1643_s1 + $0x270] sm:$0xff] %v748_v12  ;;  %769 = vst [vmem:[%s1643_s1 + $0x670] sm:$0xff] %v750_v13 }
  0x6c   :  { %770 = vst [vmem:[%s1643_s1 + $0x2b0] sm:$0xff] %v748_v12  ;;  %771 = vst [vmem:[%s1643_s1 + $0x6b0] sm:$0xff] %v750_v13 }
  0x6d   :  { %772 = vst [vmem:[%s1643_s1 + $0x2f0] sm:$0xff] %v748_v12  ;;  %773 = vst [vmem:[%s1643_s1 + $0x6f0] sm:$0xff] %v750_v13 }
  0x6e   :  { %774 = vst [vmem:[%s1643_s1 + $0x330] sm:$0xff] %v748_v12  ;;  %775 = vst [vmem:[%s1643_s1 + $0x730] sm:$0xff] %v750_v13 }
  0x6f   :  { %776 = vst [vmem:[%s1643_s1 + $0x370] sm:$0xff] %v748_v12  ;;  %777 = vst [vmem:[%s1643_s1 + $0x770] sm:$0xff] %v750_v13 }
  0x70   :  { %778 = vst [vmem:[%s1643_s1 + $0x3b0] sm:$0xff] %v748_v12  ;;  %779 = vst [vmem:[%s1643_s1 + $0x7b0] sm:$0xff] %v750_v13 }
  0x71   :  { %780 = vst [vmem:[%s1643_s1 + $0x3f0] sm:$0xff] %v748_v12  ;;  %781 = vst [vmem:[%s1643_s1 + $0x7f0] sm:$0xff] %v750_v13 }
  0x72   :  { %783 = vst [vmem:[%s1643_s1 + $0x38] sm:$0xff] %v782_v14  ;;  %786 = vst [vmem:[%s1643_s1 + $0x78] sm:$0xff] %v782_v14 }
  0x73   :  { %788 = vst [vmem:[%s1643_s1 + $0xb8] sm:$0xff] %v782_v14  ;;  %790 = vst [vmem:[%s1643_s1 + $0xf8] sm:$0xff] %v782_v14 }
  0x74   :  { %792 = vst [vmem:[%s1643_s1 + $0x138] sm:$0xff] %v782_v14  ;;  %794 = vst [vmem:[%s1643_s1 + $0x178] sm:$0xff] %v782_v14 }
  0x75   :  { %796 = vst [vmem:[%s1643_s1 + $0x1b8] sm:$0xff] %v782_v14  ;;  %798 = vst [vmem:[%s1643_s1 + $0x1f8] sm:$0xff] %v782_v14 }
  0x76   :  { %800 = vst [vmem:[%s1643_s1 + $0x238] sm:$0xff] %v782_v14  ;;  %802 = vst [vmem:[%s1643_s1 + $0x278] sm:$0xff] %v782_v14 }
  0x77   :  { %804 = vst [vmem:[%s1643_s1 + $0x2b8] sm:$0xff] %v782_v14  ;;  %806 = vst [vmem:[%s1643_s1 + $0x2f8] sm:$0xff] %v782_v14 }
  0x78   :  { %808 = vst [vmem:[%s1643_s1 + $0x338] sm:$0xff] %v782_v14  ;;  %810 = vst [vmem:[%s1643_s1 + $0x378] sm:$0xff] %v782_v14 }
  0x79   :  { %812 = vst [vmem:[%s1643_s1 + $0x3b8] sm:$0xff] %v782_v14  ;;  %814 = vst [vmem:[%s1643_s1 + $0x3f8] sm:$0xff] %v782_v14 }
  0x7a   :  { %785 = vst [vmem:[%s1643_s1 + $0x438] sm:$0xff] %v784_v15  ;;  %787 = vst [vmem:[%s1643_s1 + $0x478] sm:$0xff] %v784_v15 }
  0x7b   :  { %789 = vst [vmem:[%s1643_s1 + $0x4b8] sm:$0xff] %v784_v15  ;;  %791 = vst [vmem:[%s1643_s1 + $0x4f8] sm:$0xff] %v784_v15 }
  0x7c   :  { %793 = vst [vmem:[%s1643_s1 + $0x538] sm:$0xff] %v784_v15  ;;  %795 = vst [vmem:[%s1643_s1 + $0x578] sm:$0xff] %v784_v15 }
  0x7d   :  { %797 = vst [vmem:[%s1643_s1 + $0x5b8] sm:$0xff] %v784_v15  ;;  %799 = vst [vmem:[%s1643_s1 + $0x5f8] sm:$0xff] %v784_v15 }
  0x7e   :  { %801 = vst [vmem:[%s1643_s1 + $0x638] sm:$0xff] %v784_v15  ;;  %803 = vst [vmem:[%s1643_s1 + $0x678] sm:$0xff] %v784_v15 }
  0x7f   :  { %805 = vst [vmem:[%s1643_s1 + $0x6b8] sm:$0xff] %v784_v15  ;;  %807 = vst [vmem:[%s1643_s1 + $0x6f8] sm:$0xff] %v784_v15 }
  0x80   :  { %809 = vst [vmem:[%s1643_s1 + $0x738] sm:$0xff] %v784_v15  ;;  %811 = vst [vmem:[%s1643_s1 + $0x778] sm:$0xff] %v784_v15 }
  0x81   :  { %813 = vst [vmem:[%s1643_s1 + $0x7b8] sm:$0xff] %v784_v15  ;;  %815 = vst [vmem:[%s1643_s1 + $0x7f8] sm:$0xff] %v784_v15 }

// kernel: _lambda_.4
= control target key start
LH: loop header
LB: loop body
LE: loop exit
PB: predicated region body
PF: predicated region fallthrough
CT: control target
= control target key end

     0   :  { %vm599_vm0 = vcmask 1041408   ;;  %vm310_vm1 = vcmask 31744   ;;  %vm1404_vm2 = vcmask 523264   ;;  %s3325_s2 = inlined_call_operand.vmem [shape: bf16[4,64], index: 2, kind: input, shape index: {}]   ;;  %s3326_s0 = inlined_call_operand.vmem [shape: f32[4,24,16,4], index: 0, kind: input, shape index: {}]   ;;  %s3327_s3 = inlined_call_operand.vmem [shape: bf16[4,64], index: 3, kind: input, shape index: {}]   ;;  %s3328_s1 = inlined_call_operand.vmem [shape: f32[4,16,4], index: 1, kind: input, shape index: {}]   ;;  %s3329_s4 = inlined_call_operand.vmem [shape: f32[1,64], index: 4, kind: input, shape index: {}]   ;;  %s3330_s5 = inlined_call_operand.vmem [shape: f32[4,16,64], index: 5, kind: output, shape index: {}]  }
   0x1   :  { %v309_v0 = vld [vmem:[%s3325_s2] sm:$0x3]  ;;  %v22_v2 = vld [vmem:[%s3326_s0 + $0x8] sm:$0xff]  ;;  %v23_v7 = vld [vmem:[%s3326_s0 + $0x10] sm:$0xff] }
   0x2   :  { %v21_v1 = vld [vmem:[%s3326_s0] sm:$0xff]  ;;  %2318 = vmatprep.subr.msk.bf16.mxu0 %vm599_vm0, %v309_v0  ;;  %2319 = vmatprep.subr.msk.bf16.mxu1 %vm599_vm0, %v309_v0  ;;  %v601_v3 = vsel %vm599_vm0, %v309_v0, 0  ;;  %v122_v6 = vld [vmem:[%s3326_s0 + $0x328] sm:$0xff]  ;;  %v24_v9 = vld [vmem:[%s3326_s0 + $0x18] sm:$0xff] }
   0x3   :  { %v213_v4 = vpack.c.bf16 %v22_v2, %v21_v1  ;;  %v121_v5 = vld [vmem:[%s3326_s0 + $0x320] sm:$0xff]  ;;  %2113 = vmatpush3.bf16.msra.mxu0 %v601_v3  ;;  %2317 = vmatpush3.bf16.msra.mxu1 %v601_v3  ;;  %v123_v10 = vld [vmem:[%s3326_s0 + $0x330] sm:$0xff]  ;;  %v124_v11 = vld [vmem:[%s3326_s0 + $0x338] sm:$0xff]  ;;  %v214_v12 = vpack.c.bf16 %v24_v9, %v23_v7 }
   0x4   :  { %v263_v8 = vpack.c.bf16 %v122_v6, %v121_v5  ;;  %v264_v13 = vpack.c.bf16 %v124_v11, %v123_v10  ;;  %v25_v14 = vld [vmem:[%s3326_s0 + $0x20] sm:$0xff]  ;;  %v26_v15 = vld [vmem:[%s3326_s0 + $0x28] sm:$0xff]  ;;  %v27_v20 = vld [vmem:[%s3326_s0 + $0x30] sm:$0xff] }
   0x5   :  { %2114 = vmatprep.mubr.msk.bf16.mxu0 %vm310_vm1, %v213_v4  ;;  %v125_v16 = vld [vmem:[%s3326_s0 + $0x340] sm:$0xff]  ;;  %v215_v17 = vpack.c.bf16 %v26_v15, %v25_v14  ;;  %v126_v18 = vld [vmem:[%s3326_s0 + $0x348] sm:$0xff]  ;;  %v28_v21 = vld [vmem:[%s3326_s0 + $0x38] sm:$0xff] }
   0x6   :  { %2214 = vmatprep.mubr.msk.bf16.mxu1 %vm310_vm1, %v263_v8  ;;  %2115 = vmatmul.mubr.msk.bf16.vlgmr.msra.gmra.mrb[0].mxu0 %vm310_vm1, %v214_v12  ;;  %v265_v19 = vpack.c.bf16 %v126_v18, %v125_v16  ;;  %v127_v22 = vld [vmem:[%s3326_s0 + $0x350] sm:$0xff]  ;;  %v128_v23 = vld [vmem:[%s3326_s0 + $0x358] sm:$0xff]  ;;  %v29_v24 = vld [vmem:[%s3326_s0 + $0x40] sm:$0xff]  ;;  %v216_v28 = vpack.c.bf16 %v28_v21, %v27_v20 }
   0x7   :  { %2215 = vmatmul.mubr.msk.bf16.vlgmr.msra.gmra.mrb[0].mxu1 %vm310_vm1, %v264_v13  ;;  %2118 = vmatprep.mubr.msk.bf16.mxu0 %vm310_vm1, %v215_v17  ;;  %v30_v25 = vld [vmem:[%s3326_s0 + $0x48] sm:$0xff]  ;;  %v129_v26 = vld [vmem:[%s3326_s0 + $0x360] sm:$0xff]  ;;  %v266_v29 = vpack.c.bf16 %v128_v23, %v127_v22  ;;  %v31_v32 = vld [vmem:[%s3326_s0 + $0x50] sm:$0xff] }
   0x8   :  { %2218 = vmatprep.mubr.msk.bf16.mxu1 %vm310_vm1, %v265_v19  ;;  %v130_v27 = vld [vmem:[%s3326_s0 + $0x368] sm:$0xff]  ;;  %v217_v30 = vpack.c.bf16 %v30_v25, %v29_v24  ;;  %v32_v33 = vld [vmem:[%s3326_s0 + $0x58] sm:$0xff]  ;;  %v131_v34 = vld [vmem:[%s3326_s0 + $0x370] sm:$0xff] }
   0x9   :  { %v267_v31 = vpack.c.bf16 %v130_v27, %v129_v26  ;;  %v132_v35 = vld [vmem:[%s3326_s0 + $0x378] sm:$0xff]  ;;  %v33_v36 = vld [vmem:[%s3326_s0 + $0x60] sm:$0xff]  ;;  %v34_v37 = vld [vmem:[%s3326_s0 + $0x68] sm:$0xff]  ;;  %v218_v41 = vpack.c.bf16 %v32_v33, %v31_v32 }
   0xa   :  { %v133_v38 = vld [vmem:[%s3326_s0 + $0x380] sm:$0xff]  ;;  %v134_v39 = vld [vmem:[%s3326_s0 + $0x388] sm:$0xff]  ;;  %v268_v42 = vpack.c.bf16 %v132_v35, %v131_v34  ;;  %v219_v44 = vpack.c.bf16 %v34_v37, %v33_v36  ;;  %v35_v46 = vld [vmem:[%s3326_s0 + $0x70] sm:$0xff] }
   0xb   :  { %v1793_v40 = vld [vmem:[%s3327_s3] sm:$0x3]  ;;  %v269_v45 = vpack.c.bf16 %v134_v39, %v133_v38  ;;  %v36_v47 = vld [vmem:[%s3326_s0 + $0x78] sm:$0xff]  ;;  %v135_v48 = vld [vmem:[%s3326_s0 + $0x390] sm:$0xff] }
   0xc   :  { %2320 = vmatprep.subr.msk.bf16.mxu1 %vm599_vm0, %v1793_v40  ;;  %v1807_v43 = vsel %vm599_vm0, %v1793_v40, 0  ;;  %v136_v49 = vld [vmem:[%s3326_s0 + $0x398] sm:$0xff]  ;;  %v37_v50 = vld [vmem:[%s3326_s0 + $0x80] sm:$0xff]  ;;  %v38_v51 = vld [vmem:[%s3326_s0 + $0x88] sm:$0xff]  ;;  %v220_v54 = vpack.c.bf16 %v36_v47, %v35_v46 }
   0xd   :  { %2307 = vmatpush3.bf16.msra.mxu1 %v1807_v43  ;;  %v137_v52 = vld [vmem:[%s3326_s0 + $0x3a0] sm:$0xff]  ;;  %v138_v53 = vld [vmem:[%s3326_s0 + $0x3a8] sm:$0xff]  ;;  %v270_v55 = vpack.c.bf16 %v136_v49, %v135_v48  ;;  %v221_v56 = vpack.c.bf16 %v38_v51, %v37_v50  ;;  %v39_v58 = vld [vmem:[%s3326_s0 + $0x90] sm:$0xff] }
   0xe   :  { %2119 = vmatmul.mubr.msk.bf16.gmra.mrb[4].mxu0 %vm310_vm1, %v216_v28  ;;  %v271_v57 = vpack.c.bf16 %v138_v53, %v137_v52  ;;  %v40_v59 = vld [vmem:[%s3326_s0 + $0x98] sm:$0xff]  ;;  %v139_v60 = vld [vmem:[%s3326_s0 + $0x3b0] sm:$0xff]  ;;  %v41_v62 = vld [vmem:[%s3326_s0 + $0xa0] sm:$0xff] }
   0xf   :  { %2219 = vmatmul.mubr.msk.bf16.gmra.mrb[4].mxu1 %vm310_vm1, %v266_v29  ;;  %2122 = vmatprep.mubr.msk.bf16.mxu0 %vm310_vm1, %v217_v30  ;;  %v140_v61 = vld [vmem:[%s3326_s0 + $0x3b8] sm:$0xff]  ;;  %v42_v63 = vld [vmem:[%s3326_s0 + $0xa8] sm:$0xff]  ;;  %v141_v0 = vld [vmem:[%s3326_s0 + $0x3c0] sm:$0xff]  ;;  %v222_v2 = vpack.c.bf16 %v40_v59, %v39_v58 }
  0x10   :  { %2222 = vmatprep.mubr.msk.bf16.mxu1 %vm310_vm1, %v267_v31  ;;  %v142_v1 = vld [vmem:[%s3326_s0 + $0x3c8] sm:$0xff]  ;;  %v272_v3 = vpack.c.bf16 %v140_v61, %v139_v60  ;;  %v223_v4 = vpack.c.bf16 %v42_v63, %v41_v62  ;;  %v43_v6 = vld [vmem:[%s3326_s0 + $0xb0] sm:$0xff]  ;;  %v44_v7 = vld [vmem:[%s3326_s0 + $0xb8] sm:$0xff] }
  0x11   :  { %v273_v5 = vpack.c.bf16 %v142_v1, %v141_v0  ;;  %v143_v8 = vld [vmem:[%s3326_s0 + $0x3d0] sm:$0xff]  ;;  %v144_v9 = vld [vmem:[%s3326_s0 + $0x3d8] sm:$0xff]  ;;  %v45_v10 = vld [vmem:[%s3326_s0 + $0xc0] sm:$0xff]  ;;  %v224_v14 = vpack.c.bf16 %v44_v7, %v43_v6 }
  0x12   :  { %v46_v11 = vld [vmem:[%s3326_s0 + $0xc8] sm:$0xff]  ;;  %v145_v12 = vld [vmem:[%s3326_s0 + $0x3e0] sm:$0xff]  ;;  %v274_v15 = vpack.c.bf16 %v144_v9, %v143_v8  ;;  %v47_v18 = vld [vmem:[%s3326_s0 + $0xd0] sm:$0xff] }
  0x13   :  { %v146_v13 = vld [vmem:[%s3326_s0 + $0x3e8] sm:$0xff]  ;;  %v225_v16 = vpack.c.bf16 %v46_v11, %v45_v10  ;;  %v48_v19 = vld [vmem:[%s3326_s0 + $0xd8] sm:$0xff]  ;;  %v147_v20 = vld [vmem:[%s3326_s0 + $0x3f0] sm:$0xff] }
  0x14   :  { %v275_v17 = vpack.c.bf16 %v146_v13, %v145_v12  ;;  %v148_v21 = vld [vmem:[%s3326_s0 + $0x3f8] sm:$0xff]  ;;  %v49_v22 = vld [vmem:[%s3326_s0 + $0xe0] sm:$0xff]  ;;  %v50_v23 = vld [vmem:[%s3326_s0 + $0xe8] sm:$0xff]  ;;  %v226_v26 = vpack.c.bf16 %v48_v19, %v47_v18 }
  0x15   :  { %v149_v24 = vld [vmem:[%s3326_s0 + $0x400] sm:$0xff]  ;;  %v150_v25 = vld [vmem:[%s3326_s0 + $0x408] sm:$0xff]  ;;  %v276_v27 = vpack.c.bf16 %v148_v21, %v147_v20  ;;  %v227_v28 = vpack.c.bf16 %v50_v23, %v49_v22  ;;  %v51_v30 = vld [vmem:[%s3326_s0 + $0xf0] sm:$0xff] }
  0x16   :  { %2123 = vmatmul.mubr.msk.bf16.gmra.mrb[8].mxu0 %vm310_vm1, %v218_v41  ;;  %v277_v29 = vpack.c.bf16 %v150_v25, %v149_v24  ;;  %v52_v31 = vld [vmem:[%s3326_s0 + $0xf8] sm:$0xff]  ;;  %v151_v32 = vld [vmem:[%s3326_s0 + $0x410] sm:$0xff]  ;;  %v53_v34 = vld [vmem:[%s3326_s0 + $0x100] sm:$0xff] }
  0x17   :  { %2223 = vmatmul.mubr.msk.bf16.gmra.mrb[8].mxu1 %vm310_vm1, %v268_v42  ;;  %2126 = vmatprep.mubr.msk.bf16.mxu0 %vm310_vm1, %v219_v44  ;;  %v152_v33 = vld [vmem:[%s3326_s0 + $0x418] sm:$0xff]  ;;  %v54_v35 = vld [vmem:[%s3326_s0 + $0x108] sm:$0xff]  ;;  %v153_v36 = vld [vmem:[%s3326_s0 + $0x420] sm:$0xff]  ;;  %v228_v38 = vpack.c.bf16 %v52_v31, %v51_v30 }
  0x18   :  { %2226 = vmatprep.mubr.msk.bf16.mxu1 %vm310_vm1, %v269_v45  ;;  %v154_v37 = vld [vmem:[%s3326_s0 + $0x428] sm:$0xff]  ;;  %v278_v39 = vpack.c.bf16 %v152_v33, %v151_v32  ;;  %v229_v40 = vpack.c.bf16 %v54_v35, %v53_v34  ;;  %v55_v42 = vld [vmem:[%s3326_s0 + $0x110] sm:$0xff]  ;;  %v56_v43 = vld [vmem:[%s3326_s0 + $0x118] sm:$0xff] }
  0x19   :  { %v279_v41 = vpack.c.bf16 %v154_v37, %v153_v36  ;;  %v155_v44 = vld [vmem:[%s3326_s0 + $0x430] sm:$0xff]  ;;  %v156_v45 = vld [vmem:[%s3326_s0 + $0x438] sm:$0xff]  ;;  %v57_v46 = vld [vmem:[%s3326_s0 + $0x120] sm:$0xff]  ;;  %v230_v50 = vpack.c.bf16 %v56_v43, %v55_v42 }
  0x1a   :  { %v58_v47 = vld [vmem:[%s3326_s0 + $0x128] sm:$0xff]  ;;  %v157_v48 = vld [vmem:[%s3326_s0 + $0x440] sm:$0xff]  ;;  %v280_v51 = vpack.c.bf16 %v156_v45, %v155_v44 }
  0x1b   :  { %v158_v49 = vld [vmem:[%s3326_s0 + $0x448] sm:$0xff]  ;;  %v231_v52 = vpack.c.bf16 %v58_v47, %v57_v46  ;;  %v61_v58 = vld [vmem:[%s3326_s0 + $0x140] sm:$0xff] }
  0x1c   :  { %v281_v53 = vpack.c.bf16 %v158_v49, %v157_v48  ;;  %v62_v59 = vld [vmem:[%s3326_s0 + $0x148] sm:$0xff]  ;;  %v161_v60 = vld [vmem:[%s3326_s0 + $0x460] sm:$0xff] }
  0x1d   :  { %v162_v61 = vld [vmem:[%s3326_s0 + $0x468] sm:$0xff]  ;;  %v233_v0 = vpack.c.bf16 %v62_v59, %v61_v58  ;;  %v65_v6 = vld [vmem:[%s3326_s0 + $0x160] sm:$0xff] }
  0x1e   :  { %2127 = vmatmul.mubr.msk.bf16.gmra.mrb[12].mxu0 %vm310_vm1, %v220_v54  ;;  %v59_v54 = vld [vmem:[%s3326_s0 + $0x130] sm:$0xff]  ;;  %v283_v1 = vpack.c.bf16 %v162_v61, %v161_v60  ;;  %v66_v7 = vld [vmem:[%s3326_s0 + $0x168] sm:$0xff]  ;;  %v165_v8 = vld [vmem:[%s3326_s0 + $0x480] sm:$0xff] }
  0x1f   :  { %2227 = vmatmul.mubr.msk.bf16.gmra.mrb[12].mxu1 %vm310_vm1, %v270_v55  ;;  %2130 = vmatprep.mubr.msk.bf16.mxu0 %vm310_vm1, %v221_v56  ;;  %v60_v55 = vld [vmem:[%s3326_s0 + $0x138] sm:$0xff]  ;;  %v159_v56 = vld [vmem:[%s3326_s0 + $0x450] sm:$0xff]  ;;  %v166_v9 = vld [vmem:[%s3326_s0 + $0x488] sm:$0xff]  ;;  %v235_v12 = vpack.c.bf16 %v66_v7, %v65_v6 }
  0x20   :  { %2230 = vmatprep.mubr.msk.bf16.mxu1 %vm310_vm1, %v271_v57  ;;  %v160_v57 = vld [vmem:[%s3326_s0 + $0x458] sm:$0xff]  ;;  %v232_v62 = vpack.c.bf16 %v60_v55, %v59_v54  ;;  %v285_v13 = vpack.c.bf16 %v166_v9, %v165_v8  ;;  %v69_v18 = vld [vmem:[%s3326_s0 + $0x180] sm:$0xff]  ;;  %v70_v19 = vld [vmem:[%s3326_s0 + $0x188] sm:$0xff] }
  0x21   :  { %v282_v63 = vpack.c.bf16 %v160_v57, %v159_v56  ;;  %v169_v20 = vld [vmem:[%s3326_s0 + $0x4a0] sm:$0xff]  ;;  %v170_v21 = vld [vmem:[%s3326_s0 + $0x4a8] sm:$0xff]  ;;  %v237_v24 = vpack.c.bf16 %v70_v19, %v69_v18 }
  0x22   :  { %v287_v25 = vpack.c.bf16 %v170_v21, %v169_v20  ;;  %v73_v30 = vld [vmem:[%s3326_s0 + $0x1a0] sm:$0xff]  ;;  %v74_v31 = vld [vmem:[%s3326_s0 + $0x1a8] sm:$0xff] }
  0x23   :  { %v173_v32 = vld [vmem:[%s3326_s0 + $0x4c0] sm:$0xff]  ;;  %v174_v33 = vld [vmem:[%s3326_s0 + $0x4c8] sm:$0xff]  ;;  %v239_v36 = vpack.c.bf16 %v74_v31, %v73_v30 }
  0x24   :  { %v289_v37 = vpack.c.bf16 %v174_v33, %v173_v32  ;;  %v77_v42 = vld [vmem:[%s3326_s0 + $0x1c0] sm:$0xff]  ;;  %v78_v43 = vld [vmem:[%s3326_s0 + $0x1c8] sm:$0xff] }
  0x25   :  { %v177_v44 = vld [vmem:[%s3326_s0 + $0x4e0] sm:$0xff]  ;;  %v178_v45 = vld [vmem:[%s3326_s0 + $0x4e8] sm:$0xff]  ;;  %v241_v48 = vpack.c.bf16 %v78_v43, %v77_v42 }
  0x26   :  { %2131 = vmatmul.mubr.msk.bf16.gmra.mrb[16].mxu0 %vm310_vm1, %v222_v2  ;;  %v63_v2 = vld [vmem:[%s3326_s0 + $0x150] sm:$0xff]  ;;  %v291_v49 = vpack.c.bf16 %v178_v45, %v177_v44  ;;  %v81_v54 = vld [vmem:[%s3326_s0 + $0x1e0] sm:$0xff]  ;;  %v82_v55 = vld [vmem:[%s3326_s0 + $0x1e8] sm:$0xff] }
  0x27   :  { %2231 = vmatmul.mubr.msk.bf16.gmra.mrb[16].mxu1 %vm310_vm1, %v272_v3  ;;  %2134 = vmatprep.mubr.msk.bf16.mxu0 %vm310_vm1, %v223_v4  ;;  %v64_v3 = vld [vmem:[%s3326_s0 + $0x158] sm:$0xff]  ;;  %v163_v4 = vld [vmem:[%s3326_s0 + $0x470] sm:$0xff]  ;;  %v181_v56 = vld [vmem:[%s3326_s0 + $0x500] sm:$0xff]  ;;  %v243_v60 = vpack.c.bf16 %v82_v55, %v81_v54 }
  0x28   :  { %2234 = vmatprep.mubr.msk.bf16.mxu1 %vm310_vm1, %v273_v5  ;;  %v164_v5 = vld [vmem:[%s3326_s0 + $0x478] sm:$0xff]  ;;  %v234_v10 = vpack.c.bf16 %v64_v3, %v63_v2  ;;  %v182_v57 = vld [vmem:[%s3326_s0 + $0x508] sm:$0xff]  ;;  %v85_v2 = vld [vmem:[%s3326_s0 + $0x200] sm:$0xff] }
  0x29   :  { %v284_v11 = vpack.c.bf16 %v164_v5, %v163_v4  ;;  %v293_v61 = vpack.c.bf16 %v182_v57, %v181_v56  ;;  %v86_v3 = vld [vmem:[%s3326_s0 + $0x208] sm:$0xff]  ;;  %v185_v4 = vld [vmem:[%s3326_s0 + $0x520] sm:$0xff] }
  0x2a   :  { %v186_v5 = vld [vmem:[%s3326_s0 + $0x528] sm:$0xff]  ;;  %v245_v8 = vpack.c.bf16 %v86_v3, %v85_v2 }
  0x2b   :  { %v295_v9 = vpack.c.bf16 %v186_v5, %v185_v4 }
  0x2e   :  { %2135 = vmatmul.mubr.msk.bf16.gmra.mrb[20].mxu0 %vm310_vm1, %v224_v14  ;;  %v67_v14 = vld [vmem:[%s3326_s0 + $0x170] sm:$0xff] }
  0x2f   :  { %2235 = vmatmul.mubr.msk.bf16.gmra.mrb[20].mxu1 %vm310_vm1, %v274_v15  ;;  %2138 = vmatprep.mubr.msk.bf16.mxu0 %vm310_vm1, %v225_v16  ;;  %v68_v15 = vld [vmem:[%s3326_s0 + $0x178] sm:$0xff]  ;;  %v167_v16 = vld [vmem:[%s3326_s0 + $0x490] sm:$0xff] }
  0x30   :  { %2238 = vmatprep.mubr.msk.bf16.mxu1 %vm310_vm1, %v275_v17  ;;  %v168_v17 = vld [vmem:[%s3326_s0 + $0x498] sm:$0xff]  ;;  %v236_v22 = vpack.c.bf16 %v68_v15, %v67_v14  ;;  %v89_v14 = vld [vmem:[%s3326_s0 + $0x220] sm:$0xff]  ;;  %v90_v15 = vld [vmem:[%s3326_s0 + $0x228] sm:$0xff] }
  0x31   :  { %v286_v23 = vpack.c.bf16 %v168_v17, %v167_v16  ;;  %v189_v16 = vld [vmem:[%s3326_s0 + $0x540] sm:$0xff]  ;;  %v190_v17 = vld [vmem:[%s3326_s0 + $0x548] sm:$0xff]  ;;  %v247_v20 = vpack.c.bf16 %v90_v15, %v89_v14 }
  0x32   :  { %v297_v21 = vpack.c.bf16 %v190_v17, %v189_v16 }
  0x36   :  { %2139 = vmatmul.mubr.msk.bf16.gmra.mrb[24].mxu0 %vm310_vm1, %v226_v26  ;;  %v71_v26 = vld [vmem:[%s3326_s0 + $0x190] sm:$0xff] }
  0x37   :  { %2239 = vmatmul.mubr.msk.bf16.gmra.mrb[24].mxu1 %vm310_vm1, %v276_v27  ;;  %2142 = vmatprep.mubr.msk.bf16.mxu0 %vm310_vm1, %v227_v28  ;;  %v72_v27 = vld [vmem:[%s3326_s0 + $0x198] sm:$0xff]  ;;  %v171_v28 = vld [vmem:[%s3326_s0 + $0x4b0] sm:$0xff] }
  0x38   :  { %2242 = vmatprep.mubr.msk.bf16.mxu1 %vm310_vm1, %v277_v29  ;;  %v172_v29 = vld [vmem:[%s3326_s0 + $0x4b8] sm:$0xff]  ;;  %v238_v34 = vpack.c.bf16 %v72_v27, %v71_v26  ;;  %v93_v26 = vld [vmem:[%s3326_s0 + $0x240] sm:$0xff]  ;;  %v94_v27 = vld [vmem:[%s3326_s0 + $0x248] sm:$0xff] }
  0x39   :  { %v288_v35 = vpack.c.bf16 %v172_v29, %v171_v28  ;;  %v193_v28 = vld [vmem:[%s3326_s0 + $0x560] sm:$0xff]  ;;  %v194_v29 = vld [vmem:[%s3326_s0 + $0x568] sm:$0xff]  ;;  %v249_v32 = vpack.c.bf16 %v94_v27, %v93_v26 }
  0x3a   :  { %v299_v33 = vpack.c.bf16 %v194_v29, %v193_v28 }
  0x3e   :  { %2143 = vmatmul.mubr.msk.bf16.gmra.mrb[28].mxu0 %vm310_vm1, %v228_v38  ;;  %v75_v38 = vld [vmem:[%s3326_s0 + $0x1b0] sm:$0xff] }
  0x3f   :  { %2243 = vmatmul.mubr.msk.bf16.gmra.mrb[28].mxu1 %vm310_vm1, %v278_v39  ;;  %2146 = vmatprep.mubr.msk.bf16.mxu0 %vm310_vm1, %v229_v40  ;;  %v76_v39 = vld [vmem:[%s3326_s0 + $0x1b8] sm:$0xff]  ;;  %v175_v40 = vld [vmem:[%s3326_s0 + $0x4d0] sm:$0xff] }
  0x40   :  { %2246 = vmatprep.mubr.msk.bf16.mxu1 %vm310_vm1, %v279_v41  ;;  %v176_v41 = vld [vmem:[%s3326_s0 + $0x4d8] sm:$0xff]  ;;  %v240_v46 = vpack.c.bf16 %v76_v39, %v75_v38  ;;  %v97_v38 = vld [vmem:[%s3326_s0 + $0x260] sm:$0xff]  ;;  %v98_v39 = vld [vmem:[%s3326_s0 + $0x268] sm:$0xff] }
  0x41   :  { %v290_v47 = vpack.c.bf16 %v176_v41, %v175_v40  ;;  %v197_v40 = vld [vmem:[%s3326_s0 + $0x580] sm:$0xff]  ;;  %v198_v41 = vld [vmem:[%s3326_s0 + $0x588] sm:$0xff]  ;;  %v251_v44 = vpack.c.bf16 %v98_v39, %v97_v38 }
  0x42   :  { %v301_v45 = vpack.c.bf16 %v198_v41, %v197_v40 }
  0x46   :  { %2147 = vmatmul.mubr.msk.bf16.gmra.mrb[32].mxu0 %vm310_vm1, %v230_v50  ;;  %v79_v50 = vld [vmem:[%s3326_s0 + $0x1d0] sm:$0xff] }
  0x47   :  { %2247 = vmatmul.mubr.msk.bf16.gmra.mrb[32].mxu1 %vm310_vm1, %v280_v51  ;;  %2150 = vmatprep.mubr.msk.bf16.mxu0 %vm310_vm1, %v231_v52  ;;  %v80_v51 = vld [vmem:[%s3326_s0 + $0x1d8] sm:$0xff]  ;;  %v179_v52 = vld [vmem:[%s3326_s0 + $0x4f0] sm:$0xff] }
  0x48   :  { %2250 = vmatprep.mubr.msk.bf16.mxu1 %vm310_vm1, %v281_v53  ;;  %v180_v53 = vld [vmem:[%s3326_s0 + $0x4f8] sm:$0xff]  ;;  %v242_v58 = vpack.c.bf16 %v80_v51, %v79_v50  ;;  %v101_v50 = vld [vmem:[%s3326_s0 + $0x280] sm:$0xff]  ;;  %v102_v51 = vld [vmem:[%s3326_s0 + $0x288] sm:$0xff] }
  0x49   :  { %v292_v59 = vpack.c.bf16 %v180_v53, %v179_v52  ;;  %v201_v52 = vld [vmem:[%s3326_s0 + $0x5a0] sm:$0xff]  ;;  %v202_v53 = vld [vmem:[%s3326_s0 + $0x5a8] sm:$0xff]  ;;  %v253_v56 = vpack.c.bf16 %v102_v51, %v101_v50 }
  0x4a   :  { %v303_v57 = vpack.c.bf16 %v202_v53, %v201_v52 }
  0x4e   :  { %2151 = vmatmul.mubr.msk.bf16.gmra.mrb[36].mxu0 %vm310_vm1, %v232_v62  ;;  %v83_v62 = vld [vmem:[%s3326_s0 + $0x1f0] sm:$0xff] }
  0x4f   :  { %2251 = vmatmul.mubr.msk.bf16.gmra.mrb[36].mxu1 %vm310_vm1, %v282_v63  ;;  %2154 = vmatprep.mubr.msk.bf16.mxu0 %vm310_vm1, %v233_v0  ;;  %v84_v63 = vld [vmem:[%s3326_s0 + $0x1f8] sm:$0xff]  ;;  %v183_v0 = vld [vmem:[%s3326_s0 + $0x510] sm:$0xff] }
  0x50   :  { %2254 = vmatprep.mubr.msk.bf16.mxu1 %vm310_vm1, %v283_v1  ;;  %v184_v1 = vld [vmem:[%s3326_s0 + $0x518] sm:$0xff]  ;;  %v244_v6 = vpack.c.bf16 %v84_v63, %v83_v62  ;;  %v105_v62 = vld [vmem:[%s3326_s0 + $0x2a0] sm:$0xff]  ;;  %v106_v63 = vld [vmem:[%s3326_s0 + $0x2a8] sm:$0xff] }
  0x51   :  { %v294_v7 = vpack.c.bf16 %v184_v1, %v183_v0  ;;  %v205_v0 = vld [vmem:[%s3326_s0 + $0x5c0] sm:$0xff]  ;;  %v206_v1 = vld [vmem:[%s3326_s0 + $0x5c8] sm:$0xff]  ;;  %v255_v4 = vpack.c.bf16 %v106_v63, %v105_v62 }
  0x52   :  { %v305_v5 = vpack.c.bf16 %v206_v1, %v205_v0 }
  0x56   :  { %2155 = vmatmul.mubr.msk.bf16.gmra.mrb[40].mxu0 %vm310_vm1, %v234_v10  ;;  %v87_v10 = vld [vmem:[%s3326_s0 + $0x210] sm:$0xff] }
  0x57   :  { %2255 = vmatmul.mubr.msk.bf16.gmra.mrb[40].mxu1 %vm310_vm1, %v284_v11  ;;  %2158 = vmatprep.mubr.msk.bf16.mxu0 %vm310_vm1, %v235_v12  ;;  %v88_v11 = vld [vmem:[%s3326_s0 + $0x218] sm:$0xff]  ;;  %v187_v12 = vld [vmem:[%s3326_s0 + $0x530] sm:$0xff] }
  0x58   :  { %2258 = vmatprep.mubr.msk.bf16.mxu1 %vm310_vm1, %v285_v13  ;;  %v188_v13 = vld [vmem:[%s3326_s0 + $0x538] sm:$0xff]  ;;  %v246_v18 = vpack.c.bf16 %v88_v11, %v87_v10  ;;  %v109_v10 = vld [vmem:[%s3326_s0 + $0x2c0] sm:$0xff]  ;;  %v110_v11 = vld [vmem:[%s3326_s0 + $0x2c8] sm:$0xff] }
  0x59   :  { %v296_v19 = vpack.c.bf16 %v188_v13, %v187_v12  ;;  %v209_v12 = vld [vmem:[%s3326_s0 + $0x5e0] sm:$0xff]  ;;  %v210_v13 = vld [vmem:[%s3326_s0 + $0x5e8] sm:$0xff]  ;;  %v257_v16 = vpack.c.bf16 %v110_v11, %v109_v10 }
  0x5a   :  { %v307_v17 = vpack.c.bf16 %v210_v13, %v209_v12 }
  0x5e   :  { %2159 = vmatmul.mubr.msk.bf16.gmra.mrb[44].mxu0 %vm310_vm1, %v236_v22  ;;  %v91_v22 = vld [vmem:[%s3326_s0 + $0x230] sm:$0xff] }
  0x5f   :  { %2259 = vmatmul.mubr.msk.bf16.gmra.mrb[44].mxu1 %vm310_vm1, %v286_v23  ;;  %2162 = vmatprep.mubr.msk.bf16.mxu0 %vm310_vm1, %v237_v24  ;;  %v92_v23 = vld [vmem:[%s3326_s0 + $0x238] sm:$0xff]  ;;  %v191_v24 = vld [vmem:[%s3326_s0 + $0x550] sm:$0xff] }
  0x60   :  { %2262 = vmatprep.mubr.msk.bf16.mxu1 %vm310_vm1, %v287_v25  ;;  %v192_v25 = vld [vmem:[%s3326_s0 + $0x558] sm:$0xff]  ;;  %v248_v30 = vpack.c.bf16 %v92_v23, %v91_v22  ;;  %v113_v22 = vld [vmem:[%s3326_s0 + $0x2e0] sm:$0xff]  ;;  %v114_v23 = vld [vmem:[%s3326_s0 + $0x2e8] sm:$0xff] }
  0x61   :  { %v298_v31 = vpack.c.bf16 %v192_v25, %v191_v24  ;;  %v1781_v24 = vld [vmem:[%s3328_s1] sm:$0xff]  ;;  %v1782_v25 = vld [vmem:[%s3328_s1 + $0x8] sm:$0xff]  ;;  %v259_v28 = vpack.c.bf16 %v114_v23, %v113_v22 }
  0x62   :  { %v1789_v29 = vpack.c.bf16 %v1782_v25, %v1781_v24 }
  0x66   :  { %2163 = vmatmul.mubr.msk.bf16.gmra.mrb[48].mxu0 %vm310_vm1, %v238_v34  ;;  %v95_v34 = vld [vmem:[%s3326_s0 + $0x250] sm:$0xff] }
  0x67   :  { %2263 = vmatmul.mubr.msk.bf16.gmra.mrb[48].mxu1 %vm310_vm1, %v288_v35  ;;  %2166 = vmatprep.mubr.msk.bf16.mxu0 %vm310_vm1, %v239_v36  ;;  %v96_v35 = vld [vmem:[%s3326_s0 + $0x258] sm:$0xff]  ;;  %v195_v36 = vld [vmem:[%s3326_s0 + $0x570] sm:$0xff] }
  0x68   :  { %2266 = vmatprep.mubr.msk.bf16.mxu1 %vm310_vm1, %v289_v37  ;;  %v196_v37 = vld [vmem:[%s3326_s0 + $0x578] sm:$0xff]  ;;  %v250_v42 = vpack.c.bf16 %v96_v35, %v95_v34  ;;  %v117_v34 = vld [vmem:[%s3326_s0 + $0x300] sm:$0xff]  ;;  %v118_v35 = vld [vmem:[%s3326_s0 + $0x308] sm:$0xff] }
  0x69   :  { %v300_v43 = vpack.c.bf16 %v196_v37, %v195_v36  ;;  %v1785_v36 = vld [vmem:[%s3328_s1 + $0x20] sm:$0xff]  ;;  %v1786_v37 = vld [vmem:[%s3328_s1 + $0x28] sm:$0xff]  ;;  %v261_v40 = vpack.c.bf16 %v118_v35, %v117_v34 }
  0x6a   :  { %v1791_v41 = vpack.c.bf16 %v1786_v37, %v1785_v36 }
  0x6e   :  { %2167 = vmatmul.mubr.msk.bf16.gmra.mrb[52].mxu0 %vm310_vm1, %v240_v46  ;;  %v99_v46 = vld [vmem:[%s3326_s0 + $0x270] sm:$0xff] }
  0x6f   :  { %2267 = vmatmul.mubr.msk.bf16.gmra.mrb[52].mxu1 %vm310_vm1, %v290_v47  ;;  %2170 = vmatprep.mubr.msk.bf16.mxu0 %vm310_vm1, %v241_v48  ;;  %v100_v47 = vld [vmem:[%s3326_s0 + $0x278] sm:$0xff]  ;;  %v199_v48 = vld [vmem:[%s3326_s0 + $0x590] sm:$0xff] }
  0x70   :  { %2270 = vmatprep.mubr.msk.bf16.mxu1 %vm310_vm1, %v291_v49  ;;  %v200_v49 = vld [vmem:[%s3326_s0 + $0x598] sm:$0xff]  ;;  %v252_v54 = vpack.c.bf16 %v100_v47, %v99_v46 }
  0x71   :  { %v302_v55 = vpack.c.bf16 %v200_v49, %v199_v48 }
  0x76   :  { %2171 = vmatmul.mubr.msk.bf16.gmra.mrb[56].mxu0 %vm310_vm1, %v242_v58  ;;  %v103_v58 = vld [vmem:[%s3326_s0 + $0x290] sm:$0xff] }
  0x77   :  { %2271 = vmatmul.mubr.msk.bf16.gmra.mrb[56].mxu1 %vm310_vm1, %v292_v59  ;;  %2174 = vmatprep.mubr.msk.bf16.mxu0 %vm310_vm1, %v243_v60  ;;  %v104_v59 = vld [vmem:[%s3326_s0 + $0x298] sm:$0xff]  ;;  %v203_v60 = vld [vmem:[%s3326_s0 + $0x5b0] sm:$0xff] }
  0x78   :  { %2274 = vmatprep.mubr.msk.bf16.mxu1 %vm310_vm1, %v293_v61  ;;  %v204_v61 = vld [vmem:[%s3326_s0 + $0x5b8] sm:$0xff]  ;;  %v254_v2 = vpack.c.bf16 %v104_v59, %v103_v58 }
  0x79   :  { %v304_v3 = vpack.c.bf16 %v204_v61, %v203_v60 }
  0x7e   :  { %2175 = vmatmul.mubr.msk.bf16.gmra.mrb[60].mxu0 %vm310_vm1, %v244_v6  ;;  %v107_v6 = vld [vmem:[%s3326_s0 + $0x2b0] sm:$0xff] }
  0x7f   :  { %2275 = vmatmul.mubr.msk.bf16.gmra.mrb[60].mxu1 %vm310_vm1, %v294_v7  ;;  %2178 = vmatprep.mubr.msk.bf16.mxu0 %vm310_vm1, %v245_v8  ;;  %v108_v7 = vld [vmem:[%s3326_s0 + $0x2b8] sm:$0xff]  ;;  %v207_v8 = vld [vmem:[%s3326_s0 + $0x5d0] sm:$0xff] }
  0x80   :  { %2278 = vmatprep.mubr.msk.bf16.mxu1 %vm310_vm1, %v295_v9  ;;  %v208_v9 = vld [vmem:[%s3326_s0 + $0x5d8] sm:$0xff]  ;;  %v256_v14 = vpack.c.bf16 %v108_v7, %v107_v6 }
  0x81   :  { %v306_v15 = vpack.c.bf16 %v208_v9, %v207_v8 }
  0x86   :  { %2179 = vmatmul.mubr.msk.bf16.gmra.mrb[64].mxu0 %vm310_vm1, %v246_v18  ;;  %v111_v18 = vld [vmem:[%s3326_s0 + $0x2d0] sm:$0xff] }
  0x87   :  { %2279 = vmatmul.mubr.msk.bf16.gmra.mrb[64].mxu1 %vm310_vm1, %v296_v19  ;;  %2182 = vmatprep.mubr.msk.bf16.mxu0 %vm310_vm1, %v247_v20  ;;  %v112_v19 = vld [vmem:[%s3326_s0 + $0x2d8] sm:$0xff]  ;;  %v211_v20 = vld [vmem:[%s3326_s0 + $0x5f0] sm:$0xff] }
  0x88   :  { %2282 = vmatprep.mubr.msk.bf16.mxu1 %vm310_vm1, %v297_v21  ;;  %v212_v21 = vld [vmem:[%s3326_s0 + $0x5f8] sm:$0xff]  ;;  %v258_v26 = vpack.c.bf16 %v112_v19, %v111_v18 }
  0x89   :  { %v308_v27 = vpack.c.bf16 %v212_v21, %v211_v20 }
  0x8e   :  { %2183 = vmatmul.mubr.msk.bf16.gmra.mrb[68].mxu0 %vm310_vm1, %v248_v30  ;;  %v115_v30 = vld [vmem:[%s3326_s0 + $0x2f0] sm:$0xff] }
  0x8f   :  { %2283 = vmatmul.mubr.msk.bf16.gmra.mrb[68].mxu1 %vm310_vm1, %v298_v31  ;;  %2186 = vmatprep.mubr.msk.bf16.mxu0 %vm310_vm1, %v249_v32  ;;  %v116_v31 = vld [vmem:[%s3326_s0 + $0x2f8] sm:$0xff]  ;;  %v1783_v32 = vld [vmem:[%s3328_s1 + $0x10] sm:$0xff] }
  0x90   :  { %2286 = vmatprep.mubr.msk.bf16.mxu1 %vm310_vm1, %v299_v33  ;;  %v1784_v33 = vld [vmem:[%s3328_s1 + $0x18] sm:$0xff]  ;;  %v260_v38 = vpack.c.bf16 %v116_v31, %v115_v30 }
  0x91   :  { %v1790_v39 = vpack.c.bf16 %v1784_v33, %v1783_v32 }
  0x96   :  { %2187 = vmatmul.mubr.msk.bf16.gmra.mrb[72].mxu0 %vm310_vm1, %v250_v42  ;;  %v119_v42 = vld [vmem:[%s3326_s0 + $0x310] sm:$0xff] }
  0x97   :  { %2287 = vmatmul.mubr.msk.bf16.gmra.mrb[72].mxu1 %vm310_vm1, %v300_v43  ;;  %2190 = vmatprep.mubr.msk.bf16.mxu0 %vm310_vm1, %v251_v44  ;;  %v120_v43 = vld [vmem:[%s3326_s0 + $0x318] sm:$0xff]  ;;  %v1787_v44 = vld [vmem:[%s3328_s1 + $0x30] sm:$0xff] }
  0x98   :  { %2290 = vmatprep.mubr.msk.bf16.mxu1 %vm310_vm1, %v301_v45  ;;  %v1788_v45 = vld [vmem:[%s3328_s1 + $0x38] sm:$0xff]  ;;  %v262_v46 = vpack.c.bf16 %v120_v43, %v119_v42 }
  0x99   :  { %v1792_v47 = vpack.c.bf16 %v1788_v45, %v1787_v44 }
  0x9e   :  { %2191 = vmatmul.mubr.msk.bf16.gmra.mrb[76].mxu0 %vm310_vm1, %v252_v54 }
  0x9f   :  { %2291 = vmatmul.mubr.msk.bf16.gmra.mrb[76].mxu1 %vm310_vm1, %v302_v55  ;;  %2194 = vmatprep.mubr.msk.bf16.mxu0 %vm310_vm1, %v253_v56 }
  0xa0   :  { %2294 = vmatprep.mubr.msk.bf16.mxu1 %vm310_vm1, %v303_v57 }
  0xa6   :  { %2195 = vmatmul.mubr.msk.bf16.gmra.mrb[80].mxu0 %vm310_vm1, %v254_v2 }
  0xa7   :  { %2295 = vmatmul.mubr.msk.bf16.gmra.mrb[80].mxu1 %vm310_vm1, %v304_v3  ;;  %2198 = vmatprep.mubr.msk.bf16.mxu0 %vm310_vm1, %v255_v4 }
  0xa8   :  { %2298 = vmatprep.mubr.msk.bf16.mxu1 %vm310_vm1, %v305_v5 }
  0xae   :  { %2199 = vmatmul.mubr.msk.bf16.gmra.mrb[84].mxu0 %vm310_vm1, %v256_v14 }
  0xaf   :  { %2299 = vmatmul.mubr.msk.bf16.gmra.mrb[84].mxu1 %vm310_vm1, %v306_v15  ;;  %2202 = vmatprep.mubr.msk.bf16.mxu0 %vm310_vm1, %v257_v16 }
  0xb0   :  { %2302 = vmatprep.mubr.msk.bf16.mxu1 %vm310_vm1, %v307_v17 }
  0xb6   :  { %2203 = vmatmul.mubr.msk.bf16.gmra.mrb[88].mxu0 %vm310_vm1, %v258_v26 }
  0xb7   :  { %2303 = vmatmul.mubr.msk.bf16.gmra.mrb[88].mxu1 %vm310_vm1, %v308_v27  ;;  %2206 = vmatprep.mubr.msk.bf16.mxu0 %vm310_vm1, %v259_v28 }
  0xb8   :  { %2308 = vmatprep.mubr.msk.bf16.mxu1 %vm310_vm1, %v1789_v29 }
  0xbe   :  { %2207 = vmatmul.mubr.msk.bf16.gmra.mrb[92].mxu0 %vm310_vm1, %v260_v38 }
  0xbf   :  { %2309 = vmatmul.mubr.msk.bf16.vlgmr.msra.gmra.mrb[92].mxu1 %vm310_vm1, %v1790_v39  ;;  %2210 = vmatprep.mubr.msk.bf16.mxu0 %vm310_vm1, %v261_v40 }
  0xc0   :  { %2312 = vmatprep.mubr.msk.bf16.mxu1 %vm310_vm1, %v1791_v41 }
  0xc6   :  { %2211 = vmatmul.mubr.msk.bf16.gmra.mrb[96].mxu0 %vm310_vm1, %v262_v46 }
  0xc7   :  { %2313 = vmatmul.mubr.msk.bf16.gmra.mrb[96].mxu1 %vm310_vm1, %v1792_v47 }
  0xd9   :  { %v2116_v48 = vpop.f32.mrb[0].mxu0 }
  0xda   :  { %v2216_v49 = vpop.f32.mrb[0].mxu1  ;;  %v1406_v50 = vsel %vm1404_vm2, %v2116_v48, -inf  ;;  %v637_v51 = vpop.f32.mrb[1].mxu0 }
  0xdb   :  { %v1598_v52 = vsel %vm1404_vm2, %v2216_v49, -inf  ;;  %v1037_v53 = vpop.f32.mrb[1].mxu1  ;;  %v1405_v54 = vsel %vm1404_vm2, %v637_v51, -inf  ;;  %v2117_v55 = vpop.f32.mrb[2].mxu0 }
  0xdc   :  { %v1596_v56 = vsel %vm1404_vm2, %v1037_v53, -inf  ;;  %v2217_v57 = vpop.f32.mrb[2].mxu1  ;;  %v1407_v58 = vmax.f32 %v1405_v54, %v1406_v50  ;;  %v1453_v59 = vsel %vm1404_vm2, %v2117_v55, -inf  ;;  %v640_v60 = vpop.f32.mrb[3].mxu0 }
  0xdd   :  { %v1597_v61 = vmax.f32 %v1598_v52, %v1596_v56  ;;  %v1645_v62 = vsel %vm1404_vm2, %v2217_v57, -inf  ;;  %v1040_v63 = vpop.f32.mrb[3].mxu1  ;;  %v1452_v0 = vsel %vm1404_vm2, %v640_v60, -inf }
  0xde   :  { %v1643_v1 = vsel %vm1404_vm2, %v1040_v63, -inf  ;;  %v1454_v2 = vmax.f32 %v1452_v0, %v1453_v59 }
  0xdf   :  { %v1644_v3 = vmax.f32 %v1645_v62, %v1643_v1 }
  0xe1   :  { %v2120_v4 = vpop.f32.mrb[4].mxu0 }
  0xe2   :  { %v2220_v5 = vpop.f32.mrb[4].mxu1  ;;  %v653_v6 = vpop.f32.mrb[5].mxu0  ;;  %v1410_v14 = vsel %vm1404_vm2, %v2120_v4, -inf }
  0xe3   :  { %v1602_v7 = vsel %vm1404_vm2, %v2220_v5, -inf  ;;  %v1053_v8 = vpop.f32.mrb[5].mxu1  ;;  %v1408_v9 = vsel %vm1404_vm2, %v653_v6, -inf  ;;  %v2121_v10 = vpop.f32.mrb[6].mxu0 }
  0xe4   :  { %v1599_v11 = vmax.f32 %v1597_v61, %v1602_v7  ;;  %v1600_v12 = vsel %vm1404_vm2, %v1053_v8, -inf  ;;  %v2221_v13 = vpop.f32.mrb[6].mxu1  ;;  %v1409_v15 = vmax.f32 %v1407_v58, %v1408_v9  ;;  %v656_v16 = vpop.f32.mrb[7].mxu0  ;;  %v1457_v25 = vsel %vm1404_vm2, %v2121_v10, -inf }
  0xe5   :  { %v1649_v17 = vsel %vm1404_vm2, %v2221_v13, -inf  ;;  %v1056_v18 = vpop.f32.mrb[7].mxu1  ;;  %v1455_v19 = vsel %vm1404_vm2, %v656_v16, -inf }
  0xe6   :  { %v1601_v20 = vmax.f32 %v1599_v11, %v1600_v12  ;;  %v1646_v21 = vmax.f32 %v1644_v3, %v1649_v17  ;;  %v1647_v22 = vsel %vm1404_vm2, %v1056_v18, -inf  ;;  %v1456_v23 = vmax.f32 %v1454_v2, %v1455_v19 }
  0xe7   :  { %v1411_v24 = vmax.f32 %v1409_v15, %v1410_v14 }
  0xe8   :  { %v1648_v26 = vmax.f32 %v1646_v21, %v1647_v22  ;;  %v1458_v27 = vmax.f32 %v1456_v23, %v1457_v25 }
  0xe9   :  { %v2124_v28 = vpop.f32.mrb[8].mxu0 }
  0xea   :  { %v2224_v29 = vpop.f32.mrb[8].mxu1  ;;  %v669_v30 = vpop.f32.mrb[9].mxu0  ;;  %v1414_v38 = vsel %vm1404_vm2, %v2124_v28, -inf }
  0xeb   :  { %v1606_v31 = vsel %vm1404_vm2, %v2224_v29, -inf  ;;  %v1069_v32 = vpop.f32.mrb[9].mxu1  ;;  %v1412_v33 = vsel %vm1404_vm2, %v669_v30, -inf  ;;  %v2125_v34 = vpop.f32.mrb[10].mxu0 }
  0xec   :  { %v1603_v35 = vmax.f32 %v1601_v20, %v1606_v31  ;;  %v1604_v36 = vsel %vm1404_vm2, %v1069_v32, -inf  ;;  %v2225_v37 = vpop.f32.mrb[10].mxu1  ;;  %v1413_v39 = vmax.f32 %v1411_v24, %v1412_v33  ;;  %v672_v40 = vpop.f32.mrb[11].mxu0  ;;  %v1461_v49 = vsel %vm1404_vm2, %v2125_v34, -inf }
  0xed   :  { %v1653_v41 = vsel %vm1404_vm2, %v2225_v37, -inf  ;;  %v1072_v42 = vpop.f32.mrb[11].mxu1  ;;  %v1459_v43 = vsel %vm1404_vm2, %v672_v40, -inf }
  0xee   :  { %v1605_v44 = vmax.f32 %v1603_v35, %v1604_v36  ;;  %v1650_v45 = vmax.f32 %v1648_v26, %v1653_v41  ;;  %v1651_v46 = vsel %vm1404_vm2, %v1072_v42, -inf  ;;  %v1460_v47 = vmax.f32 %v1458_v27, %v1459_v43 }
  0xef   :  { %v1415_v48 = vmax.f32 %v1413_v39, %v1414_v38 }
  0xf0   :  { %v1652_v50 = vmax.f32 %v1650_v45, %v1651_v46  ;;  %v1462_v51 = vmax.f32 %v1460_v47, %v1461_v49 }
  0xf1   :  { %v2128_v52 = vpop.f32.mrb[12].mxu0 }
  0xf2   :  { %v2228_v53 = vpop.f32.mrb[12].mxu1  ;;  %v685_v54 = vpop.f32.mrb[13].mxu0  ;;  %v1418_v62 = vsel %vm1404_vm2, %v2128_v52, -inf }
  0xf3   :  { %v1610_v55 = vsel %vm1404_vm2, %v2228_v53, -inf  ;;  %v1085_v56 = vpop.f32.mrb[13].mxu1  ;;  %v1416_v57 = vsel %vm1404_vm2, %v685_v54, -inf  ;;  %v2129_v58 = vpop.f32.mrb[14].mxu0 }
  0xf4   :  { %v1607_v59 = vmax.f32 %v1605_v44, %v1610_v55  ;;  %v1608_v60 = vsel %vm1404_vm2, %v1085_v56, -inf  ;;  %v2229_v61 = vpop.f32.mrb[14].mxu1  ;;  %v1417_v63 = vmax.f32 %v1415_v48, %v1416_v57  ;;  %v688_v0 = vpop.f32.mrb[15].mxu0  ;;  %v1465_v9 = vsel %vm1404_vm2, %v2129_v58, -inf }
  0xf5   :  { %v1657_v1 = vsel %vm1404_vm2, %v2229_v61, -inf  ;;  %v1088_v2 = vpop.f32.mrb[15].mxu1  ;;  %v1463_v3 = vsel %vm1404_vm2, %v688_v0, -inf }
  0xf6   :  { %v1609_v4 = vmax.f32 %v1607_v59, %v1608_v60  ;;  %v1654_v5 = vmax.f32 %v1652_v50, %v1657_v1  ;;  %v1655_v6 = vsel %vm1404_vm2, %v1088_v2, -inf  ;;  %v1464_v7 = vmax.f32 %v1462_v51, %v1463_v3 }
  0xf7   :  { %v1419_v8 = vmax.f32 %v1417_v63, %v1418_v62 }
  0xf8   :  { %v1656_v10 = vmax.f32 %v1654_v5, %v1655_v6  ;;  %v1466_v11 = vmax.f32 %v1464_v7, %v1465_v9 }
  0xf9   :  { %v2132_v12 = vpop.f32.mrb[16].mxu0 }
  0xfa   :  { %v2232_v13 = vpop.f32.mrb[16].mxu1  ;;  %v701_v14 = vpop.f32.mrb[17].mxu0  ;;  %v1422_v22 = vsel %vm1404_vm2, %v2132_v12, -inf }
  0xfb   :  { %v1614_v15 = vsel %vm1404_vm2, %v2232_v13, -inf  ;;  %v1101_v16 = vpop.f32.mrb[17].mxu1  ;;  %v1420_v17 = vsel %vm1404_vm2, %v701_v14, -inf  ;;  %v2133_v18 = vpop.f32.mrb[18].mxu0 }
  0xfc   :  { %v1611_v19 = vmax.f32 %v1609_v4, %v1614_v15  ;;  %v1612_v20 = vsel %vm1404_vm2, %v1101_v16, -inf  ;;  %v2233_v21 = vpop.f32.mrb[18].mxu1  ;;  %v1421_v23 = vmax.f32 %v1419_v8, %v1420_v17  ;;  %v704_v24 = vpop.f32.mrb[19].mxu0  ;;  %v1469_v33 = vsel %vm1404_vm2, %v2133_v18, -inf }
  0xfd   :  { %v1661_v25 = vsel %vm1404_vm2, %v2233_v21, -inf  ;;  %v1104_v26 = vpop.f32.mrb[19].mxu1  ;;  %v1467_v27 = vsel %vm1404_vm2, %v704_v24, -inf }
  0xfe   :  { %v1613_v28 = vmax.f32 %v1611_v19, %v1612_v20  ;;  %v1658_v29 = vmax.f32 %v1656_v10, %v1661_v25  ;;  %v1659_v30 = vsel %vm1404_vm2, %v1104_v26, -inf  ;;  %v1468_v31 = vmax.f32 %v1466_v11, %v1467_v27 }
  0xff   :  { %v1423_v32 = vmax.f32 %v1421_v23, %v1422_v22 }
 0x100   :  { %v1660_v34 = vmax.f32 %v1658_v29, %v1659_v30  ;;  %v1470_v35 = vmax.f32 %v1468_v31, %v1469_v33 }
 0x101   :  { %v2136_v36 = vpop.f32.mrb[20].mxu0 }
 0x102   :  { %v2236_v37 = vpop.f32.mrb[20].mxu1  ;;  %v717_v38 = vpop.f32.mrb[21].mxu0  ;;  %v1426_v46 = vsel %vm1404_vm2, %v2136_v36, -inf }
 0x103   :  { %v1618_v39 = vsel %vm1404_vm2, %v2236_v37, -inf  ;;  %v1117_v40 = vpop.f32.mrb[21].mxu1  ;;  %v1424_v41 = vsel %vm1404_vm2, %v717_v38, -inf  ;;  %v2137_v42 = vpop.f32.mrb[22].mxu0 }
 0x104   :  { %v1615_v43 = vmax.f32 %v1613_v28, %v1618_v39  ;;  %v1616_v44 = vsel %vm1404_vm2, %v1117_v40, -inf  ;;  %v2237_v45 = vpop.f32.mrb[22].mxu1  ;;  %v1425_v47 = vmax.f32 %v1423_v32, %v1424_v41  ;;  %v720_v48 = vpop.f32.mrb[23].mxu0  ;;  %v1473_v57 = vsel %vm1404_vm2, %v2137_v42, -inf }
 0x105   :  { %v1665_v49 = vsel %vm1404_vm2, %v2237_v45, -inf  ;;  %v1120_v50 = vpop.f32.mrb[23].mxu1  ;;  %v1471_v51 = vsel %vm1404_vm2, %v720_v48, -inf }
 0x106   :  { %v1617_v52 = vmax.f32 %v1615_v43, %v1616_v44  ;;  %v1662_v53 = vmax.f32 %v1660_v34, %v1665_v49  ;;  %v1663_v54 = vsel %vm1404_vm2, %v1120_v50, -inf  ;;  %v1472_v55 = vmax.f32 %v1470_v35, %v1471_v51 }
 0x107   :  { %v1427_v56 = vmax.f32 %v1425_v47, %v1426_v46 }
 0x108   :  { %v1664_v58 = vmax.f32 %v1662_v53, %v1663_v54  ;;  %v1474_v59 = vmax.f32 %v1472_v55, %v1473_v57 }
 0x109   :  { %v2140_v60 = vpop.f32.mrb[24].mxu0 }
 0x10a   :  { %v2240_v61 = vpop.f32.mrb[24].mxu1  ;;  %v733_v62 = vpop.f32.mrb[25].mxu0  ;;  %v1430_v6 = vsel %vm1404_vm2, %v2140_v60, -inf }
 0x10b   :  { %v1622_v63 = vsel %vm1404_vm2, %v2240_v61, -inf  ;;  %v1133_v0 = vpop.f32.mrb[25].mxu1  ;;  %v1428_v1 = vsel %vm1404_vm2, %v733_v62, -inf  ;;  %v2141_v2 = vpop.f32.mrb[26].mxu0 }
 0x10c   :  { %v1619_v3 = vmax.f32 %v1617_v52, %v1622_v63  ;;  %v1620_v4 = vsel %vm1404_vm2, %v1133_v0, -inf  ;;  %v2241_v5 = vpop.f32.mrb[26].mxu1  ;;  %v1429_v7 = vmax.f32 %v1427_v56, %v1428_v1  ;;  %v736_v8 = vpop.f32.mrb[27].mxu0  ;;  %v1477_v17 = vsel %vm1404_vm2, %v2141_v2, -inf }
 0x10d   :  { %v1669_v9 = vsel %vm1404_vm2, %v2241_v5, -inf  ;;  %v1136_v10 = vpop.f32.mrb[27].mxu1  ;;  %v1475_v11 = vsel %vm1404_vm2, %v736_v8, -inf }
 0x10e   :  { %v1621_v12 = vmax.f32 %v1619_v3, %v1620_v4  ;;  %v1666_v13 = vmax.f32 %v1664_v58, %v1669_v9  ;;  %v1667_v14 = vsel %vm1404_vm2, %v1136_v10, -inf  ;;  %v1476_v15 = vmax.f32 %v1474_v59, %v1475_v11 }
 0x10f   :  { %v1431_v16 = vmax.f32 %v1429_v7, %v1430_v6 }
 0x110   :  { %v1668_v18 = vmax.f32 %v1666_v13, %v1667_v14  ;;  %v1478_v19 = vmax.f32 %v1476_v15, %v1477_v17 }
 0x111   :  { %v2144_v20 = vpop.f32.mrb[28].mxu0 }
 0x112   :  { %v2244_v21 = vpop.f32.mrb[28].mxu1  ;;  %v749_v22 = vpop.f32.mrb[29].mxu0  ;;  %v1434_v30 = vsel %vm1404_vm2, %v2144_v20, -inf }
 0x113   :  { %v1626_v23 = vsel %vm1404_vm2, %v2244_v21, -inf  ;;  %v1149_v24 = vpop.f32.mrb[29].mxu1  ;;  %v1432_v25 = vsel %vm1404_vm2, %v749_v22, -inf  ;;  %v2145_v26 = vpop.f32.mrb[30].mxu0 }
 0x114   :  { %v1623_v27 = vmax.f32 %v1621_v12, %v1626_v23  ;;  %v1624_v28 = vsel %vm1404_vm2, %v1149_v24, -inf  ;;  %v2245_v29 = vpop.f32.mrb[30].mxu1  ;;  %v1433_v31 = vmax.f32 %v1431_v16, %v1432_v25  ;;  %v752_v32 = vpop.f32.mrb[31].mxu0  ;;  %v1481_v41 = vsel %vm1404_vm2, %v2145_v26, -inf }
 0x115   :  { %v1673_v33 = vsel %vm1404_vm2, %v2245_v29, -inf  ;;  %v1152_v34 = vpop.f32.mrb[31].mxu1  ;;  %v1479_v35 = vsel %vm1404_vm2, %v752_v32, -inf }
 0x116   :  { %v1625_v36 = vmax.f32 %v1623_v27, %v1624_v28  ;;  %v1670_v37 = vmax.f32 %v1668_v18, %v1673_v33  ;;  %v1671_v38 = vsel %vm1404_vm2, %v1152_v34, -inf  ;;  %v1480_v39 = vmax.f32 %v1478_v19, %v1479_v35 }
 0x117   :  { %v1435_v40 = vmax.f32 %v1433_v31, %v1434_v30 }
 0x118   :  { %v1672_v42 = vmax.f32 %v1670_v37, %v1671_v38  ;;  %v1482_v43 = vmax.f32 %v1480_v39, %v1481_v41 }
 0x119   :  { %v2148_v44 = vpop.f32.mrb[32].mxu0 }
 0x11a   :  { %v2248_v45 = vpop.f32.mrb[32].mxu1  ;;  %v765_v46 = vpop.f32.mrb[33].mxu0  ;;  %v1438_v54 = vsel %vm1404_vm2, %v2148_v44, -inf }
 0x11b   :  { %v1630_v47 = vsel %vm1404_vm2, %v2248_v45, -inf  ;;  %v1165_v48 = vpop.f32.mrb[33].mxu1  ;;  %v1436_v49 = vsel %vm1404_vm2, %v765_v46, -inf  ;;  %v2149_v50 = vpop.f32.mrb[34].mxu0 }
 0x11c   :  { %v1627_v51 = vmax.f32 %v1625_v36, %v1630_v47  ;;  %v1628_v52 = vsel %vm1404_vm2, %v1165_v48, -inf  ;;  %v2249_v53 = vpop.f32.mrb[34].mxu1  ;;  %v1437_v55 = vmax.f32 %v1435_v40, %v1436_v49  ;;  %v768_v56 = vpop.f32.mrb[35].mxu0  ;;  %v1485_v1 = vsel %vm1404_vm2, %v2149_v50, -inf }
 0x11d   :  { %v1677_v57 = vsel %vm1404_vm2, %v2249_v53, -inf  ;;  %v1168_v58 = vpop.f32.mrb[35].mxu1  ;;  %v1483_v59 = vsel %vm1404_vm2, %v768_v56, -inf }
 0x11e   :  { %v1629_v60 = vmax.f32 %v1627_v51, %v1628_v52  ;;  %v1674_v61 = vmax.f32 %v1672_v42, %v1677_v57  ;;  %v1675_v62 = vsel %vm1404_vm2, %v1168_v58, -inf  ;;  %v1484_v63 = vmax.f32 %v1482_v43, %v1483_v59 }
 0x11f   :  { %v1439_v0 = vmax.f32 %v1437_v55, %v1438_v54 }
 0x120   :  { %v1676_v2 = vmax.f32 %v1674_v61, %v1675_v62  ;;  %v1486_v3 = vmax.f32 %v1484_v63, %v1485_v1 }
 0x121   :  { %v2152_v4 = vpop.f32.mrb[36].mxu0 }
 0x122   :  { %v2252_v5 = vpop.f32.mrb[36].mxu1  ;;  %v781_v6 = vpop.f32.mrb[37].mxu0  ;;  %v1442_v14 = vsel %vm1404_vm2, %v2152_v4, -inf }
 0x123   :  { %v1634_v7 = vsel %vm1404_vm2, %v2252_v5, -inf  ;;  %v1181_v8 = vpop.f32.mrb[37].mxu1  ;;  %v1440_v9 = vsel %vm1404_vm2, %v781_v6, -inf  ;;  %v2153_v10 = vpop.f32.mrb[38].mxu0 }
 0x124   :  { %v1631_v11 = vmax.f32 %v1629_v60, %v1634_v7  ;;  %v1632_v12 = vsel %vm1404_vm2, %v1181_v8, -inf  ;;  %v2253_v13 = vpop.f32.mrb[38].mxu1  ;;  %v1441_v15 = vmax.f32 %v1439_v0, %v1440_v9  ;;  %v784_v16 = vpop.f32.mrb[39].mxu0  ;;  %v1489_v25 = vsel %vm1404_vm2, %v2153_v10, -inf }
 0x125   :  { %v1681_v17 = vsel %vm1404_vm2, %v2253_v13, -inf  ;;  %v1184_v18 = vpop.f32.mrb[39].mxu1  ;;  %v1487_v19 = vsel %vm1404_vm2, %v784_v16, -inf }
 0x126   :  { %v1633_v20 = vmax.f32 %v1631_v11, %v1632_v12  ;;  %v1678_v21 = vmax.f32 %v1676_v2, %v1681_v17  ;;  %v1679_v22 = vsel %vm1404_vm2, %v1184_v18, -inf  ;;  %v1488_v23 = vmax.f32 %v1486_v3, %v1487_v19 }
 0x127   :  { %v1443_v24 = vmax.f32 %v1441_v15, %v1442_v14 }
 0x128   :  { %v1680_v26 = vmax.f32 %v1678_v21, %v1679_v22  ;;  %v1490_v27 = vmax.f32 %v1488_v23, %v1489_v25 }
 0x129   :  { %v2156_v28 = vpop.f32.mrb[40].mxu0 }
 0x12a   :  { %v2256_v29 = vpop.f32.mrb[40].mxu1  ;;  %v797_v30 = vpop.f32.mrb[41].mxu0  ;;  %v1446_v38 = vsel %vm1404_vm2, %v2156_v28, -inf }
 0x12b   :  { %v1638_v31 = vsel %vm1404_vm2, %v2256_v29, -inf  ;;  %v1197_v32 = vpop.f32.mrb[41].mxu1  ;;  %v1444_v33 = vsel %vm1404_vm2, %v797_v30, -inf  ;;  %v2157_v34 = vpop.f32.mrb[42].mxu0 }
 0x12c   :  { %v3144_v35 = vmax.f32 %v1633_v20, %v1638_v31  ;;  %v3147_v36 = vsel %vm1404_vm2, %v1197_v32, -inf  ;;  %v2257_v37 = vpop.f32.mrb[42].mxu1  ;;  %v1445_v39 = vmax.f32 %v1443_v24, %v1444_v33  ;;  %v800_v40 = vpop.f32.mrb[43].mxu0  ;;  %v1493_v49 = vsel %vm1404_vm2, %v2157_v34, -inf }
 0x12d   :  { %v1685_v41 = vsel %vm1404_vm2, %v2257_v37, -inf  ;;  %v1200_v42 = vpop.f32.mrb[43].mxu1  ;;  %v1491_v43 = vsel %vm1404_vm2, %v800_v40, -inf }
 0x12e   :  { %v1637_v44 = vmax.f32 %v3144_v35, %v3147_v36  ;;  %v3154_v45 = vmax.f32 %v1680_v26, %v1685_v41  ;;  %v3157_v46 = vsel %vm1404_vm2, %v1200_v42, -inf  ;;  %v1492_v47 = vmax.f32 %v1490_v27, %v1491_v43 }
 0x12f   :  { %v1447_v48 = vmax.f32 %v1445_v39, %v1446_v38 }
 0x130   :  { %v1684_v50 = vmax.f32 %v3154_v45, %v3157_v46  ;;  %v1494_v51 = vmax.f32 %v1492_v47, %v1493_v49 }
 0x131   :  { %v2160_v52 = vpop.f32.mrb[44].mxu0 }
 0x132   :  { %v2260_v53 = vpop.f32.mrb[44].mxu1  ;;  %v813_v54 = vpop.f32.mrb[45].mxu0  ;;  %v3169_v2 = vsel %vm1404_vm2, %v2160_v52, -inf }
 0x133   :  { %v1688_v55 = vsel %vm1404_vm2, %v2260_v53, -inf  ;;  %v1213_v56 = vpop.f32.mrb[45].mxu1  ;;  %v1448_v57 = vsel %vm1404_vm2, %v813_v54, -inf  ;;  %v2161_v58 = vpop.f32.mrb[46].mxu0 }
 0x134   :  { %v1687_v59 = vsel %vm1404_vm2, %v1213_v56, -inf  ;;  %v2261_v60 = vpop.f32.mrb[46].mxu1  ;;  %v3165_v61 = vmax.f32 %v1447_v48, %v1448_v57  ;;  %v816_v62 = vpop.f32.mrb[47].mxu0  ;;  %v3178_v8 = vsel %vm1404_vm2, %v2161_v58, -inf }
 0x135   :  { %v1689_v63 = vmax.f32 %v1687_v59, %v1688_v55  ;;  %v1735_v0 = vsel %vm1404_vm2, %v2261_v60, -inf  ;;  %v1216_v1 = vpop.f32.mrb[47].mxu1  ;;  %v1495_v3 = vsel %vm1404_vm2, %v816_v62, -inf }
 0x136   :  { %v1734_v4 = vsel %vm1404_vm2, %v1216_v1, -inf  ;;  %v1451_v5 = vmax.f32 %v3165_v61, %v3169_v2  ;;  %v3175_v6 = vmax.f32 %v1494_v51, %v1495_v3 }
 0x137   :  { %v1736_v7 = vmax.f32 %v1734_v4, %v1735_v0 }
 0x138   :  { %v1498_v9 = vmax.f32 %v3175_v6, %v3178_v8 }
 0x139   :  { %v2164_v10 = vpop.f32.mrb[48].mxu0 }
 0x13a   :  { %v2264_v11 = vpop.f32.mrb[48].mxu1  ;;  %v1500_v12 = vsel %vm1404_vm2, %v2164_v10, -inf  ;;  %v829_v13 = vpop.f32.mrb[49].mxu0 }
 0x13b   :  { %v1229_v14 = vpop.f32.mrb[49].mxu1  ;;  %v1499_v15 = vsel %vm1404_vm2, %v829_v13, -inf  ;;  %v2165_v16 = vpop.f32.mrb[50].mxu0  ;;  %v1692_v17 = vsel %vm1404_vm2, %v2264_v11, -inf }
 0x13c   :  { %v1690_v18 = vsel %vm1404_vm2, %v1229_v14, -inf  ;;  %v2265_v19 = vpop.f32.mrb[50].mxu1  ;;  %v1501_v20 = vmax.f32 %v1499_v15, %v1500_v12  ;;  %v1547_v21 = vsel %vm1404_vm2, %v2165_v16, -inf  ;;  %v832_v22 = vpop.f32.mrb[51].mxu0 }
 0x13d   :  { %v1691_v23 = vmax.f32 %v1689_v63, %v1690_v18  ;;  %v1232_v24 = vpop.f32.mrb[51].mxu1  ;;  %v1546_v25 = vsel %vm1404_vm2, %v832_v22, -inf  ;;  %v1739_v30 = vsel %vm1404_vm2, %v2265_v19, -inf }
 0x13e   :  { %v1737_v26 = vsel %vm1404_vm2, %v1232_v24, -inf  ;;  %v1548_v27 = vmax.f32 %v1546_v25, %v1547_v21 }
 0x13f   :  { %v1738_v28 = vmax.f32 %v1736_v7, %v1737_v26  ;;  %v1693_v29 = vmax.f32 %v1691_v23, %v1692_v17 }
 0x141   :  { %v1740_v31 = vmax.f32 %v1738_v28, %v1739_v30  ;;  %v2168_v32 = vpop.f32.mrb[52].mxu0 }
 0x142   :  { %v2268_v33 = vpop.f32.mrb[52].mxu1  ;;  %v845_v34 = vpop.f32.mrb[53].mxu0  ;;  %v1504_v51 = vsel %vm1404_vm2, %v2168_v32, -inf }
 0x143   :  { %v1245_v37 = vpop.f32.mrb[53].mxu1  ;;  %v1502_v38 = vsel %vm1404_vm2, %v845_v34, -inf  ;;  %v2169_v39 = vpop.f32.mrb[54].mxu0  ;;  %v1696_v40 = vsel %vm1404_vm2, %v2268_v33, -inf }
 0x144   :  { %v1694_v41 = vsel %vm1404_vm2, %v1245_v37, -inf  ;;  %v2269_v42 = vpop.f32.mrb[54].mxu1  ;;  %v1503_v43 = vmax.f32 %v1501_v20, %v1502_v38  ;;  %v848_v47 = vpop.f32.mrb[55].mxu0  ;;  %v1551_v58 = vsel %vm1404_vm2, %v2169_v39, -inf }
 0x145   :  { %v1695_v48 = vmax.f32 %v1693_v29, %v1694_v41  ;;  %v1248_v49 = vpop.f32.mrb[55].mxu1  ;;  %v1549_v52 = vsel %vm1404_vm2, %v848_v47, -inf  ;;  %v1743_v59 = vsel %vm1404_vm2, %v2269_v42, -inf }
 0x146   :  { %v1741_v53 = vsel %vm1404_vm2, %v1248_v49, -inf  ;;  %v1550_v54 = vmax.f32 %v1548_v27, %v1549_v52  ;;  %v1505_v55 = vmax.f32 %v1503_v43, %v1504_v51 }
 0x147   :  { %v1742_v56 = vmax.f32 %v1740_v31, %v1741_v53  ;;  %v1697_v57 = vmax.f32 %v1695_v48, %v1696_v40 }
 0x148   :  { %v1552_v60 = vmax.f32 %v1550_v54, %v1551_v58 }
 0x149   :  { %v1744_v62 = vmax.f32 %v1742_v56, %v1743_v59  ;;  %v2172_v63 = vpop.f32.mrb[56].mxu0 }
 0x14a   :  { %v2272_v0 = vpop.f32.mrb[56].mxu1  ;;  %v861_v1 = vpop.f32.mrb[57].mxu0  ;;  %v1508_v17 = vsel %vm1404_vm2, %v2172_v63, -inf }
 0x14b   :  { %v1261_v3 = vpop.f32.mrb[57].mxu1  ;;  %v1506_v4 = vsel %vm1404_vm2, %v861_v1, -inf  ;;  %v2173_v7 = vpop.f32.mrb[58].mxu0  ;;  %v1700_v10 = vsel %vm1404_vm2, %v2272_v0, -inf }
 0x14c   :  { %v1698_v11 = vsel %vm1404_vm2, %v1261_v3, -inf  ;;  %v2273_v12 = vpop.f32.mrb[58].mxu1  ;;  %v1507_v13 = vmax.f32 %v1505_v55, %v1506_v4  ;;  %v864_v14 = vpop.f32.mrb[59].mxu0  ;;  %v1555_v24 = vsel %vm1404_vm2, %v2173_v7, -inf }
 0x14d   :  { %v1699_v15 = vmax.f32 %v1697_v57, %v1698_v11  ;;  %v1264_v16 = vpop.f32.mrb[59].mxu1  ;;  %v1553_v18 = vsel %vm1404_vm2, %v864_v14, -inf  ;;  %v1747_v25 = vsel %vm1404_vm2, %v2273_v12, -inf }
 0x14e   :  { %v1745_v19 = vsel %vm1404_vm2, %v1264_v16, -inf  ;;  %v1554_v20 = vmax.f32 %v1552_v60, %v1553_v18  ;;  %v1509_v21 = vmax.f32 %v1507_v13, %v1508_v17 }
 0x14f   :  { %v1746_v22 = vmax.f32 %v1744_v62, %v1745_v19  ;;  %v1701_v23 = vmax.f32 %v1699_v15, %v1700_v10 }
 0x150   :  { %v1556_v26 = vmax.f32 %v1554_v20, %v1555_v24 }
 0x151   :  { %v1748_v27 = vmax.f32 %v1746_v22, %v1747_v25  ;;  %v2176_v28 = vpop.f32.mrb[60].mxu0 }
 0x152   :  { %v2276_v29 = vpop.f32.mrb[60].mxu1  ;;  %v877_v30 = vpop.f32.mrb[61].mxu0  ;;  %v1512_v43 = vsel %vm1404_vm2, %v2176_v28, -inf }
 0x153   :  { %v1277_v31 = vpop.f32.mrb[61].mxu1  ;;  %v1510_v32 = vsel %vm1404_vm2, %v877_v30, -inf  ;;  %v2177_v33 = vpop.f32.mrb[62].mxu0  ;;  %v1704_v34 = vsel %vm1404_vm2, %v2276_v29, -inf }
 0x154   :  { %v1702_v37 = vsel %vm1404_vm2, %v1277_v31, -inf  ;;  %v2277_v38 = vpop.f32.mrb[62].mxu1  ;;  %v1511_v39 = vmax.f32 %v1509_v21, %v1510_v32  ;;  %v880_v40 = vpop.f32.mrb[63].mxu0  ;;  %v1559_v54 = vsel %vm1404_vm2, %v2177_v33, -inf }
 0x155   :  { %v1703_v41 = vmax.f32 %v1701_v23, %v1702_v37  ;;  %v1280_v42 = vpop.f32.mrb[63].mxu1  ;;  %v1557_v47 = vsel %vm1404_vm2, %v880_v40, -inf  ;;  %v1751_v55 = vsel %vm1404_vm2, %v2277_v38, -inf }
 0x156   :  { %v1749_v48 = vsel %vm1404_vm2, %v1280_v42, -inf  ;;  %v1558_v49 = vmax.f32 %v1556_v26, %v1557_v47  ;;  %v1513_v51 = vmax.f32 %v1511_v39, %v1512_v43 }
 0x157   :  { %v1750_v52 = vmax.f32 %v1748_v27, %v1749_v48  ;;  %v1705_v53 = vmax.f32 %v1703_v41, %v1704_v34 }
 0x158   :  { %v1560_v56 = vmax.f32 %v1558_v49, %v1559_v54 }
 0x159   :  { %v1752_v57 = vmax.f32 %v1750_v52, %v1751_v55  ;;  %v2180_v58 = vpop.f32.mrb[64].mxu0 }
 0x15a   :  { %v2280_v59 = vpop.f32.mrb[64].mxu1  ;;  %v893_v60 = vpop.f32.mrb[65].mxu0  ;;  %v1516_v13 = vsel %vm1404_vm2, %v2180_v58, -inf }
 0x15b   :  { %v1293_v62 = vpop.f32.mrb[65].mxu1  ;;  %v1514_v63 = vsel %vm1404_vm2, %v893_v60, -inf  ;;  %v2181_v0 = vpop.f32.mrb[66].mxu0  ;;  %v1708_v1 = vsel %vm1404_vm2, %v2280_v59, -inf }
 0x15c   :  { %v1706_v3 = vsel %vm1404_vm2, %v1293_v62, -inf  ;;  %v2281_v4 = vpop.f32.mrb[66].mxu1  ;;  %v1515_v7 = vmax.f32 %v1513_v51, %v1514_v63  ;;  %v896_v10 = vpop.f32.mrb[67].mxu0  ;;  %v1563_v20 = vsel %vm1404_vm2, %v2181_v0, -inf }
 0x15d   :  { %v1707_v11 = vmax.f32 %v1705_v53, %v1706_v3  ;;  %v1296_v12 = vpop.f32.mrb[67].mxu1  ;;  %v1561_v14 = vsel %vm1404_vm2, %v896_v10, -inf  ;;  %v1755_v21 = vsel %vm1404_vm2, %v2281_v4, -inf }
 0x15e   :  { %v1753_v15 = vsel %vm1404_vm2, %v1296_v12, -inf  ;;  %v1562_v16 = vmax.f32 %v1560_v56, %v1561_v14  ;;  %v1517_v17 = vmax.f32 %v1515_v7, %v1516_v13 }
 0x15f   :  { %v1754_v18 = vmax.f32 %v1752_v57, %v1753_v15  ;;  %v1709_v19 = vmax.f32 %v1707_v11, %v1708_v1 }
 0x160   :  { %v1564_v22 = vmax.f32 %v1562_v16, %v1563_v20 }
 0x161   :  { %v1756_v23 = vmax.f32 %v1754_v18, %v1755_v21  ;;  %v2184_v24 = vpop.f32.mrb[68].mxu0 }
 0x162   :  { %v2284_v25 = vpop.f32.mrb[68].mxu1  ;;  %v909_v26 = vpop.f32.mrb[69].mxu0  ;;  %v1520_v39 = vsel %vm1404_vm2, %v2184_v24, -inf }
 0x163   :  { %v1309_v27 = vpop.f32.mrb[69].mxu1  ;;  %v1518_v28 = vsel %vm1404_vm2, %v909_v26, -inf  ;;  %v2185_v29 = vpop.f32.mrb[70].mxu0  ;;  %v1712_v30 = vsel %vm1404_vm2, %v2284_v25, -inf }
 0x164   :  { %v1710_v31 = vsel %vm1404_vm2, %v1309_v27, -inf  ;;  %v2285_v32 = vpop.f32.mrb[70].mxu1  ;;  %v1519_v33 = vmax.f32 %v1517_v17, %v1518_v28  ;;  %v912_v34 = vpop.f32.mrb[71].mxu0  ;;  %v1567_v49 = vsel %vm1404_vm2, %v2185_v29, -inf }
 0x165   :  { %v1711_v37 = vmax.f32 %v1709_v19, %v1710_v31  ;;  %v1312_v38 = vpop.f32.mrb[71].mxu1  ;;  %v1565_v40 = vsel %vm1404_vm2, %v912_v34, -inf  ;;  %v1759_v51 = vsel %vm1404_vm2, %v2285_v32, -inf }
 0x166   :  { %v1757_v41 = vsel %vm1404_vm2, %v1312_v38, -inf  ;;  %v1566_v42 = vmax.f32 %v1564_v22, %v1565_v40  ;;  %v1521_v43 = vmax.f32 %v1519_v33, %v1520_v39 }
 0x167   :  { %v1758_v47 = vmax.f32 %v1756_v23, %v1757_v41  ;;  %v1713_v48 = vmax.f32 %v1711_v37, %v1712_v30 }
 0x168   :  { %v1568_v52 = vmax.f32 %v1566_v42, %v1567_v49 }
 0x169   :  { %v1760_v53 = vmax.f32 %v1758_v47, %v1759_v51  ;;  %v2188_v54 = vpop.f32.mrb[72].mxu0 }
 0x16a   :  { %v2288_v55 = vpop.f32.mrb[72].mxu1  ;;  %v925_v56 = vpop.f32.mrb[73].mxu0  ;;  %v1524_v7 = vsel %vm1404_vm2, %v2188_v54, -inf }
 0x16b   :  { %v1325_v57 = vpop.f32.mrb[73].mxu1  ;;  %v1522_v58 = vsel %vm1404_vm2, %v925_v56, -inf  ;;  %v2189_v59 = vpop.f32.mrb[74].mxu0  ;;  %v1716_v60 = vsel %vm1404_vm2, %v2288_v55, -inf }
 0x16c   :  { %v1714_v62 = vsel %vm1404_vm2, %v1325_v57, -inf  ;;  %v2289_v63 = vpop.f32.mrb[74].mxu1  ;;  %v1523_v0 = vmax.f32 %v1521_v43, %v1522_v58  ;;  %v928_v1 = vpop.f32.mrb[75].mxu0  ;;  %v1571_v16 = vsel %vm1404_vm2, %v2189_v59, -inf }
 0x16d   :  { %v1715_v3 = vmax.f32 %v1713_v48, %v1714_v62  ;;  %v1328_v4 = vpop.f32.mrb[75].mxu1  ;;  %v1569_v10 = vsel %vm1404_vm2, %v928_v1, -inf  ;;  %v1763_v17 = vsel %vm1404_vm2, %v2289_v63, -inf }
 0x16e   :  { %v1761_v11 = vsel %vm1404_vm2, %v1328_v4, -inf  ;;  %v1570_v12 = vmax.f32 %v1568_v52, %v1569_v10  ;;  %v1525_v13 = vmax.f32 %v1523_v0, %v1524_v7 }
 0x16f   :  { %v1762_v14 = vmax.f32 %v1760_v53, %v1761_v11  ;;  %v1717_v15 = vmax.f32 %v1715_v3, %v1716_v60 }
 0x170   :  { %v1572_v18 = vmax.f32 %v1570_v12, %v1571_v16 }
 0x171   :  { %v1764_v19 = vmax.f32 %v1762_v14, %v1763_v17  ;;  %v2192_v20 = vpop.f32.mrb[76].mxu0 }
 0x172   :  { %v2292_v21 = vpop.f32.mrb[76].mxu1  ;;  %v941_v22 = vpop.f32.mrb[77].mxu0  ;;  %v1528_v33 = vsel %vm1404_vm2, %v2192_v20, -inf }
 0x173   :  { %v1341_v23 = vpop.f32.mrb[77].mxu1  ;;  %v1526_v24 = vsel %vm1404_vm2, %v941_v22, -inf  ;;  %v2193_v25 = vpop.f32.mrb[78].mxu0  ;;  %v1720_v26 = vsel %vm1404_vm2, %v2292_v21, -inf }
 0x174   :  { %v1718_v27 = vsel %vm1404_vm2, %v1341_v23, -inf  ;;  %v2293_v28 = vpop.f32.mrb[78].mxu1  ;;  %v1527_v29 = vmax.f32 %v1525_v13, %v1526_v24  ;;  %v944_v30 = vpop.f32.mrb[79].mxu0  ;;  %v1575_v42 = vsel %vm1404_vm2, %v2193_v25, -inf }
 0x175   :  { %v1719_v31 = vmax.f32 %v1717_v15, %v1718_v27  ;;  %v1344_v32 = vpop.f32.mrb[79].mxu1  ;;  %v1573_v34 = vsel %vm1404_vm2, %v944_v30, -inf  ;;  %v1767_v43 = vsel %vm1404_vm2, %v2293_v28, -inf }
 0x176   :  { %v1765_v37 = vsel %vm1404_vm2, %v1344_v32, -inf  ;;  %v1574_v38 = vmax.f32 %v1572_v18, %v1573_v34  ;;  %v1529_v39 = vmax.f32 %v1527_v29, %v1528_v33 }
 0x177   :  { %v1766_v40 = vmax.f32 %v1764_v19, %v1765_v37  ;;  %v1721_v41 = vmax.f32 %v1719_v31, %v1720_v26 }
 0x178   :  { %v1576_v47 = vmax.f32 %v1574_v38, %v1575_v42 }
 0x179   :  { %v1768_v48 = vmax.f32 %v1766_v40, %v1767_v43  ;;  %v2196_v49 = vpop.f32.mrb[80].mxu0 }
 0x17a   :  { %v2296_v51 = vpop.f32.mrb[80].mxu1  ;;  %v957_v52 = vpop.f32.mrb[81].mxu0  ;;  %v1532_v0 = vsel %vm1404_vm2, %v2196_v49, -inf }
 0x17b   :  { %v1357_v53 = vpop.f32.mrb[81].mxu1  ;;  %v1530_v54 = vsel %vm1404_vm2, %v957_v52, -inf  ;;  %v2197_v55 = vpop.f32.mrb[82].mxu0  ;;  %v1724_v56 = vsel %vm1404_vm2, %v2296_v51, -inf }
 0x17c   :  { %v1722_v57 = vsel %vm1404_vm2, %v1357_v53, -inf  ;;  %v2297_v58 = vpop.f32.mrb[82].mxu1  ;;  %v1531_v59 = vmax.f32 %v1529_v39, %v1530_v54  ;;  %v960_v60 = vpop.f32.mrb[83].mxu0  ;;  %v1579_v12 = vsel %vm1404_vm2, %v2197_v55, -inf }
 0x17d   :  { %v1723_v62 = vmax.f32 %v1721_v41, %v1722_v57  ;;  %v1360_v63 = vpop.f32.mrb[83].mxu1  ;;  %v1577_v1 = vsel %vm1404_vm2, %v960_v60, -inf  ;;  %v1771_v13 = vsel %vm1404_vm2, %v2297_v58, -inf }
 0x17e   :  { %v1769_v3 = vsel %vm1404_vm2, %v1360_v63, -inf  ;;  %v1578_v4 = vmax.f32 %v1576_v47, %v1577_v1  ;;  %v1533_v10 = vmax.f32 %v1531_v59, %v1532_v0 }
 0x17f   :  { %v1770_v7 = vmax.f32 %v1768_v48, %v1769_v3  ;;  %v1725_v11 = vmax.f32 %v1723_v62, %v1724_v56 }
 0x180   :  { %v1580_v14 = vmax.f32 %v1578_v4, %v1579_v12 }
 0x181   :  { %v1772_v15 = vmax.f32 %v1770_v7, %v1771_v13  ;;  %v2200_v16 = vpop.f32.mrb[84].mxu0 }
 0x182   :  { %v2300_v17 = vpop.f32.mrb[84].mxu1  ;;  %v973_v18 = vpop.f32.mrb[85].mxu0  ;;  %v1536_v29 = vsel %vm1404_vm2, %v2200_v16, -inf }
 0x183   :  { %v1373_v19 = vpop.f32.mrb[85].mxu1  ;;  %v1728_v20 = vsel %vm1404_vm2, %v2300_v17, -inf  ;;  %v1534_v21 = vsel %vm1404_vm2, %v973_v18, -inf  ;;  %v2201_v23 = vpop.f32.mrb[86].mxu0 }
 0x184   :  { %v1726_v22 = vsel %vm1404_vm2, %v1373_v19, -inf  ;;  %v2301_v24 = vpop.f32.mrb[86].mxu1  ;;  %v1535_v25 = vmax.f32 %v1533_v10, %v1534_v21  ;;  %v976_v27 = vpop.f32.mrb[87].mxu0  ;;  %v1583_v38 = vsel %vm1404_vm2, %v2201_v23, -inf }
 0x185   :  { %v1727_v26 = vmax.f32 %v1725_v11, %v1726_v22  ;;  %v1376_v28 = vpop.f32.mrb[87].mxu1  ;;  %v1581_v30 = vsel %vm1404_vm2, %v976_v27, -inf  ;;  %v1775_v39 = vsel %vm1404_vm2, %v2301_v24, -inf  ;;  %v2009_v11 = vld [vmem:[%s3329_s4] ss:$0 sm:$0xff] }
 0x186   :  { %v1773_v31 = vsel %vm1404_vm2, %v1376_v28, -inf  ;;  %v1582_v32 = vmax.f32 %v1580_v14, %v1581_v30  ;;  %v1537_v34 = vmax.f32 %v1535_v25, %v1536_v29 }
 0x187   :  { %v1774_v33 = vmax.f32 %v1772_v15, %v1773_v31  ;;  %v1729_v37 = vmax.f32 %v1727_v26, %v1728_v20 }
 0x188   :  { %v1584_v40 = vmax.f32 %v1582_v32, %v1583_v38 }
 0x189   :  { %v1776_v41 = vmax.f32 %v1774_v33, %v1775_v39  ;;  %v2204_v42 = vpop.f32.mrb[88].mxu0 }
 0x18a   :  { %v2304_v43 = vpop.f32.mrb[88].mxu1  ;;  %v989_v47 = vpop.f32.mrb[89].mxu0  ;;  %v1540_v59 = vsel %vm1404_vm2, %v2204_v42, -inf }
 0x18b   :  { %v1389_v48 = vpop.f32.mrb[89].mxu1  ;;  %v1732_v49 = vsel %vm1404_vm2, %v2304_v43, -inf  ;;  %v1538_v51 = vsel %vm1404_vm2, %v989_v47, -inf  ;;  %v2205_v53 = vpop.f32.mrb[90].mxu0 }
 0x18c   :  { %v1730_v52 = vsel %vm1404_vm2, %v1389_v48, -inf  ;;  %v2305_v54 = vpop.f32.mrb[90].mxu1  ;;  %v1539_v55 = vmax.f32 %v1537_v34, %v1538_v51  ;;  %v992_v57 = vpop.f32.mrb[91].mxu0  ;;  %v1587_v4 = vsel %vm1404_vm2, %v2205_v53, -inf }
 0x18d   :  { %v1731_v56 = vmax.f32 %v1729_v37, %v1730_v52  ;;  %v1392_v58 = vpop.f32.mrb[91].mxu1  ;;  %v1585_v60 = vsel %vm1404_vm2, %v992_v57, -inf  ;;  %v1779_v7 = vsel %vm1404_vm2, %v2305_v54, -inf }
 0x18e   :  { %v1777_v62 = vsel %vm1404_vm2, %v1392_v58, -inf  ;;  %v1586_v0 = vmax.f32 %v1584_v40, %v1585_v60  ;;  %v1541_v3 = vmax.f32 %v1539_v55, %v1540_v59 }
 0x18f   :  { %v1733_v63 = vmax.f32 %v1731_v56, %v1732_v49  ;;  %v1778_v1 = vmax.f32 %v1776_v41, %v1777_v62 }
 0x190   :  { %v1588_v12 = vmax.f32 %v1586_v0, %v1587_v4 }
 0x191   :  { %v1780_v10 = vmax.f32 %v1778_v1, %v1779_v7  ;;  %v2208_v13 = vpop.f32.mrb[92].mxu0 }
 0x192   :  { %v2310_v14 = vpop.f32.mrb[92].mxu1  ;;  %v1005_v15 = vpop.f32.mrb[93].mxu0  ;;  %v1544_v25 = vsel %vm1404_vm2, %v2208_v13, -inf }
 0x193   :  { %v1843_v16 = vpop.f32.mrb[93].mxu1  ;;  %v1542_v17 = vsel %vm1404_vm2, %v1005_v15, -inf  ;;  %v2209_v19 = vpop.f32.mrb[94].mxu0  ;;  %v1883_v21 = vadd.f32 %v2310_v14, %v2009_v11 }
 0x194   :  { %v1881_v18 = vadd.f32 %v2009_v11, %v1843_v16  ;;  %v2311_v20 = vpop.f32.mrb[94].mxu1  ;;  %v1543_v22 = vmax.f32 %v1541_v3, %v1542_v17  ;;  %v1008_v23 = vpop.f32.mrb[95].mxu0  ;;  %v1591_v31 = vsel %vm1404_vm2, %v2209_v19, -inf }
 0x195   :  { %v1846_v24 = vpop.f32.mrb[95].mxu1  ;;  %v1589_v27 = vsel %vm1404_vm2, %v1008_v23, -inf  ;;  %v1884_v34 = vadd.f32 %v2311_v20, %v2009_v11 }
 0x196   :  { %v1889_v26 = vadd.f32 %v1881_v18, %v1451_v5  ;;  %v1882_v28 = vadd.f32 %v2009_v11, %v1846_v24  ;;  %v1545_v29 = vmax.f32 %v1543_v22, %v1544_v25  ;;  %v1590_v30 = vmax.f32 %v1588_v12, %v1589_v27 }
 0x198   :  { %1897 = vst.msk [vmem:[%s3330_s5] sm:$0xff] %vm1404_vm2, %v1889_v26  ;;  %v1890_v32 = vadd.f32 %v1882_v28, %v1498_v9  ;;  %v1891_v33 = vadd.f32 %v1883_v21, %v1545_v29  ;;  %v1592_v61 = vmax.f32 %v1590_v30, %v1591_v31 }
 0x199   :  { %v2212_v2 = vpop.f32.mrb[96].mxu0 }
 0x19a   :  { %1898 = vst.msk [vmem:[%s3330_s5 + $0x8] sm:$0xff] %vm1404_vm2, %v1890_v32  ;;  %v2314_v5 = vpop.f32.mrb[96].mxu1  ;;  %1899 = vst.msk [vmem:[%s3330_s5 + $0x10] sm:$0xff] %vm1404_vm2, %v1891_v33  ;;  %v1892_v37 = vadd.f32 %v1884_v34, %v1592_v61  ;;  %v1594_v38 = vsel %vm1404_vm2, %v2212_v2, -inf  ;;  %v1021_v8 = vpop.f32.mrb[97].mxu0 }
 0x19b   :  { %v1887_v6 = vadd.f32 %v2314_v5, %v2009_v11  ;;  %v1859_v9 = vpop.f32.mrb[97].mxu1  ;;  %v1593_v39 = vsel %vm1404_vm2, %v1021_v8, -inf  ;;  %v2213_v41 = vpop.f32.mrb[98].mxu0 }
 0x19c   :  { %v1885_v40 = vadd.f32 %v2009_v11, %v1859_v9  ;;  %v2315_v42 = vpop.f32.mrb[98].mxu1  ;;  %1900 = vst.msk [vmem:[%s3330_s5 + $0x18] sm:$0xff] %vm1404_vm2, %v1892_v37  ;;  %v1595_v47 = vmax.f32 %v1593_v39, %v1594_v38  ;;  %v1641_v48 = vsel %vm1404_vm2, %v2213_v41, -inf  ;;  %v1024_v51 = vpop.f32.mrb[99].mxu0 }
 0x19d   :  { %v1895_v43 = vadd.f32 %v1887_v6, %v1733_v63  ;;  %v1888_v49 = vadd.f32 %v2315_v42, %v2009_v11  ;;  %v1862_v52 = vpop.f32.mrb[99].mxu1  ;;  %v1640_v53 = vsel %vm1404_vm2, %v1024_v51, -inf }
 0x19e   :  { %v1639_v54 = vmax.f32 %v1637_v44, %v1595_v47  ;;  %v1642_v56 = vmax.f32 %v1640_v53, %v1641_v48  ;;  %v1886_v59 = vadd.f32 %v2009_v11, %v1862_v52 }
 0x19f   :  { %1903 = vst.msk [vmem:[%s3330_s5 + $0x30] sm:$0xff] %vm1404_vm2, %v1895_v43  ;;  %v1896_v55 = vadd.f32 %v1888_v49, %v1780_v10 }
 0x1a0   :  { %v1893_v57 = vadd.f32 %v1885_v40, %v1639_v54  ;;  %v1686_v58 = vmax.f32 %v1684_v50, %v1642_v56 }
 0x1a1   :  { %1904 = vst.msk [vmem:[%s3330_s5 + $0x38] sm:$0xff] %vm1404_vm2, %v1896_v55 }
 0x1a2   :  { %1901 = vst.msk [vmem:[%s3330_s5 + $0x20] sm:$0xff] %vm1404_vm2, %v1893_v57  ;;  %v1894_v35 = vadd.f32 %v1886_v59, %v1686_v58 }
 0x1a4   :  { %1902 = vst.msk [vmem:[%s3330_s5 + $0x28] sm:$0xff] %vm1404_vm2, %v1894_v35 }

// kernel: _lambda_.7
= control target key start
LH: loop header
LB: loop body
LE: loop exit
PB: predicated region body
PF: predicated region fallthrough
CT: control target
= control target key end

     0   :  { %vm54_vm0 = vcmask 523264   ;;  %vm85_vm1 = vcmask 1041409   ;;  %vm88_vm2 = vcmask 517120   ;;  %s1201_s0 = inlined_call_operand.vmem [shape: f32[2,32,64], index: 0, kind: input, shape index: {}]   ;;  %s1202_s1 = inlined_call_operand.vmem [shape: f32[2,2], index: 1, kind: input, shape index: {}]   ;;  %s1203_s2 = inlined_call_operand.vmem [shape: f32[1,64], index: 2, kind: input, shape index: {}]   ;;  %s1204_s3 = inlined_call_operand.vmem [shape: f32[1,64], index: 3, kind: input, shape index: {}]   ;;  %s1205_s4 = inlined_call_operand.vmem [shape: bf16[64,128], index: 4, kind: input, shape index: {}]   ;;  %s1206_s5 = inlined_call_operand.vmem [shape: f32[1,128], index: 5, kind: input, shape index: {}]   ;;  %s1207_s6 = inlined_call_operand.vmem [shape: bf16[128,80], index: 6, kind: input, shape index: {}]   ;;  %s1208_s7 = inlined_call_operand.vmem [shape: f32[1,80], index: 7, kind: input, shape index: {}]   ;;  %s1209_s8 = inlined_call_operand.vmem [shape: bf16[80,200], index: 8, kind: input, shape index: {}]   ;;  %s1210_s9 = inlined_call_operand.vmem [shape: bf16[2,200], index: 9, kind: input, shape index: {}]   ;;  %s1211_s10 = inlined_call_operand.vmem [shape: f32[1,200], index: 10, kind: input, shape index: {}]   ;;  %s1212_s11 = inlined_call_operand.vmem [shape: bf16[200,10], index: 11, kind: input, shape index: {}]   ;;  %s1213_s12 = inlined_call_operand.vmem [shape: f32[1,10], index: 12, kind: input, shape index: {}]   ;;  %s1214_s13 = inlined_call_operand.hbm [shape: f32[2,10], index: 13, kind: output, shape index: {}]  }
   0x1   :  { %v46_v0 = vld [vmem:[%s1201_s0] sm:$0xff]  ;;  %v47_v1 = vld [vmem:[%s1201_s0 + $0x8] sm:$0xff]  ;;  %v48_v2 = vld [vmem:[%s1201_s0 + $0x10] sm:$0xff] }
   0x2   :  { %v49_v3 = vld [vmem:[%s1201_s0 + $0x18] sm:$0xff]  ;;  %v50_v4 = vld [vmem:[%s1201_s0 + $0x20] sm:$0xff]  ;;  %v51_v5 = vld [vmem:[%s1201_s0 + $0x28] sm:$0xff]  ;;  %v55_v6 = vsel %vm54_vm0, %v46_v0, -inf  ;;  %v56_v7 = vsel %vm54_vm0, %v47_v1, -inf  ;;  %v57_v8 = vsel %vm54_vm0, %v48_v2, -inf }
   0x3   :  { %v52_v9 = vld [vmem:[%s1201_s0 + $0x30] sm:$0xff]  ;;  %v53_v10 = vld [vmem:[%s1201_s0 + $0x38] sm:$0xff]  ;;  %v58_v11 = vmax.f32 %v55_v6, %v57_v8  ;;  %v59_v12 = vsel %vm54_vm0, %v49_v3, -inf  ;;  %v68_v13 = vsel %vm54_vm0, %v50_v4, -inf  ;;  %v69_v14 = vsel %vm54_vm0, %v51_v5, -inf }
   0x4   :  { %v60_v15 = vmax.f32 %v56_v7, %v59_v12  ;;  %v70_v16 = vsel %vm54_vm0, %v52_v9, -inf  ;;  %v72_v17 = vsel %vm54_vm0, %v53_v10, -inf }
   0x5   :  { %v71_v18 = vmax.f32 %v68_v13, %v70_v16  ;;  %v73_v19 = vmax.f32 %v69_v14, %v72_v17 }
   0x6   :  { %v61_v20 = vmax.f32 %v58_v11, %v60_v15 }
   0x7   :  { %v74_v21 = vmax.f32 %v71_v18, %v73_v19 }
   0x8   :  { %v62_v22 = vrot.slane %v61_v20, 4 }
   0x9   :  { %v75_v23 = vrot.slane %v74_v21, 4 }
   0xa   :  { %v63_v24 = vmax.f32 %v61_v20, %v62_v22 }
   0xb   :  { %v76_v25 = vmax.f32 %v74_v21, %v75_v23 }
   0xc   :  { %v64_v26 = vrot.slane %v63_v24, 2 }
   0xd   :  { %v77_v27 = vrot.slane %v76_v25, 2 }
   0xe   :  { %v65_v28 = vmax.f32 %v63_v24, %v64_v26 }
   0xf   :  { %v78_v29 = vmax.f32 %v76_v25, %v77_v27 }
  0x10   :  { %v66_v30 = vrot.slane %v65_v28, 1 }
  0x11   :  { %v79_v31 = vrot.slane %v78_v29, 1 }
  0x12   :  { %v67_v32 = vmax.f32 %v65_v28, %v66_v30 }
  0x13   :  { %v80_v33 = vmax.f32 %v78_v29, %v79_v31 }
  0x15   :  { %v86_v34 = vsel %vm85_vm1, %v80_v33, %v67_v32 }
  0x16   :  { %v89_v35 = vsel %vm88_vm2, %v86_v34, 0.0 }
  0x17   :  { %90 = vadd.xlane.f32.xlu0 %v89_v35 }
  0x18   :  { %18 = vsyncpa [#allocation3], 0  ;;  %v851_v46 = vld [vmem:[%s1205_s4] sm:$0xff]   ;;  %v927_v47 = vmov 0.0   ;;  %v852_v48 = vld [vmem:[%s1205_s4 + $0x8] sm:$0xff]   ;;  %vm928_vm3 = vmmov 0  }
  0x19   :  { %814 = vmatprep.subr.bf16.mxu1 %v927_v47  ;;  %826 = vmatprep.subr.bf16.mxu0 %v927_v47  ;;  %v853_v49 = vld [vmem:[%s1205_s4 + $0x10] sm:$0xff]   ;;  %v854_v50 = vld [vmem:[%s1205_s4 + $0x18] sm:$0xff]   ;;  %v754_v55 = vld [vmem:[%s1203_s2] ss:$0 sm:$0xff]  ;;  %vm406_vm4 = vcmask 1040384   ;;  %vm402_vm5 = vcmask 15360  }
  0x1a   :  { %815 = vmatpush3.bf16.msra.mxu1 %v851_v46  ;;  %822 = vmatprep.mubr.msk.bf16.mxu1 %vm928_vm3, %v927_v47  ;;  %v755_v58 = vld [vmem:[%s1204_s3] ss:$0 sm:$0xff]  ;;  %v856_v8 = vld [vmem:[%s1207_s6 + $0x8] sm:$0xff]   ;;  %v857_v9 = vld [vmem:[%s1207_s6 + $0x10] sm:$0xff]   ;;  %vm504_vm6 = vcmask 654336   ;;  %vm694_vm7 = vcmask 1043456  }
  0x1b   :  { %816 = vmatprep.subr.bf16.mxu1 %v927_v47  ;;  %842 = vmatprep.mubr.msk.bf16.mxu0 %vm928_vm3, %v927_v47  ;;  %v855_v7 = vld [vmem:[%s1207_s6] sm:$0xff]   ;;  %v858_v10 = vld [vmem:[%s1207_s6 + $0x18] sm:$0xff]   ;;  %v860_v12 = vld [vmem:[%s1207_s6 + $0x28] sm:$0xff]   ;;  %vm690_vm8 = vcmask 588800   ;;  %vm738_vm9 = vcmask 74752  }
  0x1c   :  { %827 = vmatpush3.bf16.msra.mxu0 %v855_v7  ;;  %v859_v11 = vld [vmem:[%s1207_s6 + $0x20] sm:$0xff]   ;;  %v861_v13 = vld [vmem:[%s1207_s6 + $0x30] sm:$0xff]   ;;  %v862_v14 = vld [vmem:[%s1207_s6 + $0x38] sm:$0xff]  }
  0x1d   :  { %828 = vmatprep.subr.bf16.mxu0 %v927_v47  ;;  %v756_v15 = vld [vmem:[%s1206_s5] ss:$0 sm:$0xff]  ;;  %s931_s5 = smov [#allocation2]  }
  0x1e   :  { %817 = vmatpush3.bf16.msra.mxu1 %v852_v48  ;;  %v356_v31 = vld [vmem:[%s1202_s1] sm:$0x3]  ;;  %s746_s16 = sshll.u32 %s931_s5, 4  ;;  %s747_s16 = int_to_ptr.vmem [resolvable:$true] %s746_s16 }
  0x1f   :  { %818 = vmatprep.subr.bf16.mxu1 %v927_v47  ;;  %s903_s1 = scalar_lea.vmem %s747_s16, 32  ;;  %p908_p1 = scmp.lt.s32.totalorder %s747_s16, %s747_s16 }
  0x20   :  { %829 = vmatpush3.bf16.msra.mxu0 %v856_v8  ;;  %p904_p0 = scmp.ne.s32.totalorder %s747_s16, %s903_s1  ;;  %p909_p2 = scmp.lt.s32.totalorder %s903_s1, %s903_s1 }
  0x21   :  { %830 = vmatprep.subr.bf16.mxu0 %v927_v47 }
  0x22   :  { %819 = vmatpush3.bf16.msra.mxu1 %v853_v49  ;;  %p910_p3 = por %p909_p2, %p908_p1 }
  0x23   :  { %820 = vmatprep.subr.bf16.mxu1 %v927_v47 }
  0x24   :  { %831 = vmatpush3.bf16.msra.mxu0 %v857_v9  ;;  %p911_p4 = pnand %p910_p3, %p904_p0 }
  0x25   :  { %832 = vmatprep.subr.bf16.mxu0 %v927_v47 }
  0x26   :  { %821 = vmatpush3.bf16.msra.mxu1 %v854_v50 }
  0x28   :  { %833 = vmatpush3.bf16.msra.mxu0 %v858_v10 }
  0x29   :  { %834 = vmatprep.subr.bf16.mxu0 %v927_v47 }
  0x2c   :  { %835 = vmatpush3.bf16.msra.mxu0 %v859_v11 }
  0x2d   :  { %836 = vmatprep.subr.bf16.mxu0 %v927_v47 }
  0x30   :  { %837 = vmatpush3.bf16.msra.mxu0 %v860_v12 }
  0x31   :  { %838 = vmatprep.subr.bf16.mxu0 %v927_v47 }
  0x34   :  { %839 = vmatpush3.bf16.msra.mxu0 %v861_v13 }
  0x35   :  { %840 = vmatprep.subr.bf16.mxu0 %v927_v47 }
  0x38   :  { %841 = vmatpush3.bf16.msra.mxu0 %v862_v14 }
  0xa4   :  { %v91_v36 = vpop.xlane.xlu0 %90 }
  0xa5   :  { %v93_v37 = vmul.f32 0.015625, %v91_v36 }
  0xa7   :  { %v95_v38 = vrot.slane %v93_v37, 1  ;;  %v98_v39 = vsub.f32 %v67_v32, %v93_v37  ;;  %v357_v32 = vmul.f32 %v356_v31, %v356_v31  ;;  %v929_v37 = vmov 1966171168  }
  0xa9   :  { %v99_v40 = vsub.f32 %v80_v33, %v95_v38  ;;  %v100_v42 = vmul.f32 %v98_v39, %v98_v39  ;;  %v358_v33 = vmul.f32 %v357_v32, %v356_v31  ;;  %v389_v38 = vunpack.c.l.s4 %v929_v37  ;;  %v890_v32 = vld [vmem:[%s1212_s11 + $0x60] ss:$0 sps:$4 sm:$0xff]  }
  0xab   :  { %v101_v41 = vmul.f32 %v99_v40, %v99_v40  ;;  %v359_v34 = vmul.f32 0.044715, %v358_v33  ;;  %v696_v33 = vsel %vm694_vm7, %v890_v32, 0 }
  0xad   :  { %v104_v43 = vrot.slane %v101_v41, 7  ;;  %v360_v35 = vadd.f32 %v359_v34, %v356_v31 }
  0xaf   :  { %v105_v44 = vsel %vm85_vm1, %v104_v43, %v100_v42  ;;  %v361_v36 = vmul.f32 0.7978846, %v360_v35  ;;  %v771_v43 = vld.sshfl [vmem:[%s1210_s9] sm:$0x11 pattern:$0x75316420] }
  0xb0   :  { %v107_v45 = vsel %vm88_vm2, %v105_v44, 0.0  ;;  %v387_v44 = vcombine.high %v771_v43, %v771_v43  ;;  %v549_v35 = vld [vmem:[%s1211_s10] sm:$0x3] }
  0xb1   :  { %108 = vadd.xlane.f32.xlu0 %v107_v45 }
 0x13e   :  { %v109_v51 = vpop.xlane.xlu0 %108 }
 0x13f   :  { %v110_v52 = vmul.f32 0.015625, %v109_v51 }
 0x141   :  { %v111_v53 = vadd.f32 1e-05, %v110_v52 }
 0x143   :  { %891 = vrsqrt.f32 %v111_v53  ;;  %v930_v53 = vmov 0  }
 0x144   :  { %698 = vmatprep.subr.bf16.mxu1 %v930_v53 }
 0x14d   :  { %v892_v54 = vpop.eup %891 }
 0x14e   :  { %v114_v56 = vrot.slane %v892_v54, 1  ;;  %v117_v57 = vmul.f32 %v892_v54, %v98_v39  ;;  %v391_v39 = vlaneseq  ;;  %v865_v54 = vld [vmem:[%s1209_s8 + $0x4] ss:$8 sps:$4 sm:$0xff]  }
 0x150   :  { %v118_v59 = vmul.f32 %v114_v56, %v99_v40  ;;  %v125_v60 = vmul.f32 %v754_v55, %v117_v57  ;;  %v390_v40 = vunpack.c.0.s8 %v389_v38  ;;  %v1088_v41 = vshrl.u32 %v391_v39, 7  ;;  %v868_v56 = vld [vmem:[%s1209_s8 + $0x14] ss:$8 sps:$4 sm:$0xff]   ;;  %v866_v57 = vld [vmem:[%s1209_s8 + $0x10] ss:$8 sps:$4 sm:$0xff]  }
 0x152   :  { %v126_v61 = vmul.f32 %v754_v55, %v118_v59  ;;  %v133_v62 = vadd.f32 %v755_v58, %v125_v60  ;;  %v393_v45 = vsub.s32 %v390_v40, %v1088_v41  ;;  %v863_v55 = vld [vmem:[%s1209_s8] ss:$8 sps:$4 sm:$0xff]   ;;  %v874_v60 = vld [vmem:[%s1209_s8 + $0x34] ss:$8 sps:$4 sm:$0xff]   ;;  %v553_v34 = vsub.s32 0, %v1088_v41 }
 0x153   :  { %v869_v59 = vld [vmem:[%s1209_s8 + $0x20] ss:$8 sps:$4 sm:$0xff]  }
 0x154   :  { %v134_v63 = vadd.f32 %v755_v58, %v126_v61  ;;  %v135_v0 = vpack.c.bf16 %v133_v62, %v133_v62  ;;  %v401_v47 = vrot.slane %v387_v44, %v393_v45  ;;  %v394_v48 = vrot.slane %v771_v43, %v393_v45  ;;  %v871_v58 = vld [vmem:[%s1209_s8 + $0x24] ss:$8 sps:$4 sm:$0xff]   ;;  %v872_v61 = vld [vmem:[%s1209_s8 + $0x30] ss:$8 sps:$4 sm:$0xff]  }
 0x155   :  { %v877_v62 = vld [vmem:[%s1209_s8 + $0x44] ss:$8 sps:$4 sm:$0xff]   ;;  %v554_v37 = vrot.slane %v549_v35, %v553_v34 }
 0x156   :  { %v136_v1 = vpack.c.bf16 %v134_v63, %v134_v63  ;;  %v154_v3 = vunpack.c.l.b16 %v135_v0  ;;  %772 = vmatprep.subr.msk.bf16.mxu0 %vm406_vm4, %v401_v47  ;;  %v408_v50 = vsel %vm406_vm4, %v394_v48, 0  ;;  %v875_v63 = vld [vmem:[%s1209_s8 + $0x40] ss:$8 sps:$4 sm:$0xff]  }
 0x157   :  { %v878_v0 = vld [vmem:[%s1212_s11] sm:$0xff]  }
 0x158   :  { %v155_v2 = vunpack.c.l.b16 %v136_v1  ;;  %v879_v1 = vld [vmem:[%s1212_s11 + $0x8] sm:$0xff]  }
 0x15a   :  { %v156_v4 = vrot.slane %v155_v2, 7  ;;  %v880_v2 = vld [vmem:[%s1212_s11 + $0x10] sm:$0xff]  }
 0x15c   :  { %v157_v5 = vsel %vm85_vm1, %v156_v4, %v154_v3  ;;  %v881_v3 = vld [vmem:[%s1212_s11 + $0x18] sm:$0xff]   ;;  %v762_v4 = vld [vmem:[%s1208_s7] ss:$0 sm:$0xff] }
 0x15d   :  { %v158_v6 = vpack.c.b16 %v157_v5, %v157_v5 }
 0x15f   :  { %823 = vmatmul.mubr.msk.bf16.vlgmr.msra.gmra.mrb[0].mxu1 %vm54_vm0, %v158_v6 }
 0x160   :  { %699 = vmatpush1.bf16.msra.mxu1 %v878_v0 }
 0x161   :  { %700 = vmatprep.subr.bf16.mxu1 %v930_v53 }
 0x164   :  { %701 = vmatpush1.bf16.msra.mxu1 %v879_v1 }
 0x165   :  { %702 = vmatprep.subr.bf16.mxu1 %v930_v53 }
 0x168   :  { %703 = vmatpush1.bf16.msra.mxu1 %v880_v2 }
 0x169   :  { %704 = vmatprep.subr.bf16.mxu1 %v930_v53 }
 0x16c   :  { %705 = vmatpush1.bf16.msra.mxu1 %v881_v3  ;;  %v785_v3 = vld [vmem:[%s1213_s12] ss:$0 sm:$0xff] }
 0x16d   :  { %706 = vmatprep.subr.bf16.mxu1 %v930_v53 }
 0x232   :  { %v220_v16 = vpop.f32.mrb[0].mxu1 }
 0x233   :  { %v221_v17 = vadd.f32 %v756_v15, %v220_v16  ;;  %v824_v18 = vpop.f32.mrb[1].mxu1 }
 0x234   :  { %v223_v19 = vpop.f32.mrb[2].mxu1 }
 0x235   :  { %v226_v20 = vmul.f32 %v221_v17, %v221_v17  ;;  %v825_v21 = vpop.f32.mrb[3].mxu1 }
 0x237   :  { %v227_v22 = vmul.f32 %v226_v20, %v221_v17 }
 0x239   :  { %v228_v23 = vmul.f32 0.044715, %v227_v22 }
 0x23b   :  { %v229_v24 = vadd.f32 %v228_v23, %v221_v17 }
 0x23d   :  { %v230_v25 = vmul.f32 0.7978846, %v229_v24  ;;  %v882_v24 = vld [vmem:[%s1212_s11 + $0x20] sm:$0xff]  }
 0x23e   :  { %707 = vmatpush1.bf16.msra.mxu1 %v882_v24 }
 0x23f   :  { %893 = vtanh.f32 %v230_v25  ;;  %708 = vmatprep.subr.bf16.mxu1 %v930_v53  ;;  %v883_v25 = vld [vmem:[%s1212_s11 + $0x28] sm:$0xff]  }
 0x240   :  { %895 = vtanh.f32 %v361_v36  ;;  %v557_v36 = vsub.s32 1, %v1088_v41 }
 0x242   :  { %709 = vmatpush1.bf16.msra.mxu1 %v883_v25  ;;  %v558_v39 = vrot.slane %v549_v35, %v557_v36 }
 0x243   :  { %710 = vmatprep.subr.bf16.mxu1 %v930_v53 }
 0x249   :  { %v894_v26 = vpop.eup %893 }
 0x24a   :  { %v232_v27 = vadd.f32 1.0, %v894_v26  ;;  %v896_v42 = vpop.eup %895  ;;  %v884_v26 = vld [vmem:[%s1212_s11 + $0x30] sm:$0xff]  }
 0x24b   :  { %v363_v46 = vadd.f32 1.0, %v896_v42  ;;  %711 = vmatpush1.bf16.msra.mxu1 %v884_v26 }
 0x24c   :  { %v233_v28 = vmul.f32 0.5, %v232_v27  ;;  %712 = vmatprep.subr.bf16.mxu1 %v930_v53  ;;  %v885_v27 = vld [vmem:[%s1212_s11 + $0x38] sm:$0xff]  }
 0x24d   :  { %v364_v49 = vmul.f32 0.5, %v363_v46 }
 0x24e   :  { %v234_v29 = vmul.f32 %v233_v28, %v221_v17  ;;  %v886_v28 = vld [vmem:[%s1212_s11 + $0x40] sm:$0xff]  }
 0x24f   :  { %v365_v51 = vmul.f32 %v364_v49, %v356_v31  ;;  %713 = vmatpush1.bf16.msra.mxu1 %v885_v27  ;;  %v889_v31 = vld [vmem:[%s1212_s11 + $0x58] sm:$0xff]  }
 0x250   :  { %v235_v30 = vpack.c.bf16 %v234_v29, %v234_v29  ;;  %714 = vmatprep.subr.bf16.mxu1 %v930_v53  ;;  %v887_v29 = vld [vmem:[%s1212_s11 + $0x48] sm:$0xff]  }
 0x251   :  { %v377_v52 = vpack.c.bf16 %v365_v51, %v365_v51 }
 0x252   :  { %843 = vmatmul.mubr.bf16.vlgmr.msra.gmra.mrb[0].mxu0 %v235_v30  ;;  %v888_v30 = vld [vmem:[%s1212_s11 + $0x50] sm:$0xff]  }
 0x253   :  { %414 = vmatpush1.bf16.msra.mxu0 %v408_v50  ;;  %445 = vmatprep.mubr.bf16.mxu0 %v930_v53 }
 0x254   :  { %508 = vmatprep.subr.bf16.mxu0 %v865_v54  ;;  %715 = vmatpush1.bf16.msra.mxu1 %v886_v28 }
 0x255   :  { %716 = vmatprep.subr.bf16.mxu1 %v930_v53 }
 0x258   :  { %717 = vmatpush1.bf16.msra.mxu1 %v887_v29 }
 0x259   :  { %718 = vmatprep.subr.bf16.mxu1 %v930_v53 }
 0x25a   :  { %773 = vmatmul.mubr.msk.bf16.vlgmr.msra.gmra.mrb[4].mxu0 %vm402_vm5, %v377_v52 }
 0x25b   :  { %540 = vmatprep.mubr.bf16.mxu0 %v930_v53  ;;  %509 = vmatpush1.bf16.msra.mxu0 %v863_v55 }
 0x25c   :  { %510 = vmatprep.subr.bf16.mxu0 %v868_v56  ;;  %719 = vmatpush1.bf16.msra.mxu1 %v888_v30 }
 0x25d   :  { %720 = vmatprep.subr.bf16.mxu1 %v930_v53 }
 0x25f   :  { %511 = vmatpush1.bf16.msra.mxu0 %v866_v57 }
 0x260   :  { %512 = vmatprep.subr.bf16.mxu0 %v871_v58  ;;  %721 = vmatpush1.bf16.msra.mxu1 %v889_v31 }
 0x261   :  { %722 = vmatprep.subr.bf16.mxu1 %v930_v53 }
 0x263   :  { %513 = vmatpush1.bf16.msra.mxu0 %v869_v59 }
 0x264   :  { %514 = vmatprep.subr.bf16.mxu0 %v874_v60  ;;  %723 = vmatpush1.bf16.msra.mxu1 %v696_v33 }
 0x267   :  { %515 = vmatpush1.bf16.msra.mxu0 %v872_v61 }
 0x268   :  { %516 = vmatprep.subr.bf16.mxu0 %v877_v62 }
 0x26b   :  { %517 = vmatpush1.bf16.msra.mxu0 %v875_v63 }
 0x325   :  { %v341_v5 = vpop.f32.mrb[0].mxu0 }
 0x326   :  { %v342_v6 = vadd.f32 %v762_v4, %v341_v5  ;;  %v844_v7 = vpop.f32.mrb[1].mxu0 }
 0x327   :  { %v344_v8 = vpop.f32.mrb[2].mxu0 }
 0x328   :  { %v347_v9 = vmul.f32 %v342_v6, %v342_v6  ;;  %v845_v10 = vpop.f32.mrb[3].mxu0 }
 0x32a   :  { %v348_v11 = vmul.f32 %v347_v9, %v342_v6 }
 0x32c   :  { %v349_v12 = vmul.f32 0.044715, %v348_v11 }
 0x32d   :  { %v447_v20 = vpop.f32.mrb[4].mxu0 }
 0x32e   :  { %v350_v13 = vadd.f32 %v349_v12, %v342_v6  ;;  %v449_v21 = vpop.f32.mrb[5].mxu0 }
 0x32f   :  { %v451_v22 = vpop.f32.mrb[6].mxu0 }
 0x330   :  { %v351_v14 = vmul.f32 0.7978846, %v350_v13  ;;  %v452_v23 = vpop.f32.mrb[7].mxu0 }
 0x332   :  { %897 = vtanh.f32 %v351_v14 }
 0x33c   :  { %v898_v15 = vpop.eup %897 }
 0x33d   :  { %v353_v16 = vadd.f32 1.0, %v898_v15 }
 0x33f   :  { %v354_v17 = vmul.f32 0.5, %v353_v16 }
 0x341   :  { %v355_v18 = vmul.f32 %v354_v17, %v342_v6 }
 0x343   :  { %v366_v19 = vpack.c.bf16 %v355_v18, %v355_v18 }
 0x345   :  { %784 = vmatmul.mubr.msk.bf16.vlgmr.msra.gmra.mrb[8].mxu0 %vm504_vm6, %v366_v19 }
 0x418   :  { %v542_v38 = vpop.f32.mrb[8].mxu0 }
 0x419   :  { %v543_v40 = vadd.f32 %v542_v38, %v447_v20  ;;  %v544_v42 = vpop.f32.mrb[9].mxu0 }
 0x41a   :  { %v545_v43 = vadd.f32 %v544_v42, %v449_v21  ;;  %v546_v44 = vpop.f32.mrb[10].mxu0 }
 0x41b   :  { %v561_v45 = vadd.f32 %v554_v37, %v543_v40  ;;  %v547_v46 = vpop.f32.mrb[11].mxu0 }
 0x41c   :  { %v562_v47 = vadd.f32 %v558_v39, %v545_v43 }
 0x41d   :  { %v563_v48 = vmul.f32 %v561_v45, %v561_v45 }
 0x41e   :  { %v564_v49 = vmul.f32 %v562_v47, %v562_v47 }
 0x41f   :  { %v565_v50 = vmul.f32 %v563_v48, %v561_v45 }
 0x420   :  { %v566_v51 = vmul.f32 %v564_v49, %v562_v47 }
 0x421   :  { %v567_v52 = vmul.f32 0.044715, %v565_v50 }
 0x422   :  { %v568_v53 = vmul.f32 0.044715, %v566_v51 }
 0x423   :  { %v569_v54 = vadd.f32 %v567_v52, %v561_v45 }
 0x424   :  { %v570_v55 = vadd.f32 %v568_v53, %v562_v47 }
 0x425   :  { %v571_v56 = vmul.f32 0.7978846, %v569_v54 }
 0x426   :  { %v572_v41 = vmul.f32 0.7978846, %v570_v55 }
 0x427   :  { %899 = vtanh.f32 %v571_v56 }
 0x428   :  { %901 = vtanh.f32 %v572_v41 }
 0x431   :  { %v900_v57 = vpop.eup %899 }
 0x432   :  { %v902_v58 = vpop.eup %901  ;;  %v575_v59 = vadd.f32 1.0, %v900_v57 }
 0x433   :  { %v576_v60 = vadd.f32 1.0, %v902_v58 }
 0x434   :  { %v577_v61 = vmul.f32 0.5, %v575_v59 }
 0x435   :  { %v578_v62 = vmul.f32 0.5, %v576_v60 }
 0x436   :  { %v579_v63 = vmul.f32 %v577_v61, %v561_v45 }
 0x437   :  { %v580_v0 = vmul.f32 %v578_v62, %v562_v47 }
 0x438   :  { %v581_v2 = vpack.c.bf16 %v579_v63, %v579_v63 }
 0x439   :  { %v582_v1 = vpack.c.bf16 %v580_v0, %v580_v0 }
 0x43b   :  { %799 = vmatprep.mubr.msk.bf16.mxu1 %vm690_vm8, %v582_v1 }
 0x43c   :  { %731 = vmatmul.mubr.bf16.vlgmr.msra.gmra.mrb[4].mxu1 %v581_v2 }
 0x50f   :  { %v732_v4 = vpop.f32.mrb[4].mxu1 }
 0x510   :  { %v733_v5 = vadd.f32 %v785_v3, %v732_v4  ;;  %v734_v6 = vpop.f32.mrb[5].mxu1 }
 0x511   :  { %v735_v7 = vpop.f32.mrb[6].mxu1 }
 0x512   :  { %v736_v8 = vpop.f32.mrb[7].mxu1  ;;  %739 = vst.msk [vmem:[#allocation2] sm:$0x3] %vm738_vm9, %v733_v5 }
 0x513   :  { %914 = shalt.err (!%p911_p4)
}
 0x514   :  { %s915_s12 = scalar_lea.hbm %s1214_s13, 32 }
 0x515   :  { %p916_p5 = scmp.ne.s32.totalorder %s1214_s13, %s915_s12  ;;  %p919_p6 = scmp.lt.u32.totalorder %s915_s12, %s1214_s13 }
 0x517   :  { %p921_p7 = pnand %p919_p6, %p916_p5 }
 0x519   :  { %924 = shalt.err (!%p921_p7)
}
 0x51a   :  { %749 = dma.vmem_to_hbm [thread:$0]  %s747_s16, 32, %s1214_s13, [#allocation3]  }
 0x51b   :  { %925 = dma.done.wait [#allocation3], 32  }
 0x51c   :  { %926 = vsyncadd [#allocation3], 4294967264 }
 0x51d   :  { %753 = vsyncpa [#allocation3], 1 }

// kernel: _lambda_.5
= control target key start
LH: loop header
LB: loop body
LE: loop exit
PB: predicated region body
PF: predicated region fallthrough
CT: control target
= control target key end

     0   :  { %s2487_s21 = smov 0   ;;  %s2801_s0 = inlined_call_operand.vmem [shape: f32[2,32,64], index: 0, kind: input, shape index: {}]   ;;  %s2802_s1 = inlined_call_operand.vmem [shape: f32[1,64], index: 1, kind: input, shape index: {}]   ;;  %s2803_s2 = inlined_call_operand.vmem [shape: f32[1,64], index: 2, kind: input, shape index: {}]   ;;  %s2804_s3 = inlined_call_operand.vmem [shape: bf16[64,192], index: 3, kind: input, shape index: {}]   ;;  %s2805_s4 = inlined_call_operand.vmem [shape: bf16[64,64], index: 4, kind: input, shape index: {}]   ;;  %s2806_s5 = inlined_call_operand.vmem [shape: f32[1,64], index: 5, kind: input, shape index: {}]   ;;  %s2807_s6 = inlined_call_operand.vmem [shape: f32[1,64], index: 6, kind: input, shape index: {}]   ;;  %s2808_s7 = inlined_call_operand.vmem [shape: f32[1,64], index: 7, kind: input, shape index: {}]   ;;  %s2809_s8 = inlined_call_operand.vmem [shape: bf16[64,128], index: 8, kind: input, shape index: {}]   ;;  %s2810_s9 = inlined_call_operand.vmem [shape: f32[1,128], index: 9, kind: input, shape index: {}]   ;;  %s2811_s10 = inlined_call_operand.vmem [shape: bf16[128,64], index: 10, kind: input, shape index: {}]   ;;  %s2812_s11 = inlined_call_operand.vmem [shape: f32[1,64], index: 11, kind: input, shape index: {}]   ;;  %s2813_s12 = inlined_call_operand.vmem [shape: f32[2,32,64], index: 12, kind: output, shape index: {}]  }
   0x1 LB: > { %s1998_s22 = sadd.s32 4294967295, %s2412_s21   ;;  %p2002_p0 = scmp.ge.s32.totalorder %s2412_s21, 1  ;;  %s2412_s21 = sphi %s2487_s21, %s22_s21  }
   0x2   : > { %p362_p1 = scmp.lt.s32.totalorder %s2412_s21, 3 }
   0x4   : > { %p363_p2 = pnand %p2002_p0, %p362_p1 }
   0x5   : > { %p404_p3 = scmp.lt.s32.totalorder (!%p363_p2), %s1998_s22, 1  ;;  %vm421_vm0 = vcmask (!%p363_p2), 523264   ;;  %v2286_v28 = vld [vmem:[%s2804_s3 + $0x4] ss:$8 sps:$4 sm:$0xff] (!%p363_p2)   ;;  %v2288_v29 = vld [vmem:[%s2804_s3] ss:$8 sps:$4 sm:$0xff] (!%p363_p2)  }
   0x6   : > { %366 = sbr.rel (%p363_p2) target bundleno = 3300 (0xce4), region = 68  ;;  %551 = vmatprep.subr.bf16.mxu1 (!%p363_p2), %v2286_v28  ;;  %v2289_v30 = vld [vmem:[%s2804_s3 + $0x14] ss:$8 sps:$4 sm:$0xff] (!%p363_p2)   ;;  %v2291_v31 = vld [vmem:[%s2804_s3 + $0x10] ss:$8 sps:$4 sm:$0xff] (!%p363_p2)   ;;  %v2414_v36 = vmov (!%p363_p2), 0  }
   0x7   : > { %552 = vmatpush1.bf16.msra.mxu1 (!%p363_p2), %v2288_v29  ;;  %v2292_v32 = vld [vmem:[%s2804_s3 + $0x24] ss:$8 sps:$4 sm:$0xff] (!%p363_p2)   ;;  %v2294_v33 = vld [vmem:[%s2804_s3 + $0x20] ss:$8 sps:$4 sm:$0xff] (!%p363_p2)   ;;  %v2295_v34 = vld [vmem:[%s2804_s3 + $0x34] ss:$8 sps:$4 sm:$0xff] (!%p363_p2)   ;;  %583 = vmatprep.mubr.bf16.mxu1 (!%p363_p2), %v2414_v36 }
   0x8   : > { %553 = vmatprep.subr.bf16.mxu1 (!%p363_p2), %v2289_v30  ;;  %v2297_v35 = vld [vmem:[%s2804_s3 + $0x30] ss:$8 sps:$4 sm:$0xff] (!%p363_p2)   ;;  %v2007_v51 = vld [vmem:[%s2802_s1] ss:$0 sm:$0xff] (!%p363_p2)  ;;  %vm612_vm1 = vcmask (!%p363_p2), 130048   ;;  %s2415_s15 = smov (!%p363_p2), 64  }
   0x9   : > { %v2008_v56 = vld [vmem:[%s2803_s2] ss:$0 sm:$0xff] (!%p363_p2)  ;;  %s2416_s16 = smov (!%p363_p2), 112   ;;  %s2417_s17 = smov (!%p363_p2), 48   ;;  %vm678_vm2 = vcmask (!%p363_p2), 261120  }
   0xa   : > { %s2418_s18 = smov (!%p363_p2), 96   ;;  %s2419_s19 = smov (!%p363_p2), 16  }
   0xb   : > { %554 = vmatpush1.bf16.msra.mxu1 (!%p363_p2), %v2291_v31  ;;  %s2420_s20 = smov (!%p363_p2), 80   ;;  %s2421_s24 = smov (!%p363_p2), 32  }
   0xc   : > { %555 = vmatprep.subr.bf16.mxu1 (!%p363_p2), %v2292_v32 }
   0xd   : > { %s2815_s22 = smov (!%p404_p3, %s1998_s22), 1 }
   0xe   : > { %s2068_s23 = sshll.u32 %s2815_s22, 5 }
   0xf   : > { %s2503_s26 = scalar_lea.vmem %s2801_s0, %s2068_s23  ;;  %556 = vmatpush1.bf16.msra.mxu1 %v2294_v33 }
  0x10   : > { %v415_v0 = vld [vmem:[%s2503_s26] sm:$0xff]  ;;  %v417_v1 = vld [vmem:[%s2503_s26 + $0x10] sm:$0xff]  ;;  %v416_v2 = vld [vmem:[%s2503_s26 + $0x8] sm:$0xff]  ;;  %557 = vmatprep.subr.bf16.mxu1 %v2295_v34 }
  0x11   : > { %v422_v3 = vsel %vm421_vm0, %v415_v0, 0.0  ;;  %v428_v4 = vsel %vm421_vm0, %v417_v1, 0.0  ;;  %v418_v5 = vld [vmem:[%s2503_s26 + $0x18] sm:$0xff]  ;;  %v425_v6 = vsel %vm421_vm0, %v416_v2, 0.0 }
  0x12   : > { %423 = vadd.xlane.f32.xlu0 %v422_v3  ;;  %429 = vadd.xlane.f32.xlu1 %v428_v4  ;;  %v431_v7 = vsel %vm421_vm0, %v418_v5, 0.0 }
  0x13   : > { %558 = vmatpush1.bf16.msra.mxu1 %v2297_v35 }
  0x16   : > { %426 = vadd.xlane.f32.xlu0 %v425_v6  ;;  %432 = vadd.xlane.f32.xlu1 %v431_v7 }
  0x9f   : > { %v424_v8 = vpop.xlane.xlu0 %423  ;;  %v430_v9 = vpop.xlane.xlu1 %429 }
  0xa0   : > { %v435_v10 = vmul.f32 0.015625, %v424_v8  ;;  %v437_v11 = vmul.f32 0.015625, %v430_v9 }
  0xa2   : > { %v439_v12 = vsub.f32 %v415_v0, %v435_v10  ;;  %v2513_v13 = vsub.f32 %v417_v1, %v437_v11 }
  0xa3   : > { %v427_v14 = vpop.xlane.xlu0 %426  ;;  %v433_v15 = vpop.xlane.xlu1 %432 }
  0xa4   : > { %v436_v16 = vmul.f32 0.015625, %v427_v14  ;;  %v438_v17 = vmul.f32 0.015625, %v433_v15  ;;  %v443_v18 = vmul.f32 %v439_v12, %v439_v12  ;;  %v445_v19 = vmul.f32 %v2513_v13, %v2513_v13 }
  0xa6   : > { %v440_v20 = vsub.f32 %v416_v2, %v436_v16  ;;  %v442_v21 = vsub.f32 %v418_v5, %v438_v17  ;;  %v447_v22 = vsel %vm421_vm0, %v443_v18, 0.0  ;;  %v453_v23 = vsel %vm421_vm0, %v445_v19, 0.0 }
  0xa7   : > { %448 = vadd.xlane.f32.xlu0 %v447_v22 }
  0xa8   : > { %v444_v24 = vmul.f32 %v440_v20, %v440_v20  ;;  %v446_v25 = vmul.f32 %v442_v21, %v442_v21 }
  0xaa   : > { %v450_v26 = vsel %vm421_vm0, %v444_v24, 0.0  ;;  %v456_v27 = vsel %vm421_vm0, %v446_v25, 0.0 }
  0xab   : > { %454 = vadd.xlane.f32.xlu0 %v453_v23  ;;  %451 = vadd.xlane.f32.xlu1 %v450_v26 }
  0xaf   : > { %457 = vadd.xlane.f32.xlu1 %v456_v27 }
 0x134   : > { %v449_v37 = vpop.xlane.xlu0 %448 }
 0x135   : > { %v459_v38 = vmul.f32 0.015625, %v449_v37 }
 0x137   : > { %v463_v39 = vadd.f32 1e-05, %v459_v38 }
 0x138   : > { %v452_v40 = vpop.xlane.xlu1 %451  ;;  %v455_v41 = vpop.xlane.xlu0 %454 }
 0x139   : > { %2314 = vrsqrt.f32 %v463_v39  ;;  %v460_v42 = vmul.f32 0.015625, %v452_v40  ;;  %v461_v43 = vmul.f32 0.015625, %v455_v41 }
 0x13b   : > { %v464_v44 = vadd.f32 1e-05, %v460_v42  ;;  %v465_v45 = vadd.f32 1e-05, %v461_v43 }
 0x13c   : > { %v458_v46 = vpop.xlane.xlu1 %457 }
 0x13d   : > { %2316 = vrsqrt.f32 %v464_v44  ;;  %v462_v47 = vmul.f32 0.015625, %v458_v46 }
 0x13e   : > { %2318 = vrsqrt.f32 %v465_v45 }
 0x13f   : > { %v466_v48 = vadd.f32 1e-05, %v462_v47 }
 0x141   : > { %2320 = vrsqrt.f32 %v466_v48 }
 0x143   : > { %v2315_v49 = vpop.eup %2314 }
 0x144   : > { %v471_v50 = vmul.f32 %v2315_v49, %v439_v12 }
 0x146   : > { %v481_v54 = vmul.f32 %v2007_v51, %v471_v50 }
 0x147   : > { %v2317_v52 = vpop.eup %2316 }
 0x148   : > { %v472_v53 = vmul.f32 %v2317_v52, %v440_v20  ;;  %v2319_v55 = vpop.eup %2318  ;;  %v491_v61 = vadd.f32 %v2008_v56, %v481_v54 }
 0x149   : > { %v473_v59 = vmul.f32 %v2319_v55, %v2513_v13 }
 0x14a   : > { %v482_v57 = vmul.f32 %v2007_v51, %v472_v53 }
 0x14b   : > { %v2321_v58 = vpop.eup %2320  ;;  %v483_v1 = vmul.f32 %v2007_v51, %v473_v59 }
 0x14c   : > { %v474_v60 = vmul.f32 %v2321_v58, %v442_v21  ;;  %v492_v62 = vadd.f32 %v2008_v56, %v482_v57 }
 0x14d   : > { %v493_v3 = vadd.f32 %v2008_v56, %v483_v1 }
 0x14e   : > { %v495_v63 = vpack.c.bf16 %v492_v62, %v491_v61  ;;  %v484_v0 = vmul.f32 %v2007_v51, %v474_v60 }
 0x150   : > { %2017 = vmatmul.mubr.msk.bf16.vlgmr.msra.gmra.mrb[0].mxu1 %vm421_vm0, %v495_v63  ;;  %v494_v2 = vadd.f32 %v2008_v56, %v484_v0 }
 0x151   : > { %593 = vmatprep.mubr.bf16.mxu1 %v2414_v36 }
 0x152   : > { %v496_v4 = vpack.c.bf16 %v494_v2, %v493_v3 }
 0x158   : > { %2018 = vmatmul.mubr.msk.bf16.gmra.mrb[4].mxu1 %vm421_vm0, %v496_v4 }
 0x223   : > { %v585_v5 = vpop.f32.mrb[0].mxu1 }
 0x224   : > { %v587_v6 = vpop.f32.mrb[1].mxu1 }
 0x225   : > { %v589_v7 = vpop.f32.mrb[2].mxu1 }
 0x226   : > { %v2554_v8 = vpack.c.bf16 %v589_v7, %v585_v5  ;;  %v591_v9 = vpop.f32.mrb[3].mxu1 }
 0x227   : > { %v2556_v10 = vpack.c.bf16 %v591_v9, %v587_v6 }
 0x228   : > { %608 = vrot.lane.b32.xlu0 %v2554_v8, %s2415_s15  ;;  %2134 = vmatprep.mubr.msk.bf16.mxu1 %vm612_vm1, %v2554_v8 }
 0x22b   : > { %v595_v11 = vpop.f32.mrb[4].mxu1 }
 0x22c   : > { %786 = vrot.lane.b32.xlu0 %v2554_v8, %s2416_s16  ;;  %v597_v12 = vpop.f32.mrb[5].mxu1 }
 0x22d   : > { %v599_v13 = vpop.f32.mrb[6].mxu1 }
 0x22e   : > { %v2563_v14 = vpack.c.bf16 %v599_v13, %v595_v11  ;;  %v601_v15 = vpop.f32.mrb[7].mxu1 }
 0x22f   : > { %v2565_v16 = vpack.c.bf16 %v601_v15, %v597_v12 }
 0x230   : > { %610 = vrot.lane.b32.xlu1 %v2563_v14, %s2415_s15 }
 0x234   : > { %790 = vrot.lane.b32.xlu1 %v2554_v8, %s2417_s17 }
 0x238   : > { %792 = vrot.lane.b32.xlu1 %v2563_v14, %s2417_s17 }
 0x23c   : > { %788 = vrot.lane.b32.xlu1 %v2563_v14, %s2416_s16 }
 0x29a   : > { %v609_v17 = vpop.permute.xlu0 %608 }
 0x29b   : > { %v620_v18 = vsel %vm612_vm1, %v609_v17, 0  ;;  %2262 = vmatprep.subr.msk.bf16.mxu1 %vm612_vm1, %v609_v17 }
 0x29c   : > { %2131 = vmatpush3.bf16.xpose.msra.mxu1 %v620_v18 }
 0x29e   : > { %v787_v19 = vpop.permute.xlu0 %786 }
 0x29f   : > { %2150 = vmatprep.mubr.msk.bf16.mxu0 %vm612_vm1, %v787_v19 }
 0x2a2   : > { %v611_v20 = vpop.permute.xlu1 %610 }
 0x2a3   : > { %v623_v21 = vsel %vm612_vm1, %v611_v20, 0  ;;  %2263 = vmatprep.subr.msk.bf16.mxu1 %vm612_vm1, %v611_v20 }
 0x2a4   : > { %2133 = vmatpush3.bf16.xpose.msra.mxu1 %v623_v21 }
 0x2a5   : > { %2138 = vmatprep.subr.bf16.mxu1 %v2556_v10 }
 0x2a6   : > { %v791_v22 = vpop.permute.xlu1 %790 }
 0x2a7   : > { %2264 = vmatprep.subr.msk.bf16.mxu0 %vm612_vm1, %v791_v22  ;;  %v801_v23 = vsel %vm612_vm1, %v791_v22, 0 }
 0x2a8   : > { %2147 = vmatpush3.bf16.xpose.msra.mxu0 %v801_v23 }
 0x2aa   : > { %v793_v24 = vpop.permute.xlu1 %792 }
 0x2ab   : > { %2135 = vmatmul.mubr.msk.bf16.vlgmr.msra.gmra.mrb[8].mxu1 %vm612_vm1, %v2563_v14  ;;  %2265 = vmatprep.subr.msk.bf16.mxu0 %vm612_vm1, %v793_v24  ;;  %v804_v25 = vsel %vm612_vm1, %v793_v24, 0 }
 0x2ac   : > { %2139 = vmatpush3.bf16.msra.mxu1 %v2556_v10 }
 0x2ad   : > { %2140 = vmatprep.subr.bf16.mxu1 %v2565_v16 }
 0x2ae   : > { %v789_v26 = vpop.permute.xlu1 %788 }
 0x2b0   : > { %2141 = vmatpush3.bf16.msra.mxu1 %v2565_v16  ;;  %2149 = vmatpush3.bf16.xpose.msra.mxu0 %v804_v25 }
 0x2b7   : > { %2151 = vmatmul.mubr.msk.bf16.vlgmr.msra.gmra.mrb[0].mxu0 %vm612_vm1, %v789_v26 }
 0x37e   : > { %v2136_v27 = vpop.f32.mrb[8].mxu1 }
 0x37f   : > { %v659_v28 = vpop.f32.mrb[9].mxu1  ;;  %v676_v32 = vmul.f32 0.25, %v2136_v27 }
 0x380   : > { %v674_v29 = vmul.f32 0.25, %v659_v28  ;;  %v2137_v30 = vpop.f32.mrb[10].mxu1 }
 0x381   : > { %v662_v31 = vpop.f32.mrb[11].mxu1  ;;  %v677_v36 = vmul.f32 0.25, %v2137_v30  ;;  %v685_v37 = vsel %vm678_vm2, %v676_v32, -inf }
 0x382   : > { %v675_v33 = vmul.f32 0.25, %v662_v31  ;;  %v679_v34 = vsel %vm678_vm2, %v674_v29, -inf }
 0x383   : > { %680 = vmax.xlane.f32.xlu0 %v679_v34  ;;  %v688_v39 = vsel %vm678_vm2, %v677_v36, -inf }
 0x384   : > { %v682_v35 = vsel %vm678_vm2, %v675_v33, -inf }
 0x385   : > { %683 = vmax.xlane.f32.xlu1 %v682_v35 }
 0x387   : > { %686 = vmax.xlane.f32.xlu0 %v685_v37 }
 0x38a   : > { %v2152_v38 = vpop.f32.mrb[0].mxu0 }
 0x38b   : > { %689 = vmax.xlane.f32.xlu0 %v688_v39  ;;  %v840_v40 = vpop.f32.mrb[1].mxu0  ;;  %v857_v44 = vmul.f32 0.25, %v2152_v38 }
 0x38c   : > { %v855_v41 = vmul.f32 0.25, %v840_v40  ;;  %v2153_v42 = vpop.f32.mrb[2].mxu0 }
 0x38d   : > { %v843_v43 = vpop.f32.mrb[3].mxu0  ;;  %v858_v47 = vmul.f32 0.25, %v2153_v42  ;;  %v865_v49 = vsel %vm678_vm2, %v857_v44, -inf }
 0x38e   : > { %v2592_v45 = vmul.f32 0.25, %v843_v43  ;;  %v859_v46 = vsel %vm678_vm2, %v855_v41, -inf }
 0x38f   : > { %860 = vmax.xlane.f32.xlu0 %v859_v46  ;;  %v868_v50 = vsel %vm678_vm2, %v858_v47, -inf }
 0x390   : > { %v862_v48 = vsel %vm678_vm2, %v2592_v45, -inf }
 0x391   : > { %863 = vmax.xlane.f32.xlu1 %v862_v48 }
 0x393   : > { %866 = vmax.xlane.f32.xlu0 %v865_v49 }
 0x395   : > { %869 = vmax.xlane.f32.xlu1 %v868_v50 }
 0x410   : > { %v681_v51 = vpop.xlane.xlu0 %680 }
 0x411   : > { %v691_v60 = vsub.f32 %v674_v29, %v681_v51 }
 0x412   : > { %v684_v57 = vpop.xlane.xlu1 %683 }
 0x413   : > { %v692_v63 = vsub.f32 %v675_v33, %v684_v57  ;;  %v695_v1 = vmul.f32 1.442695, %v691_v60 }
 0x414   : > { %v687_v52 = vpop.xlane.xlu0 %686 }
 0x415   : > { %v693_v53 = vsub.f32 %v676_v32, %v687_v52  ;;  %v697_v9 = vmul.f32 1.442695, %v692_v63 }
 0x417   : > { %v699_v54 = vmul.f32 1.442695, %v693_v53 }
 0x418   : > { %v690_v55 = vpop.xlane.xlu0 %689 }
 0x419   : > { %2322 = vpow2.f32 %v699_v54  ;;  %v694_v56 = vsub.f32 %v677_v36, %v690_v55 }
 0x41b   : > { %v701_v58 = vmul.f32 1.442695, %v694_v56 }
 0x41c   : > { %v861_v59 = vpop.xlane.xlu0 %860 }
 0x41d   : > { %2324 = vpow2.f32 %v701_v58  ;;  %v871_v4 = vsub.f32 %v855_v41, %v861_v59 }
 0x41e   : > { %v864_v61 = vpop.xlane.xlu1 %863 }
 0x41f   : > { %v875_v13 = vmul.f32 1.442695, %v871_v4  ;;  %v872_v27 = vsub.f32 %v2592_v45, %v864_v61 }
 0x420   : > { %v867_v62 = vpop.xlane.xlu0 %866 }
 0x421   : > { %v873_v0 = vsub.f32 %v857_v44, %v867_v62  ;;  %v877_v28 = vmul.f32 1.442695, %v872_v27 }
 0x422   : > { %v870_v2 = vpop.xlane.xlu1 %869 }
 0x423   : > { %v2599_v3 = vpop.eup %2322  ;;  %v879_v5 = vmul.f32 1.442695, %v873_v0  ;;  %v874_v6 = vsub.f32 %v858_v47, %v870_v2 }
 0x424   : > { %v709_v7 = vsel %vm678_vm2, %v2599_v3, 0.0 }
 0x425   : > { %2326 = vpow2.f32 %v879_v5  ;;  %v881_v11 = vmul.f32 1.442695, %v874_v6  ;;  %710 = vadd.xlane.f32.xlu0 %v709_v7  ;;  %v2298_v7 = vld [vmem:[%s2805_s4 + $0x8] sm:$0xff]  }
 0x426   : > { %2328 = vpow2.f32 %v695_v1  ;;  %2162 = vmatprep.subr.bf16.mxu0 %v2298_v7 }
 0x427   : > { %v2325_v12 = vpop.eup %2324  ;;  %2330 = vpow2.f32 %v881_v11  ;;  %2163 = vmatpush3.bf16.msra.mxu0 %v2298_v7 }
 0x428   : > { %v712_v15 = vsel %vm678_vm2, %v2325_v12, 0.0  ;;  %2332 = vpow2.f32 %v697_v9  ;;  %v2299_v9 = vld [vmem:[%s2805_s4] sm:$0xff]  }
 0x429   : > { %713 = vadd.xlane.f32.xlu1 %v712_v15  ;;  %2334 = vpow2.f32 %v875_v13  ;;  %2168 = vmatprep.subr.bf16.mxu0 %v2299_v9 }
 0x42a   : > { %2336 = vpow2.f32 %v877_v28 }
 0x42f   : > { %v2604_v17 = vpop.eup %2326 }
 0x430   : > { %v2329_v18 = vpop.eup %2328  ;;  %v889_v19 = vsel %vm678_vm2, %v2604_v17, 0.0 }
 0x431   : > { %v2608_v20 = vpop.eup %2330  ;;  %890 = vadd.xlane.f32.xlu0 %v889_v19  ;;  %v703_v23 = vsel %vm678_vm2, %v2329_v18, 0.0 }
 0x432   : > { %v892_v21 = vsel %vm678_vm2, %v2608_v20, 0.0  ;;  %v2333_v22 = vpop.eup %2332 }
 0x433   : > { %893 = vadd.xlane.f32.xlu1 %v892_v21  ;;  %v2613_v24 = vpop.eup %2334  ;;  %v706_v25 = vsel %vm678_vm2, %v2333_v22, 0.0 }
 0x434   : > { %v883_v26 = vsel %vm678_vm2, %v2613_v24, 0.0  ;;  %v2337_v29 = vpop.eup %2336 }
 0x435   : > { %704 = vadd.xlane.f32.xlu0 %v703_v23  ;;  %v886_v30 = vsel %vm678_vm2, %v2337_v29, 0.0 }
 0x437   : > { %707 = vadd.xlane.f32.xlu1 %v706_v25 }
 0x439   : > { %884 = vadd.xlane.f32.xlu0 %v883_v26 }
 0x448   : > { %909 = vrot.lane.b32.xlu1 %v2565_v16, %s2416_s16 }
 0x44f   : > { %907 = vrot.lane.b32.xlu0 %v2556_v10, %s2416_s16 }
 0x453   : > { %1094 = vrot.lane.b32.xlu0 %v2554_v8, %s2418_s18 }
 0x457   : > { %1347 = vrot.lane.b32.xlu0 %v2554_v8, %s2419_s19 }
 0x45b   : > { %1343 = vrot.lane.b32.xlu0 %v2554_v8, %s2420_s20 }
 0x46c   : > { %887 = vadd.xlane.f32.xlu1 %v886_v30 }
 0x47d   : > { %1098 = vrot.lane.b32.xlu1 %v2554_v8, %s2421_s24 }
 0x481   : > { %1100 = vrot.lane.b32.xlu1 %v2563_v14, %s2421_s24  ;;  %s413_s24 = scalar_lea.vmem %s2813_s12, %s2068_s23 }
 0x485   : > { %1096 = vrot.lane.b32.xlu1 %v2563_v14, %s2418_s18 }
 0x489   : > { %1349 = vrot.lane.b32.xlu1 %v2563_v14, %s2419_s19 }
 0x48d   : > { %1345 = vrot.lane.b32.xlu1 %v2563_v14, %s2420_s20 }
 0x4b2   : > { %v711_v31 = vpop.xlane.xlu0 %710 }
 0x4b6   : > { %v714_v32 = vpop.xlane.xlu1 %713 }
 0x4b7   : > { %2338 = vrcp.f32 %v714_v32 }
 0x4be   : > { %v891_v33 = vpop.xlane.xlu0 %890 }
 0x4c0   : > { %v894_v34 = vpop.xlane.xlu1 %893 }
 0x4c1   : > { %v2339_v38 = vpop.eup %2338 }
 0x4c2   : > { %v705_v35 = vpop.xlane.xlu0 %704  ;;  %v722_v42 = vmul.f32 %v2339_v38, %v2325_v12 }
 0x4c3   : > { %2340 = vrcp.f32 %v705_v35 }
 0x4c4   : > { %2342 = vrcp.f32 %v711_v31  ;;  %v708_v36 = vpop.xlane.xlu1 %707 }
 0x4c5   : > { %2344 = vrcp.f32 %v708_v36 }
 0x4c6   : > { %v885_v8 = vpop.xlane.xlu0 %884  ;;  %2346 = vrcp.f32 %v894_v34 }
 0x4c7   : > { %2348 = vrcp.f32 %v885_v8 }
 0x4c8   : > { %v910_v47 = vpop.permute.xlu1 %909  ;;  %2350 = vrcp.f32 %v891_v33 }
 0x4ca   : > { %v908_v37 = vpop.permute.xlu0 %907 }
 0x4cb   : > { %2154 = vmatprep.subr.bf16.mxu1 %v908_v37 }
 0x4cd   : > { %v2341_v39 = vpop.eup %2340 }
 0x4ce   : > { %v2343_v40 = vpop.eup %2342  ;;  %v719_v43 = vmul.f32 %v2341_v39, %v2329_v18  ;;  %v1095_v60 = vpop.permute.xlu0 %1094 }
 0x4cf   : > { %v2345_v41 = vpop.eup %2344  ;;  %v721_v44 = vmul.f32 %v2343_v40, %v2599_v3 }
 0x4d0   : > { %v720_v14 = vmul.f32 %v2345_v41, %v2333_v22  ;;  %v2347_v50 = vpop.eup %2346 }
 0x4d1   : > { %v724_v46 = vpack.c.bf16 %v722_v42, %v721_v44  ;;  %v2349_v51 = vpop.eup %2348  ;;  %v902_v54 = vmul.f32 %v2347_v50, %v2608_v20 }
 0x4d2   : > { %v723_v45 = vpack.c.bf16 %v720_v14, %v719_v43  ;;  %v2351_v52 = vpop.eup %2350  ;;  %v899_v55 = vmul.f32 %v2349_v51, %v2613_v24  ;;  %v1348_v0 = vpop.permute.xlu0 %1347 }
 0x4d3   : > { %v901_v57 = vmul.f32 %v2351_v52, %v2604_v17  ;;  %v1358_v2 = vsel %vm612_vm1, %v1348_v0, 0 }
 0x4d4   : > { %2142 = vmatprep.mubr.msk.bf16.mxu1 %vm678_vm2, %v723_v45 }
 0x4d5   : > { %2143 = vmatmul.mubr.msk.bf16.vlgmr.msra.gmra.mrb[12].mxu1 %vm678_vm2, %v724_v46  ;;  %v904_v59 = vpack.c.bf16 %v902_v54, %v901_v57 }
 0x4d6   : > { %2155 = vmatpush3.bf16.msra.mxu1 %v908_v37  ;;  %v1344_v3 = vpop.permute.xlu0 %1343 }
 0x4d7   : > { %2156 = vmatprep.subr.bf16.mxu1 %v910_v47 }
 0x4da   : > { %2157 = vmatpush3.bf16.msra.mxu1 %v910_v47 }
 0x4f9   : > { %v888_v48 = vpop.xlane.xlu1 %887 }
 0x4fa   : > { %2352 = vrcp.f32 %v888_v48 }
 0x4fd   : > { %v1099_v49 = vpop.permute.xlu1 %1098 }
 0x4fe   : > { %2266 = vmatprep.subr.msk.bf16.mxu1 %vm612_vm1, %v1099_v49  ;;  %v1109_v61 = vsel %vm612_vm1, %v1099_v49, 0 }
 0x501   : > { %v1101_v62 = vpop.permute.xlu1 %1100 }
 0x502   : > { %v1112_v63 = vsel %vm612_vm1, %v1101_v62, 0 }
 0x504   : > { %v2353_v53 = vpop.eup %2352 }
 0x505   : > { %v900_v56 = vmul.f32 %v2353_v53, %v2337_v29  ;;  %v1097_v1 = vpop.permute.xlu1 %1096 }
 0x507   : > { %v903_v58 = vpack.c.bf16 %v900_v56, %v899_v55 }
 0x509   : > { %2158 = vmatprep.mubr.msk.bf16.mxu1 %vm678_vm2, %v903_v58  ;;  %v1350_v4 = vpop.permute.xlu1 %1349 }
 0x50a   : > { %2159 = vmatmul.mubr.msk.bf16.vlgmr.msra.gmra.mrb[16].mxu1 %vm678_vm2, %v904_v59  ;;  %v1361_v5 = vsel %vm612_vm1, %v1350_v4, 0 }
 0x50b   : > { %2175 = vmatpush3.bf16.xpose.msra.mxu1 %v1109_v61  ;;  %2178 = vmatprep.mubr.msk.bf16.mxu1 %vm612_vm1, %v1095_v60 }
 0x50c   : > { %2267 = vmatprep.subr.msk.bf16.mxu1 %vm612_vm1, %v1101_v62 }
 0x50d   : > { %v1346_v6 = vpop.permute.xlu1 %1345 }
 0x513   : > { %2177 = vmatpush3.bf16.xpose.msra.mxu1 %v1112_v63 }
 0x514   : > { %2268 = vmatprep.subr.msk.bf16.mxu1 %vm612_vm1, %v1348_v0 }
 0x51a   : > { %2179 = vmatmul.mubr.msk.bf16.vlgmr.msra.gmra.mrb[20].mxu1 %vm612_vm1, %v1097_v1 }
 0x51b   : > { %2197 = vmatpush3.bf16.xpose.msra.mxu1 %v1358_v2  ;;  %2200 = vmatprep.mubr.msk.bf16.mxu1 %vm612_vm1, %v1344_v3 }
 0x51c   : > { %2269 = vmatprep.subr.msk.bf16.mxu1 %vm612_vm1, %v1350_v4 }
 0x523   : > { %2199 = vmatpush3.bf16.xpose.msra.mxu1 %v1361_v5 }
 0x52a   : > { %2201 = vmatmul.mubr.msk.bf16.vlgmr.msra.gmra.mrb[24].mxu1 %vm612_vm1, %v1346_v6 }
 0x5a8   : > { %v2144_v11 = vpop.f32.mrb[12].mxu1 }
 0x5a9   : > { %v767_v12 = vpop.f32.mrb[13].mxu1 }
 0x5aa   : > { %v2145_v13 = vpop.f32.mrb[14].mxu1 }
 0x5ab   : > { %v783_v15 = vpack.c.bf16 %v2145_v13, %v2144_v11  ;;  %v770_v17 = vpop.f32.mrb[15].mxu1 }
 0x5ac   : > { %v782_v18 = vpack.c.bf16 %v770_v17, %v767_v12 }
 0x5dd   : > { %v2160_v19 = vpop.f32.mrb[16].mxu1 }
 0x5de   : > { %v953_v20 = vpop.f32.mrb[17].mxu1 }
 0x5df   : > { %v2161_v21 = vpop.f32.mrb[18].mxu1 }
 0x5e0   : > { %v969_v22 = vpack.c.bf16 %v2161_v21, %v2160_v19  ;;  %v956_v23 = vpop.f32.mrb[19].mxu1 }
 0x5e1   : > { %v968_v24 = vpack.c.bf16 %v956_v23, %v953_v20 }
 0x5e3   : > { %2164 = vmatprep.mubr.msk.bf16.mxu0 %vm612_vm1, %v968_v24 }
 0x5e4   : > { %2165 = vmatmul.mubr.msk.bf16.vlgmr.msra.gmra.mrb[4].mxu0 %vm612_vm1, %v969_v22 }
 0x5e5   : > { %2170 = vmatprep.mubr.msk.bf16.mxu0 %vm612_vm1, %v782_v18  ;;  %2169 = vmatpush3.bf16.msra.mxu0 %v2299_v9 }
 0x5ed   : > { %v2180_v25 = vpop.f32.mrb[20].mxu1 }
 0x5ee   : > { %v1148_v26 = vpop.f32.mrb[21].mxu1  ;;  %v1165_v30 = vmul.f32 0.25, %v2180_v25 }
 0x5ef   : > { %v1163_v27 = vmul.f32 0.25, %v1148_v26  ;;  %v2181_v28 = vpop.f32.mrb[22].mxu1 }
 0x5f0   : > { %v1151_v29 = vpop.f32.mrb[23].mxu1  ;;  %2171 = vmatmul.mubr.msk.bf16.vlgmr.msra.gmra.mrb[4].mxu0 %vm612_vm1, %v783_v15  ;;  %v1166_v34 = vmul.f32 0.25, %v2181_v28  ;;  %v1173_v35 = vsel %vm678_vm2, %v1165_v30, -inf }
 0x5f1   : > { %v1164_v31 = vmul.f32 0.25, %v1151_v29  ;;  %v1167_v32 = vsel %vm678_vm2, %v1163_v27, -inf }
 0x5f2   : > { %1168 = vmax.xlane.f32.xlu0 %v1167_v32  ;;  %v1176_v36 = vsel %vm678_vm2, %v1166_v34, -inf }
 0x5f3   : > { %v1170_v33 = vsel %vm678_vm2, %v1164_v31, -inf }
 0x5f4   : > { %1171 = vmax.xlane.f32.xlu1 %v1170_v33 }
 0x5f6   : > { %1174 = vmax.xlane.f32.xlu0 %v1173_v35 }
 0x5fa   : > { %1177 = vmax.xlane.f32.xlu0 %v1176_v36 }
 0x5fd   : > { %v2202_v8 = vpop.f32.mrb[24].mxu1 }
 0x5fe   : > { %v1397_v37 = vpop.f32.mrb[25].mxu1  ;;  %v1414_v60 = vmul.f32 0.25, %v2202_v8 }
 0x5ff   : > { %v2203_v38 = vpop.f32.mrb[26].mxu1  ;;  %v1412_v61 = vmul.f32 0.25, %v1397_v37 }
 0x600   : > { %v1400_v39 = vpop.f32.mrb[27].mxu1  ;;  %v1415_v63 = vmul.f32 0.25, %v2203_v38  ;;  %v1422_v0 = vsel %vm678_vm2, %v1414_v60, -inf }
 0x601   : > { %v1413_v59 = vmul.f32 0.25, %v1400_v39  ;;  %v1416_v1 = vsel %vm678_vm2, %v1412_v61, -inf }
 0x602   : > { %v1425_v2 = vsel %vm678_vm2, %v1415_v63, -inf }
 0x603   : > { %v1419_v62 = vsel %vm678_vm2, %v1413_v59, -inf }
 0x67f   : > { %v1169_v40 = vpop.xlane.xlu0 %1168 }
 0x680   : > { %v1179_v41 = vsub.f32 %v1163_v27, %v1169_v40 }
 0x681   : > { %v1172_v42 = vpop.xlane.xlu1 %1171 }
 0x682   : > { %v1183_v44 = vmul.f32 1.442695, %v1179_v41  ;;  %v1180_v45 = vsub.f32 %v1164_v31, %v1172_v42  ;;  %v2300_v42 = vld [vmem:[%s2805_s4 + $0x10] sm:$0xff]  }
 0x683   : > { %v1175_v43 = vpop.xlane.xlu0 %1174 }
 0x684   : > { %v1181_v14 = vsub.f32 %v1165_v30, %v1175_v43  ;;  %v1185_v49 = vmul.f32 1.442695, %v1180_v45 }
 0x686   : > { %v1187_v46 = vmul.f32 1.442695, %v1181_v14 }
 0x687   : > { %v1178_v47 = vpop.xlane.xlu0 %1177 }
 0x688   : > { %2354 = vpow2.f32 %v1187_v46  ;;  %v1182_v48 = vsub.f32 %v1166_v34, %v1178_v47 }
 0x689   : > { %2356 = vpow2.f32 %v1183_v44 }
 0x68a   : > { %v1189_v50 = vmul.f32 1.442695, %v1182_v48 }
 0x68c   : > { %2358 = vpow2.f32 %v1189_v50 }
 0x68d   : > { %2360 = vpow2.f32 %v1185_v49 }
 0x692   : > { %v2355_v51 = vpop.eup %2354 }
 0x693   : > { %v1197_v52 = vsel %vm678_vm2, %v2355_v51, 0.0  ;;  %v2357_v53 = vpop.eup %2356 }
 0x694   : > { %1198 = vadd.xlane.f32.xlu0 %v1197_v52  ;;  %v1191_v55 = vsel %vm678_vm2, %v2357_v53, 0.0 }
 0x696   : > { %v2359_v54 = vpop.eup %2358 }
 0x697   : > { %v1200_v56 = vsel %vm678_vm2, %v2359_v54, 0.0  ;;  %v2361_v57 = vpop.eup %2360 }
 0x698   : > { %1192 = vadd.xlane.f32.xlu0 %v1191_v55  ;;  %1201 = vadd.xlane.f32.xlu1 %v1200_v56  ;;  %v1194_v58 = vsel %vm678_vm2, %v2361_v57, 0.0 }
 0x69c   : > { %1195 = vadd.xlane.f32.xlu1 %v1194_v58 }
 0x6ad   : > { %1215 = vrot.lane.b32.xlu1 %v2565_v16, %s2418_s18 }
 0x6ae   : > { %1213 = vrot.lane.b32.xlu0 %v2556_v10, %s2418_s18 }
 0x6cd   : > { %1420 = vmax.xlane.f32.xlu0 %v1419_v62 }
 0x6d1   : > { %1423 = vmax.xlane.f32.xlu0 %v1422_v0  ;;  %1417 = vmax.xlane.f32.xlu1 %v1416_v1 }
 0x6d5   : > { %1426 = vmax.xlane.f32.xlu1 %v1425_v2 }
 0x721   : > { %v1199_v3 = vpop.xlane.xlu0 %1198 }
 0x725   : > { %v1202_v4 = vpop.xlane.xlu1 %1201  ;;  %v1193_v5 = vpop.xlane.xlu0 %1192 }
 0x726   : > { %2362 = vrcp.f32 %v1202_v4 }
 0x727   : > { %2364 = vrcp.f32 %v1193_v5 }
 0x728   : > { %2366 = vrcp.f32 %v1199_v3 }
 0x729   : > { %v1196_v6 = vpop.xlane.xlu1 %1195  ;;  %v1214_v7 = vpop.permute.xlu0 %1213 }
 0x72a   : > { %2368 = vrcp.f32 %v1196_v6  ;;  %2182 = vmatprep.subr.bf16.mxu0 %v1214_v7  ;;  %v2047_v6 = vld [vmem:[%s2806_s5] ss:$0 sm:$0xff] }
 0x72b   : > { %2183 = vmatpush3.bf16.msra.mxu0 %v1214_v7 }
 0x72d   : > { %v1216_v9 = vpop.permute.xlu1 %1215 }
 0x72e   : > { %2184 = vmatprep.subr.bf16.mxu0 %v1216_v9 }
 0x72f   : > { %2185 = vmatpush3.bf16.msra.mxu0 %v1216_v9  ;;  %v2402_v9 = vld [vmem:[%s2503_s26] sm:$0xff] }
 0x730   : > { %v2363_v11 = vpop.eup %2362  ;;  %2190 = vmatprep.subr.bf16.mxu0 %v2300_v42 }
 0x731   : > { %v2365_v12 = vpop.eup %2364  ;;  %v1210_v17 = vmul.f32 %v2363_v11, %v2359_v54 }
 0x732   : > { %v2367_v13 = vpop.eup %2366  ;;  %v1207_v18 = vmul.f32 %v2365_v12, %v2357_v53 }
 0x733   : > { %v1209_v20 = vmul.f32 %v2367_v13, %v2355_v51  ;;  %v2403_v13 = vld [vmem:[%s2503_s26 + $0x18] sm:$0xff] }
 0x734   : > { %v2369_v15 = vpop.eup %2368 }
 0x735   : > { %v1208_v19 = vmul.f32 %v2369_v15, %v2361_v57  ;;  %v1212_v22 = vpack.c.bf16 %v1210_v17, %v1209_v20 }
 0x737   : > { %v1211_v21 = vpack.c.bf16 %v1208_v19, %v1207_v18  ;;  %v2404_v18 = vld [vmem:[%s2503_s26 + $0x10] sm:$0xff] }
 0x739   : > { %2186 = vmatprep.mubr.msk.bf16.mxu0 %vm678_vm2, %v1211_v21  ;;  %v2405_v21 = vld [vmem:[%s2503_s26 + $0x8] sm:$0xff] }
 0x73a   : > { %2187 = vmatmul.mubr.msk.bf16.vlgmr.msra.gmra.mrb[8].mxu0 %vm678_vm2, %v1212_v22 }
 0x73b   : > { %2191 = vmatpush3.bf16.msra.mxu0 %v2300_v42 }
 0x75a   : > { %v1421_v23 = vpop.xlane.xlu0 %1420 }
 0x75b   : > { %v1429_v28 = vsub.f32 %v1413_v59, %v1421_v23 }
 0x75d   : > { %v1434_v33 = vmul.f32 1.442695, %v1429_v28 }
 0x75e   : > { %v1418_v24 = vpop.xlane.xlu1 %1417  ;;  %v1424_v25 = vpop.xlane.xlu0 %1423 }
 0x75f   : > { %v1428_v26 = vsub.f32 %v1412_v61, %v1418_v24  ;;  %v1430_v27 = vsub.f32 %v1414_v60, %v1424_v25  ;;  %v2301_v60 = vld [vmem:[%s2805_s4 + $0x18] sm:$0xff]  }
 0x761   : > { %v1436_v29 = vmul.f32 1.442695, %v1430_v27  ;;  %v1432_v30 = vmul.f32 1.442695, %v1428_v26 }
 0x762   : > { %v1427_v31 = vpop.xlane.xlu1 %1426 }
 0x763   : > { %v1431_v32 = vsub.f32 %v1415_v63, %v1427_v31  ;;  %2370 = vpow2.f32 %v1436_v29 }
 0x764   : > { %2372 = vpow2.f32 %v1432_v30 }
 0x765   : > { %v1438_v34 = vmul.f32 1.442695, %v1431_v32 }
 0x767   : > { %2374 = vpow2.f32 %v1438_v34 }
 0x768   : > { %2376 = vpow2.f32 %v1434_v33 }
 0x76d   : > { %v2371_v35 = vpop.eup %2370 }
 0x76e   : > { %v1446_v36 = vsel %vm678_vm2, %v2371_v35, 0.0  ;;  %v2373_v8 = vpop.eup %2372 }
 0x76f   : > { %1447 = vadd.xlane.f32.xlu0 %v1446_v36  ;;  %v1440_v40 = vsel %vm678_vm2, %v2373_v8, 0.0 }
 0x771   : > { %v2375_v37 = vpop.eup %2374 }
 0x772   : > { %v1449_v38 = vsel %vm678_vm2, %v2375_v37, 0.0  ;;  %v2377_v39 = vpop.eup %2376 }
 0x773   : > { %1450 = vadd.xlane.f32.xlu1 %v1449_v38  ;;  %1441 = vadd.xlane.f32.xlu0 %v1440_v40  ;;  %v1443_v41 = vsel %vm678_vm2, %v2377_v39, 0.0 }
 0x777   : > { %1444 = vadd.xlane.f32.xlu1 %v1443_v41 }
 0x788   : > { %1464 = vrot.lane.b32.xlu1 %v2565_v16, %s2420_s20 }
 0x789   : > { %1462 = vrot.lane.b32.xlu0 %v2556_v10, %s2420_s20 }
 0x7fc   : > { %v1448_v43 = vpop.xlane.xlu0 %1447 }
 0x800   : > { %v1451_v14 = vpop.xlane.xlu1 %1450  ;;  %v1442_v44 = vpop.xlane.xlu0 %1441 }
 0x801   : > { %2378 = vrcp.f32 %v1442_v44 }
 0x804   : > { %v1445_v45 = vpop.xlane.xlu1 %1444  ;;  %v1463_v46 = vpop.permute.xlu0 %1462 }
 0x805   : > { %2380 = vrcp.f32 %v1445_v45  ;;  %2204 = vmatprep.subr.bf16.mxu0 %v1463_v46 }
 0x806   : > { %2382 = vrcp.f32 %v1451_v14 }
 0x807   : > { %2384 = vrcp.f32 %v1448_v43 }
 0x808   : > { %v1465_v58 = vpop.permute.xlu1 %1464 }
 0x80b   : > { %v2379_v47 = vpop.eup %2378 }
 0x80c   : > { %v1456_v53 = vmul.f32 %v2379_v47, %v2373_v8 }
 0x80d   : > { %v2188_v48 = vpop.f32.mrb[8].mxu0 }
 0x80e   : > { %v1259_v49 = vpop.f32.mrb[9].mxu0 }
 0x80f   : > { %v2381_v50 = vpop.eup %2380  ;;  %v2189_v51 = vpop.f32.mrb[10].mxu0 }
 0x810   : > { %v1275_v52 = vpack.c.bf16 %v2189_v51, %v2188_v48  ;;  %v1262_v16 = vpop.f32.mrb[11].mxu0  ;;  %v1457_v54 = vmul.f32 %v2381_v50, %v2377_v39  ;;  %v2383_v56 = vpop.eup %2382  ;;  %v2302_v48 = vld [vmem:[%s2809_s8] sm:$0xff]   ;;  %v2304_v50 = vld [vmem:[%s2809_s8 + $0x10] sm:$0xff]   ;;  %v2305_v51 = vld [vmem:[%s2809_s8 + $0x18] sm:$0xff]  }
 0x811   : > { %v1274_v10 = vpack.c.bf16 %v1262_v16, %v1259_v49  ;;  %v2385_v57 = vpop.eup %2384  ;;  %v1459_v59 = vmul.f32 %v2383_v56, %v2375_v37  ;;  %2218 = vmatprep.subr.bf16.mxu1 %v2302_v48  ;;  %v2303_v49 = vld [vmem:[%s2809_s8 + $0x8] sm:$0xff]  }
 0x812   : > { %v1460_v55 = vpack.c.bf16 %v1457_v54, %v1456_v53  ;;  %v1458_v61 = vmul.f32 %v2385_v57, %v2371_v35  ;;  %2219 = vmatpush3.bf16.msra.mxu1 %v2302_v48 }
 0x813   : > { %2192 = vmatprep.mubr.msk.bf16.mxu0 %vm612_vm1, %v1274_v10  ;;  %2220 = vmatprep.subr.bf16.mxu1 %v2303_v49 }
 0x814   : > { %2193 = vmatmul.mubr.msk.bf16.vlgmr.msra.gmra.mrb[4].mxu0 %vm612_vm1, %v1275_v52  ;;  %v1461_v62 = vpack.c.bf16 %v1459_v59, %v1458_v61 }
 0x815   : > { %2205 = vmatpush3.bf16.msra.mxu0 %v1463_v46  ;;  %2208 = vmatprep.mubr.msk.bf16.mxu0 %vm678_vm2, %v1460_v55 }
 0x816   : > { %2206 = vmatprep.subr.bf16.mxu0 %v1465_v58  ;;  %2221 = vmatpush3.bf16.msra.mxu1 %v2303_v49 }
 0x817   : > { %2222 = vmatprep.subr.bf16.mxu1 %v2304_v50 }
 0x819   : > { %2207 = vmatpush3.bf16.msra.mxu0 %v1465_v58 }
 0x81a   : > { %2212 = vmatprep.subr.bf16.mxu0 %v2301_v60  ;;  %2223 = vmatpush3.bf16.msra.mxu1 %v2304_v50 }
 0x81b   : > { %2224 = vmatprep.subr.bf16.mxu1 %v2305_v51 }
 0x81c   : > { %2209 = vmatmul.mubr.msk.bf16.vlgmr.msra.gmra.mrb[12].mxu0 %vm678_vm2, %v1461_v62 }
 0x81d   : > { %2213 = vmatpush3.bf16.msra.mxu0 %v2301_v60 }
 0x81e   : > { %2225 = vmatpush3.bf16.msra.mxu1 %v2305_v51 }
 0x8ef   : > { %v2210_v63 = vpop.f32.mrb[12].mxu0 }
 0x8f0   : > { %v1508_v0 = vpop.f32.mrb[13].mxu0 }
 0x8f1   : > { %v2211_v1 = vpop.f32.mrb[14].mxu0 }
 0x8f2   : > { %v1524_v2 = vpack.c.bf16 %v2211_v1, %v2210_v63  ;;  %v1511_v3 = vpop.f32.mrb[15].mxu0  ;;  %v2048_v63 = vld [vmem:[%s2807_s6] ss:$0 sm:$0xff] }
 0x8f3   : > { %v1523_v4 = vpack.c.bf16 %v1511_v3, %v1508_v0 }
 0x8f5   : > { %2214 = vmatprep.mubr.msk.bf16.mxu0 %vm612_vm1, %v1523_v4  ;;  %v2049_v4 = vld [vmem:[%s2808_s7] ss:$0 sm:$0xff] }
 0x8f6   : > { %2215 = vmatmul.mubr.msk.bf16.vlgmr.msra.gmra.mrb[4].mxu0 %vm612_vm1, %v1524_v2 }
 0x9c9   : > { %v2216_v5 = vpop.f32.mrb[4].mxu0 }
 0x9ca   : > { %v1573_v7 = vpop.f32.mrb[5].mxu0  ;;  %v1594_v19 = vadd.f32 %v2404_v18, %v2216_v5 }
 0x9cb   : > { %v1592_v11 = vadd.f32 %v2402_v9, %v1573_v7  ;;  %v2217_v12 = vpop.f32.mrb[6].mxu0 }
 0x9cc   : > { %v1595_v15 = vadd.f32 %v2403_v13, %v2217_v12  ;;  %v1576_v17 = vpop.f32.mrb[7].mxu0  ;;  %v2719_v26 = vadd.f32 %v2047_v6, %v1594_v19 }
 0x9cd   : > { %v2710_v20 = vadd.f32 %v2047_v6, %v1592_v11  ;;  %v1593_v22 = vadd.f32 %v2405_v21, %v1576_v17 }
 0x9ce   : > { %v2713_v23 = vadd.f32 %v2047_v6, %v1595_v15  ;;  %v1615_v29 = vsel %vm421_vm0, %v2719_v26, 0.0 }
 0x9cf   : > { %v2715_v24 = vadd.f32 %v2047_v6, %v1593_v22  ;;  %v1609_v25 = vsel %vm421_vm0, %v2710_v20, 0.0 }
 0x9d0   : > { %1610 = vadd.xlane.f32.xlu1 %v1609_v25  ;;  %v1618_v28 = vsel %vm421_vm0, %v2713_v23, 0.0  ;;  %v2306_v25 = vld [vmem:[%s2811_s10] sm:$0xff]  }
 0x9d1   : > { %v1612_v27 = vsel %vm421_vm0, %v2715_v24, 0.0  ;;  %2230 = vmatprep.subr.bf16.mxu0 %v2306_v25 }
 0x9d2   : > { %1613 = vadd.xlane.f32.xlu0 %v1612_v27  ;;  %2231 = vmatpush3.bf16.msra.mxu0 %v2306_v25  ;;  %v2307_v27 = vld [vmem:[%s2811_s10 + $0x8] sm:$0xff]  }
 0x9d3   : > { %2232 = vmatprep.subr.bf16.mxu0 %v2307_v27 }
 0x9d4   : > { %1619 = vadd.xlane.f32.xlu1 %v1618_v28  ;;  %v2308_v28 = vld [vmem:[%s2811_s10 + $0x10] sm:$0xff]  }
 0x9d6   : > { %1616 = vadd.xlane.f32.xlu0 %v1615_v29  ;;  %2233 = vmatpush3.bf16.msra.mxu0 %v2307_v27  ;;  %v2309_v29 = vld [vmem:[%s2811_s10 + $0x18] sm:$0xff]  }
 0x9d7   : > { %2234 = vmatprep.subr.bf16.mxu0 %v2308_v28 }
 0x9da   : > { %2235 = vmatpush3.bf16.msra.mxu0 %v2308_v28 }
 0x9db   : > { %2236 = vmatprep.subr.bf16.mxu0 %v2309_v29 }
 0x9de   : > { %2237 = vmatpush3.bf16.msra.mxu0 %v2309_v29 }
 0xa5d   : > { %v1611_v30 = vpop.xlane.xlu1 %1610 }
 0xa5e   : > { %v1621_v31 = vmul.f32 0.015625, %v1611_v30  ;;  %v2310_v30 = vld [vmem:[%s2811_s10 + $0x20] sm:$0xff]  }
 0xa5f   : > { %v1614_v32 = vpop.xlane.xlu0 %1613  ;;  %2238 = vmatprep.subr.bf16.mxu0 %v2310_v30 }
 0xa60   : > { %v1625_v33 = vsub.f32 %v2710_v20, %v1621_v31  ;;  %v1622_v34 = vmul.f32 0.015625, %v1614_v32  ;;  %2239 = vmatpush3.bf16.msra.mxu0 %v2310_v30  ;;  %v2311_v31 = vld [vmem:[%s2811_s10 + $0x28] sm:$0xff]   ;;  %v2312_v32 = vld [vmem:[%s2811_s10 + $0x30] sm:$0xff]  }
 0xa61   : > { %v1620_v35 = vpop.xlane.xlu1 %1619  ;;  %2240 = vmatprep.subr.bf16.mxu0 %v2311_v31 }
 0xa62   : > { %v1626_v36 = vsub.f32 %v2715_v24, %v1622_v34  ;;  %v1624_v8 = vmul.f32 0.015625, %v1620_v35  ;;  %v1629_v37 = vmul.f32 %v1625_v33, %v1625_v33  ;;  %v2050_v34 = vld [vmem:[%s2810_s9] ss:$0 sm:$0xff] }
 0xa63   : > { %v1617_v38 = vpop.xlane.xlu0 %1616 }
 0xa64   : > { %v1628_v39 = vsub.f32 %v2713_v23, %v1624_v8  ;;  %v1623_v40 = vmul.f32 0.015625, %v1617_v38  ;;  %v1633_v41 = vsel %vm421_vm0, %v1629_v37, 0.0  ;;  %v1630_v42 = vmul.f32 %v1626_v36, %v1626_v36  ;;  %2241 = vmatpush3.bf16.msra.mxu0 %v2311_v31 }
 0xa65   : > { %1634 = vadd.xlane.f32.xlu0 %v1633_v41  ;;  %2242 = vmatprep.subr.bf16.mxu0 %v2312_v32 }
 0xa66   : > { %v1627_v43 = vsub.f32 %v2719_v26, %v1623_v40  ;;  %v1636_v14 = vsel %vm421_vm0, %v1630_v42, 0.0  ;;  %v1632_v44 = vmul.f32 %v1628_v39, %v1628_v39 }
 0xa67   : > { %1637 = vadd.xlane.f32.xlu1 %v1636_v14 }
 0xa68   : > { %v1631_v45 = vmul.f32 %v1627_v43, %v1627_v43  ;;  %v1642_v46 = vsel %vm421_vm0, %v1632_v44, 0.0  ;;  %2243 = vmatpush3.bf16.msra.mxu0 %v2312_v32 }
 0xa6a   : > { %v1639_v47 = vsel %vm421_vm0, %v1631_v45, 0.0 }
 0xa6b   : > { %1643 = vadd.xlane.f32.xlu1 %v1642_v46  ;;  %1640 = vadd.xlane.f32.xlu0 %v1639_v47 }
 0xaf2   : > { %v1635_v52 = vpop.xlane.xlu0 %1634 }
 0xaf3   : > { %v1645_v16 = vmul.f32 0.015625, %v1635_v52 }
 0xaf4   : > { %v1638_v53 = vpop.xlane.xlu1 %1637 }
 0xaf5   : > { %v1649_v54 = vadd.f32 1e-05, %v1645_v16  ;;  %v1646_v10 = vmul.f32 0.015625, %v1638_v53 }
 0xaf7   : > { %2386 = vrsqrt.f32 %v1649_v54  ;;  %v1650_v55 = vadd.f32 1e-05, %v1646_v10 }
 0xaf8   : > { %v1644_v56 = vpop.xlane.xlu1 %1643  ;;  %v1641_v57 = vpop.xlane.xlu0 %1640 }
 0xaf9   : > { %2388 = vrsqrt.f32 %v1650_v55  ;;  %v1648_v58 = vmul.f32 0.015625, %v1644_v56  ;;  %v1647_v59 = vmul.f32 0.015625, %v1641_v57 }
 0xafb   : > { %v1652_v60 = vadd.f32 1e-05, %v1648_v58  ;;  %v1651_v61 = vadd.f32 1e-05, %v1647_v59 }
 0xafd   : > { %2390 = vrsqrt.f32 %v1652_v60 }
 0xafe   : > { %2392 = vrsqrt.f32 %v1651_v61 }
 0xb01   : > { %v2387_v62 = vpop.eup %2386 }
 0xb02   : > { %v1657_v0 = vmul.f32 %v2387_v62, %v1625_v33  ;;  %v2313_v33 = vld [vmem:[%s2811_s10 + $0x38] sm:$0xff]  }
 0xb03   : > { %v2389_v1 = vpop.eup %2388  ;;  %2244 = vmatprep.subr.bf16.mxu0 %v2313_v33 }
 0xb04   : > { %v1658_v2 = vmul.f32 %v2389_v1, %v1626_v36  ;;  %v1667_v3 = vmul.f32 %v2048_v63, %v1657_v0  ;;  %2245 = vmatpush3.bf16.msra.mxu0 %v2313_v33 }
 0xb06   : > { %v1668_v5 = vmul.f32 %v2048_v63, %v1658_v2  ;;  %v1677_v11 = vadd.f32 %v2049_v4, %v1667_v3 }
 0xb07   : > { %v2391_v6 = vpop.eup %2390 }
 0xb08   : > { %v2393_v7 = vpop.eup %2392  ;;  %v1660_v9 = vmul.f32 %v2391_v6, %v1628_v39  ;;  %v1678_v12 = vadd.f32 %v2049_v4, %v1668_v5 }
 0xb09   : > { %v1659_v13 = vmul.f32 %v2393_v7, %v1627_v43 }
 0xb0a   : > { %v1670_v15 = vmul.f32 %v2048_v63, %v1660_v9  ;;  %v1681_v17 = vpack.c.bf16 %v1678_v12, %v1677_v11 }
 0xb0b   : > { %v1669_v18 = vmul.f32 %v2048_v63, %v1659_v13 }
 0xb0c   : > { %2226 = vmatprep.mubr.msk.bf16.mxu1 %vm421_vm0, %v1681_v17  ;;  %v1680_v19 = vadd.f32 %v2049_v4, %v1670_v15  ;;  %v2057_v17 = vld [vmem:[%s2812_s11] ss:$0 sm:$0xff] }
 0xb0d   : > { %v1679_v21 = vadd.f32 %v2049_v4, %v1669_v18 }
 0xb0f   : > { %v1682_v22 = vpack.c.bf16 %v1680_v19, %v1679_v21 }
 0xb11   : > { %2227 = vmatmul.mubr.msk.bf16.vlgmr.msra.gmra.mrb[28].mxu1 %vm421_vm0, %v1682_v22 }
 0xbe4   : > { %v2228_v35 = vpop.f32.mrb[28].mxu1 }
 0xbe5   : > { %v1771_v36 = vadd.f32 %v2228_v35, %v2050_v34  ;;  %v1762_v8 = vpop.f32.mrb[29].mxu1 }
 0xbe6   : > { %v1763_v37 = vadd.f32 %v2050_v34, %v1762_v8  ;;  %v2229_v38 = vpop.f32.mrb[30].mxu1 }
 0xbe7   : > { %v1779_v39 = vmul.f32 %v1771_v36, %v1771_v36  ;;  %v1774_v40 = vadd.f32 %v2229_v38, %v2050_v34  ;;  %v1765_v41 = vpop.f32.mrb[31].mxu1 }
 0xbe8   : > { %v1777_v42 = vmul.f32 %v1763_v37, %v1763_v37  ;;  %v1766_v43 = vadd.f32 %v2050_v34, %v1765_v41 }
 0xbe9   : > { %v1783_v14 = vmul.f32 %v1779_v39, %v1771_v36  ;;  %v1780_v44 = vmul.f32 %v1774_v40, %v1774_v40 }
 0xbea   : > { %v1781_v45 = vmul.f32 %v1777_v42, %v1763_v37  ;;  %v1778_v46 = vmul.f32 %v1766_v43, %v1766_v43 }
 0xbeb   : > { %v1787_v47 = vmul.f32 0.044715, %v1783_v14  ;;  %v1784_v48 = vmul.f32 %v1780_v44, %v1774_v40 }
 0xbec   : > { %v1785_v49 = vmul.f32 0.044715, %v1781_v45  ;;  %v1782_v50 = vmul.f32 %v1778_v46, %v1766_v43 }
 0xbed   : > { %v1791_v51 = vadd.f32 %v1787_v47, %v1771_v36  ;;  %v1788_v52 = vmul.f32 0.044715, %v1784_v48 }
 0xbee   : > { %v1789_v16 = vadd.f32 %v1785_v49, %v1763_v37  ;;  %v1786_v53 = vmul.f32 0.044715, %v1782_v50 }
 0xbef   : > { %v1795_v54 = vmul.f32 0.7978846, %v1791_v51  ;;  %v1792_v10 = vadd.f32 %v1788_v52, %v1774_v40 }
 0xbf0   : > { %v1793_v55 = vmul.f32 0.7978846, %v1789_v16  ;;  %v1790_v56 = vadd.f32 %v1786_v53, %v1766_v43 }
 0xbf1   : > { %2394 = vtanh.f32 %v1795_v54  ;;  %v1796_v57 = vmul.f32 0.7978846, %v1792_v10 }
 0xbf2   : > { %2396 = vtanh.f32 %v1793_v55  ;;  %v1794_v58 = vmul.f32 0.7978846, %v1790_v56 }
 0xbf3   : > { %2398 = vtanh.f32 %v1796_v57 }
 0xbf4   : > { %2400 = vtanh.f32 %v1794_v58 }
 0xbfb   : > { %v2395_v59 = vpop.eup %2394 }
 0xbfc   : > { %v2397_v60 = vpop.eup %2396  ;;  %v1803_v61 = vadd.f32 1.0, %v2395_v59 }
 0xbfd   : > { %v2399_v62 = vpop.eup %2398  ;;  %v1801_v63 = vadd.f32 1.0, %v2397_v60 }
 0xbfe   : > { %v2401_v0 = vpop.eup %2400  ;;  %v1807_v1 = vmul.f32 0.5, %v1803_v61  ;;  %v1804_v2 = vadd.f32 1.0, %v2399_v62 }
 0xbff   : > { %v1802_v3 = vadd.f32 1.0, %v2401_v0  ;;  %v1805_v4 = vmul.f32 0.5, %v1801_v63 }
 0xc00   : > { %v1808_v5 = vmul.f32 0.5, %v1804_v2  ;;  %v1811_v7 = vmul.f32 %v1807_v1, %v1771_v36 }
 0xc01   : > { %v1806_v6 = vmul.f32 0.5, %v1802_v3  ;;  %v1809_v11 = vmul.f32 %v1805_v4, %v1763_v37 }
 0xc02   : > { %v1812_v9 = vmul.f32 %v1808_v5, %v1774_v40 }
 0xc03   : > { %v1810_v12 = vmul.f32 %v1806_v6, %v1766_v43 }
 0xc04   : > { %v1814_v13 = vpack.c.bf16 %v1812_v9, %v1811_v7 }
 0xc05   : > { %v1813_v15 = vpack.c.bf16 %v1810_v12, %v1809_v11 }
 0xc07   : > { %2246 = vmatprep.mubr.bf16.mxu0 %v1813_v15 }
 0xc08   : > { %2247 = vmatmul.mubr.bf16.vlgmr.msra.gmra.mrb[16].mxu0 %v1814_v13 }
 0xcdb   : > { %v2248_v18 = vpop.f32.mrb[16].mxu0 }
 0xcdc   : > { %v1929_v19 = vadd.f32 %v2248_v18, %v2057_v17  ;;  %v1920_v21 = vpop.f32.mrb[17].mxu0 }
 0xcdd   : > { %v1921_v22 = vadd.f32 %v2057_v17, %v1920_v21  ;;  %v2249_v25 = vpop.f32.mrb[18].mxu0 }
 0xcde   : > { %v1937_v27 = vadd.f32 %v1929_v19, %v2719_v26  ;;  %v1932_v28 = vadd.f32 %v2249_v25, %v2057_v17  ;;  %v1923_v29 = vpop.f32.mrb[19].mxu0 }
 0xcdf   : > { %v1935_v30 = vadd.f32 %v1921_v22, %v2710_v20  ;;  %v1924_v31 = vadd.f32 %v2057_v17, %v1923_v29 }
 0xce0   : > { %1941 = vst.msk [vmem:[%s413_s24 + $0x10] sm:$0xff] %vm421_vm0, %v1937_v27  ;;  %v1938_v32 = vadd.f32 %v1932_v28, %v2713_v23 }
 0xce1   : > { %1939 = vst.msk [vmem:[%s413_s24] sm:$0xff] %vm421_vm0, %v1935_v30  ;;  %v1936_v33 = vadd.f32 %v1924_v31, %v2715_v24 }
 0xce2   : > { %1942 = vst.msk [vmem:[%s413_s24 + $0x18] sm:$0xff] %vm421_vm0, %v1938_v32 }
 0xce3   : > { %1940 = vst.msk [vmem:[%s413_s24 + $0x8] sm:$0xff] %vm421_vm0, %v1936_v33 }
 0xce4 PF: > { %s22_s21 = sadd.s32 1, %s2412_s21  }
 0xce5   : > { %p19_p4 = scmp.ge.s32.totalorder %s22_s21, 4  }
 0xce7   :  { %21 = sbr.rel (!%p19_p4) target bundleno = 1 (0x1), region = 98 }

</bundles_post_ra>
